<compile_context>
chip_gen: v7x
topology: tpu7x:2x2x1
jax: 0.10.0
libtpu: 0.0.40
codegen_flags: <defaults>
</compile_context>

<pallas_src>
import functools
import math

import numpy as np
import jax
import jax.numpy as jnp
from jax.experimental import pallas as pl
from jax.experimental.pallas import tpu as pltpu


# ----------------------------------------------------------------------------
# Pallas kernel: one full FastformerLayer (attention residual + boom residual)
# for a single (batch, seq-tile) grid step.
# ----------------------------------------------------------------------------
def _fastformer_layer_kernel(
    x_ref, mask_ref,
    ln1_g_ref, ln1_b_ref, w_proj_ref, red_q_ref, red_k_ref,
    ln2_g_ref, ln2_b_ref, w_boom_ref, w_unboom_ref,
    e_sum_ref, e_bcast_ref, band_prev_ref, band_cur_ref,
    out_ref,
    cq_s_ref, cq_z_ref, ck_s_ref, ck_z_ref,
    *, hidden, n_heads, head_size, rescale):
  t = pl.program_id(1)

  # Reset the carried window state at the start of each batch element's sweep.
  @pl.when(t == 0)
  def _():
    cq_s_ref[...] = jnp.zeros_like(cq_s_ref)
    cq_z_ref[...] = jnp.zeros_like(cq_z_ref)
    ck_s_ref[...] = jnp.zeros_like(ck_s_ref)
    ck_z_ref[...] = jnp.zeros_like(ck_z_ref)

  nh = n_heads
  x = x_ref[0]                    # (TS, H)   fp32
  mask = mask_ref[0]              # (TS, 1)   additive mask ((1-m)*-10000)
  e_sum = e_sum_ref[...]          # (H, nh)   head-membership indicator
  e_bc = e_bcast_ref[...]         # (nh, H)   broadcast-back indicator
  band_p = band_prev_ref[...]     # (TS, TS)  window band over previous tile
  band_c = band_cur_ref[...]      # (TS, TS)  window band over current tile

  def layernorm(v, g, b):
    mu = jnp.mean(v, axis=-1, keepdims=True)
    var = jnp.mean((v - mu) ** 2, axis=-1, keepdims=True)
    return (v - mu) * jax.lax.rsqrt(var + 1e-5) * g + b

  def additive_attn(v, red_mat, s_carry, z_carry):
    # Fused per-head reductions: [sum(v) | sum(v * lvn)] in one fp32 MXU pass.
    red = jnp.dot(v, red_mat, preferred_element_type=jnp.float32)   # (TS, 2nh)
    sum_v = red[:, :nh]
    raw_attn = red[:, nh:]
    sum_v2 = jnp.dot(v * v, e_sum, preferred_element_type=jnp.float32)
    mean_h = sum_v * (1.0 / head_size)
    # unbiased variance via sum(v^2) - n*mean^2  (fp32; validated vs reference)
    var_h = (sum_v2 - mean_h * sum_v) * (1.0 / (head_size - 1))
    a_h = pl.reciprocal(jnp.sqrt(var_h) + 1e-5)       # 1/(std + eps), (TS, nh)
    # real_norm(lvn) sums to zero per head, so sum(xn*lvn) == a_h*sum(v*lvn).
    attn_h = jnp.exp(a_h * raw_attn * (rescale / head_size) + mask)  # (TS, nh)
    # attn_full * xn  ==  v * p_full - q_full  with p = attn*a, q = p*mean.
    p_h = attn_h * a_h
    q_h = p_h * mean_h
    # TODO(synk): these nh->H broadcasts could move off the MXU entirely via
    # lane replication; kept as fp32 matmuls for exactness/lowering safety.
    p_full = jnp.dot(p_h, e_bc, preferred_element_type=jnp.float32)
    q_full = jnp.dot(q_h, e_bc, preferred_element_type=jnp.float32)
    ax = v * p_full - q_full                                          # (TS, H)
    # Windowed prefix sums over [previous tile ; current tile] via two (TS,TS)
    # bands (no concatenate copies).  z stays at per-head (nh) width.
    s = (jnp.dot(band_p, s_carry[...], preferred_element_type=jnp.float32)
         + jnp.dot(band_c, ax, preferred_element_type=jnp.float32))
    z_h = (jnp.dot(band_p, z_carry[...], preferred_element_type=jnp.float32)
           + jnp.dot(band_c, attn_h, preferred_element_type=jnp.float32))
    inv_full = jnp.dot(pl.reciprocal(z_h + 1e-5, approx=True), e_bc,
                       preferred_element_type=jnp.float32)            # (TS, H)
    # carry the current tile's state for the next sequence tile
    s_carry[...] = ax
    z_carry[...] = attn_h
    return s * inv_full

  # ---- FastSelfAttention ----
  xn1 = layernorm(x, ln1_g_ref[...], ln1_b_ref[...])
  proj = jnp.dot(xn1.astype(jnp.bfloat16), w_proj_ref[...],
                 preferred_element_type=jnp.float32)                  # (TS, 3H)
  q = proj[:, :hidden]
  k = proj[:, hidden:2 * hidden]
  v = proj[:, 2 * hidden:]
  pooled_q = additive_attn(q, red_q_ref[...], cq_s_ref, cq_z_ref)
  pooled_k = additive_attn(pooled_q * k, red_k_ref[...], ck_s_ref, ck_z_ref)
  x = x + pooled_k * v            # residual

  # ---- Boom (FFN) ----
  xb = layernorm(x, ln2_g_ref[...], ln2_b_ref[...])
  h = jnp.dot(xb.astype(jnp.bfloat16), w_boom_ref[...],
              preferred_element_type=jnp.float32)                     # (TS, 4H)
  # exact GELU (erf-based, matching nn.GELU default)
  h = 0.5 * h * (1.0 + jax.lax.erf(h * (1.0 / math.sqrt(2.0))))
  h2 = jnp.dot(h.astype(jnp.bfloat16), w_unboom_ref[...],
               preferred_element_type=jnp.float32)
  out_ref[0] = x + h2


def fastformer_layer_pallas(x, mask_add, lp, consts, *, hidden, n_heads,
                            head_size, rescale, seq_tile, vmem_limit):
  B, S, H = x.shape
  nh = n_heads
  TS = seq_tile
  assert S % TS == 0, "seq_tile must divide sequence length"
  n_seq = S // TS

  kern = functools.partial(_fastformer_layer_kernel, hidden=hidden,
                           n_heads=nh, head_size=head_size, rescale=rescale)

  def build(single_buffer_consts):
    if single_buffer_consts:
      # Constant-index blocks are fetched once; single-buffer them so the
      # weights do not burn 2x VMEM for nothing.
      const = lambda shape: pl.BlockSpec(shape, lambda b, t: (0,) * len(shape),
                                         pipeline_mode=pl.Buffered(1))
    else:
      const = lambda shape: pl.BlockSpec(shape, lambda b, t: (0,) * len(shape))
    return pl.pallas_call(
        kern,
        out_shape=jax.ShapeDtypeStruct((B, S, H), jnp.float32),
        grid=(B, n_seq),
        in_specs=[
            pl.BlockSpec((1, TS, H), lambda b, t: (b, t, 0)),   # x tile
            pl.BlockSpec((1, TS, 1), lambda b, t: (b, t, 0)),   # additive mask
            const((1, H)),             # ln1 gamma
            const((1, H)),             # ln1 beta
            const((H, 3 * H)),         # W_proj   (bf16)
            const((H, 2 * nh)),        # fused [e_sum | lvn_q * e_sum]
            const((H, 2 * nh)),        # fused [e_sum | lvn_k * e_sum]
            const((1, H)),             # ln2 gamma
            const((1, H)),             # ln2 beta
            const((H, 4 * H)),         # W_boom   (bf16)
            const((4 * H, H)),         # W_unboom (bf16)
            const((H, nh)),            # head-sum indicator
            const((nh, H)),            # head-broadcast indicator
            const((TS, TS)),           # window band over previous tile
            const((TS, TS)),           # window band over current tile
        ],
        out_specs=pl.BlockSpec((1, TS, H), lambda b, t: (b, t, 0)),
        scratch_shapes=[
            pltpu.VMEM((TS, H), jnp.float32),   # carry: attn1*xn1 (prev tile)
            pltpu.VMEM((TS, nh), jnp.float32),  # carry: attn1     (prev tile)
            pltpu.VMEM((TS, H), jnp.float32),   # carry: attn2*xn2 (prev tile)
            pltpu.VMEM((TS, nh), jnp.float32),  # carry: attn2     (prev tile)
        ],
        compiler_params=pltpu.CompilerParams(
            dimension_semantics=("parallel", "arbitrary"),
            vmem_limit_bytes=vmem_limit),
    )

  args = (x, mask_add,
          lp["ln1_g"], lp["ln1_b"], lp["w_proj"], lp["red_q"], lp["red_k"],
          lp["ln2_g"], lp["ln2_b"], lp["w_boom"], lp["w_unboom"],
          consts["e_sum"], consts["e_bcast"],
          consts["band_prev"], consts["band_cur"])
  try:
    return build(True)(*args)
  except Exception:
    # Fallback for JAX builds that reject pipeline_mode=pl.Buffered(1).
    return build(False)(*args)


# ----------------------------------------------------------------------------
# Glue (plain JAX): mask transform, position embeddings, per-layer constants.
# ----------------------------------------------------------------------------
def _chip_defaults():
  """(vmem_limit_bytes, seq_tile_target) per TPU generation."""
  kind = ""
  try:
    kind = jax.devices()[0].device_kind.lower()
  except Exception:
    pass
  if "v7" in kind:                     # 64 MiB VMEM per TensorCore
    return 48 * 1024 * 1024, 256
  if "v5" in kind or "v6" in kind:     # 128 MiB VMEM
    return 100 * 1024 * 1024, 512
  return 64 * 1024 * 1024, 256


def _normalize_learned_vector(lv, head_size, hidden):
  # torch real_norm with unbiased std, flattened back to (1, hidden)
  mu = lv.mean(axis=-1, keepdims=True)
  std = jnp.sqrt(((lv - mu) ** 2).sum(axis=-1, keepdims=True) / (head_size - 1))
  return ((lv - mu) / (std + 1e-5)).reshape(1, hidden)


def _reduction_matrix(lv, e_sum, head_size, hidden):
  """Fused per-head reduction matrix [e_sum | diag(lvn) @ e_sum], (H, 2*nh)."""
  lvn = _normalize_learned_vector(lv, head_size, hidden)        # (1, H)
  return jnp.concatenate([e_sum, lvn.reshape(hidden, 1) * e_sum], axis=1)


def _choose_seq_tile(S, window, target):
  """Largest seq tile <= target that divides S, is a multiple of 8 and covers
  the window (so a single previous-tile carry suffices).  A whole-sequence
  tile (n_seq == 1) is always valid, so short sequences just use S."""
  if S <= target:
    return S
  for ts in range(target, 7, -1):
    if S % ts == 0 and ts % 8 == 0 and ts >= window:
      return ts
  # TODO(synk): a ring carry of ceil(window/TS) previous tiles would lift the
  # ts >= window requirement; until then fail loudly instead of silently
  # falling back to a whole-sequence tile that may not fit in VMEM.
  raise ValueError(
      f"no sequence tile <= {target} divides seq_len={S} and covers "
      f"window={window}")


def _band_slabs(seq_tile, window):
  """band_prev[i, j]: contribution of previous-tile row j to output row i;
  band_cur[i, j]: contribution of current-tile row j (window (i-w, i])."""
  i = np.arange(seq_tile)[:, None]
  j = np.arange(seq_tile)[None, :]
  prev = (j > seq_tile + i - window)
  cur = (j <= i) & (j > i - window)
  return (jnp.asarray(prev.astype(np.float32)),
          jnp.asarray(cur.astype(np.float32)))


def _head_indicators(hidden, n_heads, head_size):
  e = np.zeros((hidden, n_heads), dtype=np.float32)
  for h in range(n_heads):
    e[h * head_size:(h + 1) * head_size, h] = 1.0
  return jnp.asarray(e), jnp.asarray(e.T)


def fastformer_decoder_forward(input_embs, attention_mask, params, cfg):
  hidden, n_heads = cfg["hidden_size"], cfg["n_heads"]
  head_size = hidden // n_heads
  B, S, H = input_embs.shape
  vmem_limit, tile_target = _chip_defaults()

  mask_add = ((1.0 - attention_mask.astype(jnp.float32)) * -10000.0)[:, :, None]
  pos = params["pos_emb"][:S][None, :, :]
  x = (input_embs + pos).astype(jnp.float32)        # dropout -> identity

  e_sum, e_bcast = _head_indicators(hidden, n_heads, head_size)
  for layer_p, window in zip(params["layers"], cfg["window_sizes"]):
    ts = _choose_seq_tile(S, window, tile_target)
    band_prev, band_cur = _band_slabs(ts, window)
    lp = {
        "ln1_g": layer_p["ln1_g"], "ln1_b": layer_p["ln1_b"],
        "ln2_g": layer_p["ln2_g"], "ln2_b": layer_p["ln2_b"],
        # bf16 weights for the big MXU matmuls (fp32 accumulation in-kernel)
        "w_proj": layer_p["w_proj"].astype(jnp.bfloat16),
        "w_boom": layer_p["w_boom"].astype(jnp.bfloat16),
        "w_unboom": layer_p["w_unboom"].astype(jnp.bfloat16),
        "red_q": _reduction_matrix(layer_p["q_attn"], e_sum, head_size, hidden),
        "red_k": _reduction_matrix(layer_p["k_attn"], e_sum, head_size, hidden),
    }
    consts = {"e_sum": e_sum, "e_bcast": e_bcast,
              "band_prev": band_prev, "band_cur": band_cur}
    x = fastformer_layer_pallas(x, mask_add, lp, consts,
                                hidden=hidden, n_heads=n_heads,
                                head_size=head_size, rescale=cfg["rescale"],
                                seq_tile=ts, vmem_limit=vmem_limit)
  return x


# ----------------------------------------------------------------------------
# Pure-JAX reference (mirrors the PyTorch code literally) for validation.
# ----------------------------------------------------------------------------
def _ref_layernorm(x, g, b):
  mu = x.mean(-1, keepdims=True)
  var = ((x - mu) ** 2).mean(-1, keepdims=True)
  return (x - mu) / jnp.sqrt(var + 1e-5) * g + b


def _ref_real_norm(x):
  mu = x.mean(-1, keepdims=True)
  std = jnp.sqrt(((x - mu) ** 2).sum(-1, keepdims=True) / (x.shape[-1] - 1))
  return (x - mu) / (std + 1e-5)


def _ref_window_align(x, w):
  cl = x.at[:, -w:].set(0.0)
  return jnp.roll(cl, w, axis=1)


def _ref_additive(x, lv, mask, n_heads, head_size, rescale, window):
  B, S, H = x.shape
  xr = x.reshape(B, S, n_heads, head_size)
  xn = _ref_real_norm(xr)
  lvn = _ref_real_norm(lv)
  attn = (xn * lvn).sum(-1) / head_size * rescale
  attn = attn + mask
  attn = jnp.exp(attn)[..., None]
  s = jnp.cumsum(attn * xn, axis=1)
  s = s - _ref_window_align(s, window)
  z = jnp.cumsum(attn, axis=1)
  z = z - _ref_window_align(z, window)
  return (s / (z + 1e-5)).reshape(B, S, H)


def _ref_decoder(input_embs, attention_mask, params, cfg):
  hidden, n_heads = cfg["hidden_size"], cfg["n_heads"]
  head_size = hidden // n_heads
  B, S, H = input_embs.shape
  mask = ((1.0 - attention_mask.astype(jnp.float32)) * -10000.0)[:, :, None]
  x = input_embs + params["pos_emb"][:S][None]
  for p, window in zip(params["layers"], cfg["window_sizes"]):
    xn = _ref_layernorm(x, p["ln1_g"], p["ln1_b"])
    proj = xn @ p["w_proj"]
    q, k, v = jnp.split(proj, 3, axis=-1)
    pq = _ref_additive(q, p["q_attn"], mask, n_heads, head_size,
                       cfg["rescale"], window)
    pk = _ref_additive(pq * k, p["k_attn"], mask, n_heads, head_size,
                       cfg["rescale"], window)
    x = x + pk * v
    xb = _ref_layernorm(x, p["ln2_g"], p["ln2_b"])
    h = xb @ p["w_boom"]
    h = 0.5 * h * (1.0 + jax.lax.erf(h / math.sqrt(2.0)))
    x = x + h @ p["w_unboom"]
  return x


# ----------------------------------------------------------------------------
# Deterministic parameter init + demo
# ----------------------------------------------------------------------------
def init_params(key, cfg):
  hidden, n_heads = cfg["hidden_size"], cfg["n_heads"]
  head_size = hidden // n_heads
  init_range = cfg["initializer_range"]
  keys = jax.random.split(key, 1 + 5 * cfg["n_layer"])
  params = {"pos_emb": jax.random.normal(keys[0], (cfg["n_positions"], hidden),
                                         jnp.float32) * 0.02,
            "layers": []}
  ki = 1
  for _ in range(cfg["n_layer"]):
    layer = {
        "ln1_g": jnp.ones((1, hidden), jnp.float32),
        "ln1_b": jnp.zeros((1, hidden), jnp.float32),
        "w_proj": jax.random.normal(keys[ki], (hidden, 3 * hidden), jnp.float32) * 0.02,
        "q_attn": jax.random.normal(keys[ki + 1], (n_heads, head_size), jnp.float32) * init_range,
        "k_attn": jax.random.normal(keys[ki + 2], (n_heads, head_size), jnp.float32) * init_range,
        "ln2_g": jnp.ones((1, hidden), jnp.float32),
        "ln2_b": jnp.zeros((1, hidden), jnp.float32),
        "w_boom": jax.random.normal(keys[ki + 3], (hidden, 4 * hidden), jnp.float32) * 0.02,
        "w_unboom": jax.random.normal(keys[ki + 4], (4 * hidden, hidden), jnp.float32) * 0.02,
    }
    params["layers"].append(layer)
    ki += 5
  return params


if __name__ == "__main__":
  cfg = {
      "hidden_size": 32,
      "n_heads": 4,
      "n_layer": 2,
      "window_sizes": (4, 8),
      "n_positions": 16,
      "rescale": 4.0,
      "initializer_range": 0.02,
      "hidden_dropout_prob": 0.0,   # dropout treated as identity (eval mode)
  }
  B, S = 2, 8

  root = jax.random.PRNGKey(0)
  k_emb, k_param = jax.random.split(root)
  input_embs = jax.random.normal(k_emb, (B, S, cfg["hidden_size"]), jnp.float32)
  attention_mask = jnp.ones((B, S), jnp.float32).at[1, 6:].set(0.0)
  params = init_params(k_param, cfg)

  out = fastformer_decoder_forward(input_embs, attention_mask, params, cfg)
  out = jax.block_until_ready(out)

  # fp32 reference; tolerance accounts for bf16 matmul operands + approx
  # reciprocal of the windowed-softmax denominator in the kernel.
  ref = _ref_decoder(input_embs, attention_mask, params, cfg)
  np.testing.assert_allclose(np.asarray(out), np.asarray(ref),
                             rtol=1e-2, atol=5e-3)
  print("KERNEL_OK")
</pallas_src>

<mosaic_0001>
module attributes {stable_mosaic.version = 11 : i64} {
  func.func @_fastformer_layer_kernel(%arg0: i32, %arg1: i32, %arg2: memref<1x8x32xf32, #tpu.memory_space<vmem>>, %arg3: memref<1x8x1xf32, #tpu.memory_space<vmem>>, %arg4: memref<1x32xf32, #tpu.memory_space<vmem>>, %arg5: memref<1x32xf32, #tpu.memory_space<vmem>>, %arg6: memref<32x96xbf16, #tpu.memory_space<vmem>>, %arg7: memref<32x8xf32, #tpu.memory_space<vmem>>, %arg8: memref<32x8xf32, #tpu.memory_space<vmem>>, %arg9: memref<1x32xf32, #tpu.memory_space<vmem>>, %arg10: memref<1x32xf32, #tpu.memory_space<vmem>>, %arg11: memref<32x128xbf16, #tpu.memory_space<vmem>>, %arg12: memref<128x32xbf16, #tpu.memory_space<vmem>>, %arg13: memref<32x4xf32, #tpu.memory_space<vmem>>, %arg14: memref<4x32xf32, #tpu.memory_space<vmem>>, %arg15: memref<8x8xf32, #tpu.memory_space<vmem>>, %arg16: memref<8x8xf32, #tpu.memory_space<vmem>>, %arg17: memref<1x8x32xf32, #tpu.memory_space<vmem>>, %arg18: memref<8x32xf32, #tpu.memory_space<vmem>>, %arg19: memref<8x4xf32, #tpu.memory_space<vmem>>, %arg20: memref<8x32xf32, #tpu.memory_space<vmem>>, %arg21: memref<8x4xf32, #tpu.memory_space<vmem>>) attributes {dimension_semantics = [#tpu.dimension_semantics<parallel>, #tpu.dimension_semantics<arbitrary>], iteration_bounds = array<i64: 2, 1>, scalar_prefetch = 0 : i64, scratch_operands = 4 : i64, tpu.core_type = #tpu.core_type<tc>, window_params = [{transform_indices = @transform_0, window_bounds = array<i64: 1, 8, 32>}, {transform_indices = @transform_1, window_bounds = array<i64: 1, 8, 1>}, {pipeline_mode = #tpu.pipeline_mode<synchronous>, transform_indices = @transform_2, window_bounds = array<i64: 1, 32>}, {pipeline_mode = #tpu.pipeline_mode<synchronous>, transform_indices = @transform_3, window_bounds = array<i64: 1, 32>}, {pipeline_mode = #tpu.pipeline_mode<synchronous>, transform_indices = @transform_4, window_bounds = array<i64: 32, 96>}, {pipeline_mode = #tpu.pipeline_mode<synchronous>, transform_indices = @transform_5, window_bounds = array<i64: 32, 8>}, {pipeline_mode = #tpu.pipeline_mode<synchronous>, transform_indices = @transform_6, window_bounds = array<i64: 32, 8>}, {pipeline_mode = #tpu.pipeline_mode<synchronous>, transform_indices = @transform_7, window_bounds = array<i64: 1, 32>}, {pipeline_mode = #tpu.pipeline_mode<synchronous>, transform_indices = @transform_8, window_bounds = array<i64: 1, 32>}, {pipeline_mode = #tpu.pipeline_mode<synchronous>, transform_indices = @transform_9, window_bounds = array<i64: 32, 128>}, {pipeline_mode = #tpu.pipeline_mode<synchronous>, transform_indices = @transform_10, window_bounds = array<i64: 128, 32>}, {pipeline_mode = #tpu.pipeline_mode<synchronous>, transform_indices = @transform_11, window_bounds = array<i64: 32, 4>}, {pipeline_mode = #tpu.pipeline_mode<synchronous>, transform_indices = @transform_12, window_bounds = array<i64: 4, 32>}, {pipeline_mode = #tpu.pipeline_mode<synchronous>, transform_indices = @transform_13, window_bounds = array<i64: 8, 8>}, {pipeline_mode = #tpu.pipeline_mode<synchronous>, transform_indices = @transform_14, window_bounds = array<i64: 8, 8>}, {transform_indices = @transform_15, window_bounds = array<i64: 1, 8, 32>}]} {
    %c0_i32 = arith.constant 0 : i32
    %0 = arith.cmpi eq, %arg1, %c0_i32 : i32
    %1 = arith.extui %0 : i1 to i32
    %c0_i32_0 = arith.constant 0 : i32
    %2 = arith.cmpi ne, %1, %c0_i32_0 : i32
    scf.if %2 {
      %cst_94 = arith.constant 0.000000e+00 : f32
      %172 = vector.broadcast %cst_94 : f32 to vector<8x32xf32>
      %c0_95 = arith.constant 0 : index
      %c0_96 = arith.constant 0 : index
      %173 = vector.load %arg18[%c0_95, %c0_96] : memref<8x32xf32, #tpu.memory_space<vmem>>, vector<8x32xf32>
      tpu.vector_store %arg18[%c0_95, %c0_96], %172 {strides = array<i32>} : memref<8x32xf32, #tpu.memory_space<vmem>>, vector<8x32xf32>,
      %cst_97 = arith.constant 0.000000e+00 : f32
      %174 = vector.broadcast %cst_97 : f32 to vector<8x4xf32>
      %c0_98 = arith.constant 0 : index
      %c0_99 = arith.constant 0 : index
      %175 = vector.load %arg19[%c0_98, %c0_99] : memref<8x4xf32, #tpu.memory_space<vmem>>, vector<8x4xf32>
      tpu.vector_store %arg19[%c0_98, %c0_99], %174 {strides = array<i32>} : memref<8x4xf32, #tpu.memory_space<vmem>>, vector<8x4xf32>,
      %cst_100 = arith.constant 0.000000e+00 : f32
      %176 = vector.broadcast %cst_100 : f32 to vector<8x32xf32>
      %c0_101 = arith.constant 0 : index
      %c0_102 = arith.constant 0 : index
      %177 = vector.load %arg20[%c0_101, %c0_102] : memref<8x32xf32, #tpu.memory_space<vmem>>, vector<8x32xf32>
      tpu.vector_store %arg20[%c0_101, %c0_102], %176 {strides = array<i32>} : memref<8x32xf32, #tpu.memory_space<vmem>>, vector<8x32xf32>,
      %cst_103 = arith.constant 0.000000e+00 : f32
      %178 = vector.broadcast %cst_103 : f32 to vector<8x4xf32>
      %c0_104 = arith.constant 0 : index
      %c0_105 = arith.constant 0 : index
      %179 = vector.load %arg21[%c0_104, %c0_105] : memref<8x4xf32, #tpu.memory_space<vmem>>, vector<8x4xf32>
      tpu.vector_store %arg21[%c0_104, %c0_105], %178 {strides = array<i32>} : memref<8x4xf32, #tpu.memory_space<vmem>>, vector<8x4xf32>,
    } else {
    }
    %c0 = arith.constant 0 : index
    %c0_1 = arith.constant 0 : index
    %c0_2 = arith.constant 0 : index
    %3 = vector.load %arg2[%c0, %c0_1, %c0_2] : memref<1x8x32xf32, #tpu.memory_space<vmem>>, vector<1x8x32xf32>
    %4 = vector.shape_cast %3 : vector<1x8x32xf32> to vector<8x32xf32>
    %c0_3 = arith.constant 0 : index
    %c0_4 = arith.constant 0 : index
    %c0_5 = arith.constant 0 : index
    %5 = vector.load %arg3[%c0_3, %c0_4, %c0_5] : memref<1x8x1xf32, #tpu.memory_space<vmem>>, vector<1x8x1xf32>
    %6 = vector.shape_cast %5 : vector<1x8x1xf32> to vector<8x1xf32>
    %c0_6 = arith.constant 0 : index
    %c0_7 = arith.constant 0 : index
    %7 = vector.load %arg13[%c0_6, %c0_7] : memref<32x4xf32, #tpu.memory_space<vmem>>, vector<32x4xf32>
    %c0_8 = arith.constant 0 : index
    %c0_9 = arith.constant 0 : index
    %8 = vector.load %arg14[%c0_8, %c0_9] : memref<4x32xf32, #tpu.memory_space<vmem>>, vector<4x32xf32>
    %c0_10 = arith.constant 0 : index
    %c0_11 = arith.constant 0 : index
    %9 = vector.load %arg15[%c0_10, %c0_11] : memref<8x8xf32, #tpu.memory_space<vmem>>, vector<8x8xf32>
    %c0_12 = arith.constant 0 : index
    %c0_13 = arith.constant 0 : index
    %10 = vector.load %arg16[%c0_12, %c0_13] : memref<8x8xf32, #tpu.memory_space<vmem>>, vector<8x8xf32>
    %c0_14 = arith.constant 0 : index
    %c0_15 = arith.constant 0 : index
    %11 = vector.load %arg4[%c0_14, %c0_15] : memref<1x32xf32, #tpu.memory_space<vmem>>, vector<1x32xf32>
    %c0_16 = arith.constant 0 : index
    %c0_17 = arith.constant 0 : index
    %12 = vector.load %arg5[%c0_16, %c0_17] : memref<1x32xf32, #tpu.memory_space<vmem>>, vector<1x32xf32>
    %cst = arith.constant dense<0.000000e+00> : vector<8xf32>
    %13 = vector.multi_reduction <add>, %4, %cst [1] : vector<8x32xf32> to vector<8xf32>
    %14 = vector.shape_cast %13 : vector<8xf32> to vector<8x1xf32>
    %cst_18 = arith.constant 3.200000e+01 : f32
    %15 = vector.broadcast %cst_18 : f32 to vector<8x1xf32>
    %16 = arith.divf %14, %15 : vector<8x1xf32>
    %17 = vector.broadcast %16 : vector<8x1xf32> to vector<8x32xf32>
    %18 = arith.subf %4, %17 : vector<8x32xf32>
    %19 = arith.mulf %18, %18 : vector<8x32xf32>
    %cst_19 = arith.constant dense<0.000000e+00> : vector<8xf32>
    %20 = vector.multi_reduction <add>, %19, %cst_19 [1] : vector<8x32xf32> to vector<8xf32>
    %21 = vector.shape_cast %20 : vector<8xf32> to vector<8x1xf32>
    %cst_20 = arith.constant 3.200000e+01 : f32
    %22 = vector.broadcast %cst_20 : f32 to vector<8x1xf32>
    %23 = arith.divf %21, %22 : vector<8x1xf32>
    %24 = vector.broadcast %16 : vector<8x1xf32> to vector<8x32xf32>
    %25 = arith.subf %4, %24 : vector<8x32xf32>
    %cst_21 = arith.constant 9.99999974E-6 : f32
    %26 = vector.broadcast %cst_21 : f32 to vector<8x1xf32>
    %27 = arith.addf %23, %26 : vector<8x1xf32>
    %28 = math.rsqrt %27 : vector<8x1xf32>
    %29 = vector.broadcast %28 : vector<8x1xf32> to vector<8x32xf32>
    %30 = arith.mulf %25, %29 : vector<8x32xf32>
    %31 = vector.broadcast %11 : vector<1x32xf32> to vector<8x32xf32>
    %32 = arith.mulf %30, %31 : vector<8x32xf32>
    %33 = vector.broadcast %12 : vector<1x32xf32> to vector<8x32xf32>
    %34 = arith.addf %32, %33 : vector<8x32xf32>
    %35 = arith.truncf %34 : vector<8x32xf32> to vector<8x32xbf16>
    %c0_22 = arith.constant 0 : index
    %c0_23 = arith.constant 0 : index
    %36 = vector.load %arg6[%c0_22, %c0_23] : memref<32x96xbf16, #tpu.memory_space<vmem>>, vector<32x96xbf16>
    %cst_24 = arith.constant dense<0.000000e+00> : vector<8x96xf32>
    %37 = tpu.matmul %35, %36, %cst_24 {dimension_numbers = #tpu.dot_dimension_numbers<[1], [0], [0], [1], [0, 0, 1, 1], [], []>} : vector<8x32xbf16>, vector<32x96xbf16>, vector<8x96xf32> -> vector<8x96xf32>
    %38 = vector.extract_strided_slice %37 {offsets = [0, 0], sizes = [8, 32], strides = [1, 1]} : vector<8x96xf32> to vector<8x32xf32>
    %39 = vector.extract_strided_slice %37 {offsets = [0, 32], sizes = [8, 32], strides = [1, 1]} : vector<8x96xf32> to vector<8x32xf32>
    %40 = vector.extract_strided_slice %37 {offsets = [0, 64], sizes = [8, 32], strides = [1, 1]} : vector<8x96xf32> to vector<8x32xf32>
    %c0_25 = arith.constant 0 : index
    %c0_26 = arith.constant 0 : index
    %41 = vector.load %arg7[%c0_25, %c0_26] : memref<32x8xf32, #tpu.memory_space<vmem>>, vector<32x8xf32>
    %cst_27 = arith.constant dense<0.000000e+00> : vector<8x8xf32>
    %42 = tpu.matmul %38, %41, %cst_27 {dimension_numbers = #tpu.dot_dimension_numbers<[1], [0], [0], [1], [0, 0, 1, 1], [], []>} : vector<8x32xf32>, vector<32x8xf32>, vector<8x8xf32> -> vector<8x8xf32>
    %43 = vector.extract_strided_slice %42 {offsets = [0, 0], sizes = [8, 4], strides = [1, 1]} : vector<8x8xf32> to vector<8x4xf32>
    %44 = vector.extract_strided_slice %42 {offsets = [0, 4], sizes = [8, 4], strides = [1, 1]} : vector<8x8xf32> to vector<8x4xf32>
    %45 = arith.mulf %38, %38 : vector<8x32xf32>
    %cst_28 = arith.constant dense<0.000000e+00> : vector<8x4xf32>
    %46 = tpu.matmul %45, %7, %cst_28 {dimension_numbers = #tpu.dot_dimension_numbers<[1], [0], [0], [1], [0, 0, 1, 1], [], []>} : vector<8x32xf32>, vector<32x4xf32>, vector<8x4xf32> -> vector<8x4xf32>
    %cst_29 = arith.constant 1.250000e-01 : f32
    %47 = vector.broadcast %cst_29 : f32 to vector<8x4xf32>
    %48 = arith.mulf %43, %47 : vector<8x4xf32>
    %49 = arith.mulf %48, %43 : vector<8x4xf32>
    %50 = arith.subf %46, %49 : vector<8x4xf32>
    %cst_30 = arith.constant 0.142857149 : f32
    %51 = vector.broadcast %cst_30 : f32 to vector<8x4xf32>
    %52 = arith.mulf %50, %51 : vector<8x4xf32>
    %53 = math.sqrt %52 : vector<8x4xf32>
    %cst_31 = arith.constant 9.99999974E-6 : f32
    %54 = vector.broadcast %cst_31 : f32 to vector<8x4xf32>
    %55 = arith.addf %53, %54 : vector<8x4xf32>
    %56 = tpu.reciprocal %55 : vector<8x4xf32> -> vector<8x4xf32>
    %57 = arith.mulf %56, %44 : vector<8x4xf32>
    %cst_32 = arith.constant 5.000000e-01 : f32
    %58 = vector.broadcast %cst_32 : f32 to vector<8x4xf32>
    %59 = arith.mulf %57, %58 : vector<8x4xf32>
    %60 = vector.broadcast %6 : vector<8x1xf32> to vector<8x4xf32>
    %61 = arith.addf %59, %60 : vector<8x4xf32>
    %62 = math.exp %61 : vector<8x4xf32>
    %63 = arith.mulf %62, %56 : vector<8x4xf32>
    %64 = arith.mulf %63, %48 : vector<8x4xf32>
    %cst_33 = arith.constant dense<0.000000e+00> : vector<8x32xf32>
    %65 = tpu.matmul %63, %8, %cst_33 {dimension_numbers = #tpu.dot_dimension_numbers<[1], [0], [0], [1], [0, 0, 1, 1], [], []>} : vector<8x4xf32>, vector<4x32xf32>, vector<8x32xf32> -> vector<8x32xf32>
    %cst_34 = arith.constant dense<0.000000e+00> : vector<8x32xf32>
    %66 = tpu.matmul %64, %8, %cst_34 {dimension_numbers = #tpu.dot_dimension_numbers<[1], [0], [0], [1], [0, 0, 1, 1], [], []>} : vector<8x4xf32>, vector<4x32xf32>, vector<8x32xf32> -> vector<8x32xf32>
    %67 = arith.mulf %38, %65 : vector<8x32xf32>
    %68 = arith.subf %67, %66 : vector<8x32xf32>
    %c0_35 = arith.constant 0 : index
    %c0_36 = arith.constant 0 : index
    %69 = vector.load %arg18[%c0_35, %c0_36] : memref<8x32xf32, #tpu.memory_space<vmem>>, vector<8x32xf32>
    %cst_37 = arith.constant dense<0.000000e+00> : vector<8x32xf32>
    %70 = tpu.matmul %9, %69, %cst_37 {dimension_numbers = #tpu.dot_dimension_numbers<[1], [0], [0], [1], [0, 0, 1, 1], [], []>} : vector<8x8xf32>, vector<8x32xf32>, vector<8x32xf32> -> vector<8x32xf32>
    %cst_38 = arith.constant dense<0.000000e+00> : vector<8x32xf32>
    %71 = tpu.matmul %10, %68, %cst_38 {dimension_numbers = #tpu.dot_dimension_numbers<[1], [0], [0], [1], [0, 0, 1, 1], [], []>} : vector<8x8xf32>, vector<8x32xf32>, vector<8x32xf32> -> vector<8x32xf32>
    %72 = arith.addf %70, %71 : vector<8x32xf32>
    %c0_39 = arith.constant 0 : index
    %c0_40 = arith.constant 0 : index
    %73 = vector.load %arg19[%c0_39, %c0_40] : memref<8x4xf32, #tpu.memory_space<vmem>>, vector<8x4xf32>
    %cst_41 = arith.constant dense<0.000000e+00> : vector<8x4xf32>
    %74 = tpu.matmul %9, %73, %cst_41 {dimension_numbers = #tpu.dot_dimension_numbers<[1], [0], [0], [1], [0, 0, 1, 1], [], []>} : vector<8x8xf32>, vector<8x4xf32>, vector<8x4xf32> -> vector<8x4xf32>
    %cst_42 = arith.constant dense<0.000000e+00> : vector<8x4xf32>
    %75 = tpu.matmul %10, %62, %cst_42 {dimension_numbers = #tpu.dot_dimension_numbers<[1], [0], [0], [1], [0, 0, 1, 1], [], []>} : vector<8x8xf32>, vector<8x4xf32>, vector<8x4xf32> -> vector<8x4xf32>
    %76 = arith.addf %74, %75 : vector<8x4xf32>
    %cst_43 = arith.constant 9.99999974E-6 : f32
    %77 = vector.broadcast %cst_43 : f32 to vector<8x4xf32>
    %78 = arith.addf %76, %77 : vector<8x4xf32>
    %79 = tpu.reciprocal %78 {approx = true} : vector<8x4xf32> -> vector<8x4xf32>
    %cst_44 = arith.constant dense<0.000000e+00> : vector<8x32xf32>
    %80 = tpu.matmul %79, %8, %cst_44 {dimension_numbers = #tpu.dot_dimension_numbers<[1], [0], [0], [1], [0, 0, 1, 1], [], []>} : vector<8x4xf32>, vector<4x32xf32>, vector<8x32xf32> -> vector<8x32xf32>
    %c0_45 = arith.constant 0 : index
    %c0_46 = arith.constant 0 : index
    %81 = vector.load %arg18[%c0_45, %c0_46] : memref<8x32xf32, #tpu.memory_space<vmem>>, vector<8x32xf32>
    tpu.vector_store %arg18[%c0_45, %c0_46], %68 {strides = array<i32>} : memref<8x32xf32, #tpu.memory_space<vmem>>, vector<8x32xf32>,
    %c0_47 = arith.constant 0 : index
    %c0_48 = arith.constant 0 : index
    %82 = vector.load %arg19[%c0_47, %c0_48] : memref<8x4xf32, #tpu.memory_space<vmem>>, vector<8x4xf32>
    tpu.vector_store %arg19[%c0_47, %c0_48], %62 {strides = array<i32>} : memref<8x4xf32, #tpu.memory_space<vmem>>, vector<8x4xf32>,
    %83 = arith.mulf %72, %80 : vector<8x32xf32>
    %84 = arith.mulf %83, %39 : vector<8x32xf32>
    %c0_49 = arith.constant 0 : index
    %c0_50 = arith.constant 0 : index
    %85 = vector.load %arg8[%c0_49, %c0_50] : memref<32x8xf32, #tpu.memory_space<vmem>>, vector<32x8xf32>
    %cst_51 = arith.constant dense<0.000000e+00> : vector<8x8xf32>
    %86 = tpu.matmul %84, %85, %cst_51 {dimension_numbers = #tpu.dot_dimension_numbers<[1], [0], [0], [1], [0, 0, 1, 1], [], []>} : vector<8x32xf32>, vector<32x8xf32>, vector<8x8xf32> -> vector<8x8xf32>
    %87 = vector.extract_strided_slice %86 {offsets = [0, 0], sizes = [8, 4], strides = [1, 1]} : vector<8x8xf32> to vector<8x4xf32>
    %88 = vector.extract_strided_slice %86 {offsets = [0, 4], sizes = [8, 4], strides = [1, 1]} : vector<8x8xf32> to vector<8x4xf32>
    %89 = arith.mulf %84, %84 : vector<8x32xf32>
    %cst_52 = arith.constant dense<0.000000e+00> : vector<8x4xf32>
    %90 = tpu.matmul %89, %7, %cst_52 {dimension_numbers = #tpu.dot_dimension_numbers<[1], [0], [0], [1], [0, 0, 1, 1], [], []>} : vector<8x32xf32>, vector<32x4xf32>, vector<8x4xf32> -> vector<8x4xf32>
    %cst_53 = arith.constant 1.250000e-01 : f32
    %91 = vector.broadcast %cst_53 : f32 to vector<8x4xf32>
    %92 = arith.mulf %87, %91 : vector<8x4xf32>
    %93 = arith.mulf %92, %87 : vector<8x4xf32>
    %94 = arith.subf %90, %93 : vector<8x4xf32>
    %cst_54 = arith.constant 0.142857149 : f32
    %95 = vector.broadcast %cst_54 : f32 to vector<8x4xf32>
    %96 = arith.mulf %94, %95 : vector<8x4xf32>
    %97 = math.sqrt %96 : vector<8x4xf32>
    %cst_55 = arith.constant 9.99999974E-6 : f32
    %98 = vector.broadcast %cst_55 : f32 to vector<8x4xf32>
    %99 = arith.addf %97, %98 : vector<8x4xf32>
    %100 = tpu.reciprocal %99 : vector<8x4xf32> -> vector<8x4xf32>
    %101 = arith.mulf %100, %88 : vector<8x4xf32>
    %cst_56 = arith.constant 5.000000e-01 : f32
    %102 = vector.broadcast %cst_56 : f32 to vector<8x4xf32>
    %103 = arith.mulf %101, %102 : vector<8x4xf32>
    %104 = vector.broadcast %6 : vector<8x1xf32> to vector<8x4xf32>
    %105 = arith.addf %103, %104 : vector<8x4xf32>
    %106 = math.exp %105 : vector<8x4xf32>
    %107 = arith.mulf %106, %100 : vector<8x4xf32>
    %108 = arith.mulf %107, %92 : vector<8x4xf32>
    %cst_57 = arith.constant dense<0.000000e+00> : vector<8x32xf32>
    %109 = tpu.matmul %107, %8, %cst_57 {dimension_numbers = #tpu.dot_dimension_numbers<[1], [0], [0], [1], [0, 0, 1, 1], [], []>} : vector<8x4xf32>, vector<4x32xf32>, vector<8x32xf32> -> vector<8x32xf32>
    %cst_58 = arith.constant dense<0.000000e+00> : vector<8x32xf32>
    %110 = tpu.matmul %108, %8, %cst_58 {dimension_numbers = #tpu.dot_dimension_numbers<[1], [0], [0], [1], [0, 0, 1, 1], [], []>} : vector<8x4xf32>, vector<4x32xf32>, vector<8x32xf32> -> vector<8x32xf32>
    %111 = arith.mulf %84, %109 : vector<8x32xf32>
    %112 = arith.subf %111, %110 : vector<8x32xf32>
    %c0_59 = arith.constant 0 : index
    %c0_60 = arith.constant 0 : index
    %113 = vector.load %arg20[%c0_59, %c0_60] : memref<8x32xf32, #tpu.memory_space<vmem>>, vector<8x32xf32>
    %cst_61 = arith.constant dense<0.000000e+00> : vector<8x32xf32>
    %114 = tpu.matmul %9, %113, %cst_61 {dimension_numbers = #tpu.dot_dimension_numbers<[1], [0], [0], [1], [0, 0, 1, 1], [], []>} : vector<8x8xf32>, vector<8x32xf32>, vector<8x32xf32> -> vector<8x32xf32>
    %cst_62 = arith.constant dense<0.000000e+00> : vector<8x32xf32>
    %115 = tpu.matmul %10, %112, %cst_62 {dimension_numbers = #tpu.dot_dimension_numbers<[1], [0], [0], [1], [0, 0, 1, 1], [], []>} : vector<8x8xf32>, vector<8x32xf32>, vector<8x32xf32> -> vector<8x32xf32>
    %116 = arith.addf %114, %115 : vector<8x32xf32>
    %c0_63 = arith.constant 0 : index
    %c0_64 = arith.constant 0 : index
    %117 = vector.load %arg21[%c0_63, %c0_64] : memref<8x4xf32, #tpu.memory_space<vmem>>, vector<8x4xf32>
    %cst_65 = arith.constant dense<0.000000e+00> : vector<8x4xf32>
    %118 = tpu.matmul %9, %117, %cst_65 {dimension_numbers = #tpu.dot_dimension_numbers<[1], [0], [0], [1], [0, 0, 1, 1], [], []>} : vector<8x8xf32>, vector<8x4xf32>, vector<8x4xf32> -> vector<8x4xf32>
    %cst_66 = arith.constant dense<0.000000e+00> : vector<8x4xf32>
    %119 = tpu.matmul %10, %106, %cst_66 {dimension_numbers = #tpu.dot_dimension_numbers<[1], [0], [0], [1], [0, 0, 1, 1], [], []>} : vector<8x8xf32>, vector<8x4xf32>, vector<8x4xf32> -> vector<8x4xf32>
    %120 = arith.addf %118, %119 : vector<8x4xf32>
    %cst_67 = arith.constant 9.99999974E-6 : f32
    %121 = vector.broadcast %cst_67 : f32 to vector<8x4xf32>
    %122 = arith.addf %120, %121 : vector<8x4xf32>
    %123 = tpu.reciprocal %122 {approx = true} : vector<8x4xf32> -> vector<8x4xf32>
    %cst_68 = arith.constant dense<0.000000e+00> : vector<8x32xf32>
    %124 = tpu.matmul %123, %8, %cst_68 {dimension_numbers = #tpu.dot_dimension_numbers<[1], [0], [0], [1], [0, 0, 1, 1], [], []>} : vector<8x4xf32>, vector<4x32xf32>, vector<8x32xf32> -> vector<8x32xf32>
    %c0_69 = arith.constant 0 : index
    %c0_70 = arith.constant 0 : index
    %125 = vector.load %arg20[%c0_69, %c0_70] : memref<8x32xf32, #tpu.memory_space<vmem>>, vector<8x32xf32>
    tpu.vector_store %arg20[%c0_69, %c0_70], %112 {strides = array<i32>} : memref<8x32xf32, #tpu.memory_space<vmem>>, vector<8x32xf32>,
    %c0_71 = arith.constant 0 : index
    %c0_72 = arith.constant 0 : index
    %126 = vector.load %arg21[%c0_71, %c0_72] : memref<8x4xf32, #tpu.memory_space<vmem>>, vector<8x4xf32>
    tpu.vector_store %arg21[%c0_71, %c0_72], %106 {strides = array<i32>} : memref<8x4xf32, #tpu.memory_space<vmem>>, vector<8x4xf32>,
    %127 = arith.mulf %116, %124 : vector<8x32xf32>
    %128 = arith.mulf %127, %40 : vector<8x32xf32>
    %129 = arith.addf %4, %128 : vector<8x32xf32>
    %c0_73 = arith.constant 0 : index
    %c0_74 = arith.constant 0 : index
    %130 = vector.load %arg9[%c0_73, %c0_74] : memref<1x32xf32, #tpu.memory_space<vmem>>, vector<1x32xf32>
    %c0_75 = arith.constant 0 : index
    %c0_76 = arith.constant 0 : index
    %131 = vector.load %arg10[%c0_75, %c0_76] : memref<1x32xf32, #tpu.memory_space<vmem>>, vector<1x32xf32>
    %cst_77 = arith.constant dense<0.000000e+00> : vector<8xf32>
    %132 = vector.multi_reduction <add>, %129, %cst_77 [1] : vector<8x32xf32> to vector<8xf32>
    %133 = vector.shape_cast %132 : vector<8xf32> to vector<8x1xf32>
    %cst_78 = arith.constant 3.200000e+01 : f32
    %134 = vector.broadcast %cst_78 : f32 to vector<8x1xf32>
    %135 = arith.divf %133, %134 : vector<8x1xf32>
    %136 = vector.broadcast %135 : vector<8x1xf32> to vector<8x32xf32>
    %137 = arith.subf %129, %136 : vector<8x32xf32>
    %138 = arith.mulf %137, %137 : vector<8x32xf32>
    %cst_79 = arith.constant dense<0.000000e+00> : vector<8xf32>
    %139 = vector.multi_reduction <add>, %138, %cst_79 [1] : vector<8x32xf32> to vector<8xf32>
    %140 = vector.shape_cast %139 : vector<8xf32> to vector<8x1xf32>
    %cst_80 = arith.constant 3.200000e+01 : f32
    %141 = vector.broadcast %cst_80 : f32 to vector<8x1xf32>
    %142 = arith.divf %140, %141 : vector<8x1xf32>
    %143 = vector.broadcast %135 : vector<8x1xf32> to vector<8x32xf32>
    %144 = arith.subf %129, %143 : vector<8x32xf32>
    %cst_81 = arith.constant 9.99999974E-6 : f32
    %145 = vector.broadcast %cst_81 : f32 to vector<8x1xf32>
    %146 = arith.addf %142, %145 : vector<8x1xf32>
    %147 = math.rsqrt %146 : vector<8x1xf32>
    %148 = vector.broadcast %147 : vector<8x1xf32> to vector<8x32xf32>
    %149 = arith.mulf %144, %148 : vector<8x32xf32>
    %150 = vector.broadcast %130 : vector<1x32xf32> to vector<8x32xf32>
    %151 = arith.mulf %149, %150 : vector<8x32xf32>
    %152 = vector.broadcast %131 : vector<1x32xf32> to vector<8x32xf32>
    %153 = arith.addf %151, %152 : vector<8x32xf32>
    %154 = arith.truncf %153 : vector<8x32xf32> to vector<8x32xbf16>
    %c0_82 = arith.constant 0 : index
    %c0_83 = arith.constant 0 : index
    %155 = vector.load %arg11[%c0_82, %c0_83] : memref<32x128xbf16, #tpu.memory_space<vmem>>, vector<32x128xbf16>
    %cst_84 = arith.constant dense<0.000000e+00> : vector<8x128xf32>
    %156 = tpu.matmul %154, %155, %cst_84 {dimension_numbers = #tpu.dot_dimension_numbers<[1], [0], [0], [1], [0, 0, 1, 1], [], []>} : vector<8x32xbf16>, vector<32x128xbf16>, vector<8x128xf32> -> vector<8x128xf32>
    %cst_85 = arith.constant 5.000000e-01 : f32
    %157 = vector.broadcast %cst_85 : f32 to vector<8x128xf32>
    %158 = arith.mulf %157, %156 : vector<8x128xf32>
    %cst_86 = arith.constant 0.707106769 : f32
    %159 = vector.broadcast %cst_86 : f32 to vector<8x128xf32>
    %160 = arith.mulf %156, %159 : vector<8x128xf32>
    %161 = math.erf %160 : vector<8x128xf32>
    %cst_87 = arith.constant 1.000000e+00 : f32
    %162 = vector.broadcast %cst_87 : f32 to vector<8x128xf32>
    %163 = arith.addf %162, %161 : vector<8x128xf32>
    %164 = arith.mulf %158, %163 : vector<8x128xf32>
    %165 = arith.truncf %164 : vector<8x128xf32> to vector<8x128xbf16>
    %c0_88 = arith.constant 0 : index
    %c0_89 = arith.constant 0 : index
    %166 = vector.load %arg12[%c0_88, %c0_89] : memref<128x32xbf16, #tpu.memory_space<vmem>>, vector<128x32xbf16>
    %cst_90 = arith.constant dense<0.000000e+00> : vector<8x32xf32>
    %167 = tpu.matmul %165, %166, %cst_90 {dimension_numbers = #tpu.dot_dimension_numbers<[1], [0], [0], [1], [0, 0, 1, 1], [], []>} : vector<8x128xbf16>, vector<128x32xbf16>, vector<8x32xf32> -> vector<8x32xf32>
    %168 = arith.addf %129, %167 : vector<8x32xf32>
    %c0_91 = arith.constant 0 : index
    %c0_92 = arith.constant 0 : index
    %c0_93 = arith.constant 0 : index
    %169 = vector.load %arg17[%c0_91, %c0_92, %c0_93] : memref<1x8x32xf32, #tpu.memory_space<vmem>>, vector<1x8x32xf32>
    %170 = vector.shape_cast %169 : vector<1x8x32xf32> to vector<8x32xf32>
    %171 = vector.shape_cast %168 : vector<8x32xf32> to vector<1x8x32xf32>
    tpu.vector_store %arg17[%c0_91, %c0_92, %c0_93], %171 {strides = array<i32>} : memref<1x8x32xf32, #tpu.memory_space<vmem>>, vector<1x8x32xf32>,
    return
  }
  func.func @transform_0(%arg0: i32, %arg1: i32) -> (i32, i32, i32) {
    %c0_i32 = arith.constant 0 : i32
    %c0_i32_0 = arith.constant 0 : i32
    return %arg0, %arg1, %c0_i32 : i32, i32, i32
  }
  func.func @transform_1(%arg0: i32, %arg1: i32) -> (i32, i32, i32) {
    %c0_i32 = arith.constant 0 : i32
    %c0_i32_0 = arith.constant 0 : i32
    return %arg0, %arg1, %c0_i32 : i32, i32, i32
  }
  func.func @transform_2(%arg0: i32, %arg1: i32) -> (i32, i32) {
    %c0_i32 = arith.constant 0 : i32
    %c0_i32_0 = arith.constant 0 : i32
    %c0_i32_1 = arith.constant 0 : i32
    return %c0_i32, %c0_i32_0 : i32, i32
  }
  func.func @transform_3(%arg0: i32, %arg1: i32) -> (i32, i32) {
    %c0_i32 = arith.constant 0 : i32
    %c0_i32_0 = arith.constant 0 : i32
    %c0_i32_1 = arith.constant 0 : i32
    return %c0_i32, %c0_i32_0 : i32, i32
  }
  func.func @transform_4(%arg0: i32, %arg1: i32) -> (i32, i32) {
    %c0_i32 = arith.constant 0 : i32
    %c0_i32_0 = arith.constant 0 : i32
    %c0_i32_1 = arith.constant 0 : i32
    return %c0_i32, %c0_i32_0 : i32, i32
  }
  func.func @transform_5(%arg0: i32, %arg1: i32) -> (i32, i32) {
    %c0_i32 = arith.constant 0 : i32
    %c0_i32_0 = arith.constant 0 : i32
    %c0_i32_1 = arith.constant 0 : i32
    return %c0_i32, %c0_i32_0 : i32, i32
  }
  func.func @transform_6(%arg0: i32, %arg1: i32) -> (i32, i32) {
    %c0_i32 = arith.constant 0 : i32
    %c0_i32_0 = arith.constant 0 : i32
    %c0_i32_1 = arith.constant 0 : i32
    return %c0_i32, %c0_i32_0 : i32, i32
  }
  func.func @transform_7(%arg0: i32, %arg1: i32) -> (i32, i32) {
    %c0_i32 = arith.constant 0 : i32
    %c0_i32_0 = arith.constant 0 : i32
    %c0_i32_1 = arith.constant 0 : i32
    return %c0_i32, %c0_i32_0 : i32, i32
  }
  func.func @transform_8(%arg0: i32, %arg1: i32) -> (i32, i32) {
    %c0_i32 = arith.constant 0 : i32
    %c0_i32_0 = arith.constant 0 : i32
    %c0_i32_1 = arith.constant 0 : i32
    return %c0_i32, %c0_i32_0 : i32, i32
  }
  func.func @transform_9(%arg0: i32, %arg1: i32) -> (i32, i32) {
    %c0_i32 = arith.constant 0 : i32
    %c0_i32_0 = arith.constant 0 : i32
    %c0_i32_1 = arith.constant 0 : i32
    return %c0_i32, %c0_i32_0 : i32, i32
  }
  func.func @transform_10(%arg0: i32, %arg1: i32) -> (i32, i32) {
    %c0_i32 = arith.constant 0 : i32
    %c0_i32_0 = arith.constant 0 : i32
    %c0_i32_1 = arith.constant 0 : i32
    return %c0_i32, %c0_i32_0 : i32, i32
  }
  func.func @transform_11(%arg0: i32, %arg1: i32) -> (i32, i32) {
    %c0_i32 = arith.constant 0 : i32
    %c0_i32_0 = arith.constant 0 : i32
    %c0_i32_1 = arith.constant 0 : i32
    return %c0_i32, %c0_i32_0 : i32, i32
  }
  func.func @transform_12(%arg0: i32, %arg1: i32) -> (i32, i32) {
    %c0_i32 = arith.constant 0 : i32
    %c0_i32_0 = arith.constant 0 : i32
    %c0_i32_1 = arith.constant 0 : i32
    return %c0_i32, %c0_i32_0 : i32, i32
  }
  func.func @transform_13(%arg0: i32, %arg1: i32) -> (i32, i32) {
    %c0_i32 = arith.constant 0 : i32
    %c0_i32_0 = arith.constant 0 : i32
    %c0_i32_1 = arith.constant 0 : i32
    return %c0_i32, %c0_i32_0 : i32, i32
  }
  func.func @transform_14(%arg0: i32, %arg1: i32) -> (i32, i32) {
    %c0_i32 = arith.constant 0 : i32
    %c0_i32_0 = arith.constant 0 : i32
    %c0_i32_1 = arith.constant 0 : i32
    return %c0_i32, %c0_i32_0 : i32, i32
  }
  func.func @transform_15(%arg0: i32, %arg1: i32) -> (i32, i32, i32) {
    %c0_i32 = arith.constant 0 : i32
    %c0_i32_0 = arith.constant 0 : i32
    return %arg0, %arg1, %c0_i32 : i32, i32, i32
  }
}

module attributes {stable_mosaic.version = 11 : i64} {
  func.func @_fastformer_layer_kernel(%arg0: i32, %arg1: i32, %arg2: memref<1x8x32xf32, #tpu.memory_space<vmem>>, %arg3: memref<1x8x1xf32, #tpu.memory_space<vmem>>, %arg4: memref<1x32xf32, #tpu.memory_space<vmem>>, %arg5: memref<1x32xf32, #tpu.memory_space<vmem>>, %arg6: memref<32x96xbf16, #tpu.memory_space<vmem>>, %arg7: memref<32x8xf32, #tpu.memory_space<vmem>>, %arg8: memref<32x8xf32, #tpu.memory_space<vmem>>, %arg9: memref<1x32xf32, #tpu.memory_space<vmem>>, %arg10: memref<1x32xf32, #tpu.memory_space<vmem>>, %arg11: memref<32x128xbf16, #tpu.memory_space<vmem>>, %arg12: memref<128x32xbf16, #tpu.memory_space<vmem>>, %arg13: memref<32x4xf32, #tpu.memory_space<vmem>>, %arg14: memref<4x32xf32, #tpu.memory_space<vmem>>, %arg15: memref<8x8xf32, #tpu.memory_space<vmem>>, %arg16: memref<8x8xf32, #tpu.memory_space<vmem>>, %arg17: memref<1x8x32xf32, #tpu.memory_space<vmem>>, %arg18: memref<8x32xf32, #tpu.memory_space<vmem>>, %arg19: memref<8x4xf32, #tpu.memory_space<vmem>>, %arg20: memref<8x32xf32, #tpu.memory_space<vmem>>, %arg21: memref<8x4xf32, #tpu.memory_space<vmem>>) attributes {dimension_semantics = [#tpu.dimension_semantics<parallel>, #tpu.dimension_semantics<arbitrary>], iteration_bounds = array<i64: 2, 1>, scalar_prefetch = 0 : i64, scratch_operands = 4 : i64, tpu.core_type = #tpu.core_type<tc>, window_params = [{transform_indices = @transform_0, window_bounds = array<i64: 1, 8, 32>}, {transform_indices = @transform_1, window_bounds = array<i64: 1, 8, 1>}, {pipeline_mode = #tpu.pipeline_mode<synchronous>, transform_indices = @transform_2, window_bounds = array<i64: 1, 32>}, {pipeline_mode = #tpu.pipeline_mode<synchronous>, transform_indices = @transform_3, window_bounds = array<i64: 1, 32>}, {pipeline_mode = #tpu.pipeline_mode<synchronous>, transform_indices = @transform_4, window_bounds = array<i64: 32, 96>}, {pipeline_mode = #tpu.pipeline_mode<synchronous>, transform_indices = @transform_5, window_bounds = array<i64: 32, 8>}, {pipeline_mode = #tpu.pipeline_mode<synchronous>, transform_indices = @transform_6, window_bounds = array<i64: 32, 8>}, {pipeline_mode = #tpu.pipeline_mode<synchronous>, transform_indices = @transform_7, window_bounds = array<i64: 1, 32>}, {pipeline_mode = #tpu.pipeline_mode<synchronous>, transform_indices = @transform_8, window_bounds = array<i64: 1, 32>}, {pipeline_mode = #tpu.pipeline_mode<synchronous>, transform_indices = @transform_9, window_bounds = array<i64: 32, 128>}, {pipeline_mode = #tpu.pipeline_mode<synchronous>, transform_indices = @transform_10, window_bounds = array<i64: 128, 32>}, {pipeline_mode = #tpu.pipeline_mode<synchronous>, transform_indices = @transform_11, window_bounds = array<i64: 32, 4>}, {pipeline_mode = #tpu.pipeline_mode<synchronous>, transform_indices = @transform_12, window_bounds = array<i64: 4, 32>}, {pipeline_mode = #tpu.pipeline_mode<synchronous>, transform_indices = @transform_13, window_bounds = array<i64: 8, 8>}, {pipeline_mode = #tpu.pipeline_mode<synchronous>, transform_indices = @transform_14, window_bounds = array<i64: 8, 8>}, {transform_indices = @transform_15, window_bounds = array<i64: 1, 8, 32>}]} {
    %c0_i32 = arith.constant 0 : i32
    %0 = arith.cmpi eq, %arg1, %c0_i32 : i32
    %1 = arith.extui %0 : i1 to i32
    %c0_i32_0 = arith.constant 0 : i32
    %2 = arith.cmpi ne, %1, %c0_i32_0 : i32
    scf.if %2 {
      %cst_94 = arith.constant 0.000000e+00 : f32
      %172 = vector.broadcast %cst_94 : f32 to vector<8x32xf32>
      %c0_95 = arith.constant 0 : index
      %c0_96 = arith.constant 0 : index
      %173 = vector.load %arg18[%c0_95, %c0_96] : memref<8x32xf32, #tpu.memory_space<vmem>>, vector<8x32xf32>
      tpu.vector_store %arg18[%c0_95, %c0_96], %172 {strides = array<i32>} : memref<8x32xf32, #tpu.memory_space<vmem>>, vector<8x32xf32>,
      %cst_97 = arith.constant 0.000000e+00 : f32
      %174 = vector.broadcast %cst_97 : f32 to vector<8x4xf32>
      %c0_98 = arith.constant 0 : index
      %c0_99 = arith.constant 0 : index
      %175 = vector.load %arg19[%c0_98, %c0_99] : memref<8x4xf32, #tpu.memory_space<vmem>>, vector<8x4xf32>
      tpu.vector_store %arg19[%c0_98, %c0_99], %174 {strides = array<i32>} : memref<8x4xf32, #tpu.memory_space<vmem>>, vector<8x4xf32>,
      %cst_100 = arith.constant 0.000000e+00 : f32
      %176 = vector.broadcast %cst_100 : f32 to vector<8x32xf32>
      %c0_101 = arith.constant 0 : index
      %c0_102 = arith.constant 0 : index
      %177 = vector.load %arg20[%c0_101, %c0_102] : memref<8x32xf32, #tpu.memory_space<vmem>>, vector<8x32xf32>
      tpu.vector_store %arg20[%c0_101, %c0_102], %176 {strides = array<i32>} : memref<8x32xf32, #tpu.memory_space<vmem>>, vector<8x32xf32>,
      %cst_103 = arith.constant 0.000000e+00 : f32
      %178 = vector.broadcast %cst_103 : f32 to vector<8x4xf32>
      %c0_104 = arith.constant 0 : index
      %c0_105 = arith.constant 0 : index
      %179 = vector.load %arg21[%c0_104, %c0_105] : memref<8x4xf32, #tpu.memory_space<vmem>>, vector<8x4xf32>
      tpu.vector_store %arg21[%c0_104, %c0_105], %178 {strides = array<i32>} : memref<8x4xf32, #tpu.memory_space<vmem>>, vector<8x4xf32>,
    } else {
    }
    %c0 = arith.constant 0 : index
    %c0_1 = arith.constant 0 : index
    %c0_2 = arith.constant 0 : index
    %3 = vector.load %arg2[%c0, %c0_1, %c0_2] : memref<1x8x32xf32, #tpu.memory_space<vmem>>, vector<1x8x32xf32>
    %4 = vector.shape_cast %3 : vector<1x8x32xf32> to vector<8x32xf32>
    %c0_3 = arith.constant 0 : index
    %c0_4 = arith.constant 0 : index
    %c0_5 = arith.constant 0 : index
    %5 = vector.load %arg3[%c0_3, %c0_4, %c0_5] : memref<1x8x1xf32, #tpu.memory_space<vmem>>, vector<1x8x1xf32>
    %6 = vector.shape_cast %5 : vector<1x8x1xf32> to vector<8x1xf32>
    %c0_6 = arith.constant 0 : index
    %c0_7 = arith.constant 0 : index
    %7 = vector.load %arg13[%c0_6, %c0_7] : memref<32x4xf32, #tpu.memory_space<vmem>>, vector<32x4xf32>
    %c0_8 = arith.constant 0 : index
    %c0_9 = arith.constant 0 : index
    %8 = vector.load %arg14[%c0_8, %c0_9] : memref<4x32xf32, #tpu.memory_space<vmem>>, vector<4x32xf32>
    %c0_10 = arith.constant 0 : index
    %c0_11 = arith.constant 0 : index
    %9 = vector.load %arg15[%c0_10, %c0_11] : memref<8x8xf32, #tpu.memory_space<vmem>>, vector<8x8xf32>
    %c0_12 = arith.constant 0 : index
    %c0_13 = arith.constant 0 : index
    %10 = vector.load %arg16[%c0_12, %c0_13] : memref<8x8xf32, #tpu.memory_space<vmem>>, vector<8x8xf32>
    %c0_14 = arith.constant 0 : index
    %c0_15 = arith.constant 0 : index
    %11 = vector.load %arg4[%c0_14, %c0_15] : memref<1x32xf32, #tpu.memory_space<vmem>>, vector<1x32xf32>
    %c0_16 = arith.constant 0 : index
    %c0_17 = arith.constant 0 : index
    %12 = vector.load %arg5[%c0_16, %c0_17] : memref<1x32xf32, #tpu.memory_space<vmem>>, vector<1x32xf32>
    %cst = arith.constant dense<0.000000e+00> : vector<8xf32>
    %13 = vector.multi_reduction <add>, %4, %cst [1] : vector<8x32xf32> to vector<8xf32>
    %14 = vector.shape_cast %13 : vector<8xf32> to vector<8x1xf32>
    %cst_18 = arith.constant 3.200000e+01 : f32
    %15 = vector.broadcast %cst_18 : f32 to vector<8x1xf32>
    %16 = arith.divf %14, %15 : vector<8x1xf32>
    %17 = vector.broadcast %16 : vector<8x1xf32> to vector<8x32xf32>
    %18 = arith.subf %4, %17 : vector<8x32xf32>
    %19 = arith.mulf %18, %18 : vector<8x32xf32>
    %cst_19 = arith.constant dense<0.000000e+00> : vector<8xf32>
    %20 = vector.multi_reduction <add>, %19, %cst_19 [1] : vector<8x32xf32> to vector<8xf32>
    %21 = vector.shape_cast %20 : vector<8xf32> to vector<8x1xf32>
    %cst_20 = arith.constant 3.200000e+01 : f32
    %22 = vector.broadcast %cst_20 : f32 to vector<8x1xf32>
    %23 = arith.divf %21, %22 : vector<8x1xf32>
    %24 = vector.broadcast %16 : vector<8x1xf32> to vector<8x32xf32>
    %25 = arith.subf %4, %24 : vector<8x32xf32>
    %cst_21 = arith.constant 9.99999974E-6 : f32
    %26 = vector.broadcast %cst_21 : f32 to vector<8x1xf32>
    %27 = arith.addf %23, %26 : vector<8x1xf32>
    %28 = math.rsqrt %27 : vector<8x1xf32>
    %29 = vector.broadcast %28 : vector<8x1xf32> to vector<8x32xf32>
    %30 = arith.mulf %25, %29 : vector<8x32xf32>
    %31 = vector.broadcast %11 : vector<1x32xf32> to vector<8x32xf32>
    %32 = arith.mulf %30, %31 : vector<8x32xf32>
    %33 = vector.broadcast %12 : vector<1x32xf32> to vector<8x32xf32>
    %34 = arith.addf %32, %33 : vector<8x32xf32>
    %35 = arith.truncf %34 : vector<8x32xf32> to vector<8x32xbf16>
    %c0_22 = arith.constant 0 : index
    %c0_23 = arith.constant 0 : index
    %36 = vector.load %arg6[%c0_22, %c0_23] : memref<32x96xbf16, #tpu.memory_space<vmem>>, vector<32x96xbf16>
    %cst_24 = arith.constant dense<0.000000e+00> : vector<8x96xf32>
    %37 = tpu.matmul %35, %36, %cst_24 {dimension_numbers = #tpu.dot_dimension_numbers<[1], [0], [0], [1], [0, 0, 1, 1], [], []>} : vector<8x32xbf16>, vector<32x96xbf16>, vector<8x96xf32> -> vector<8x96xf32>
    %38 = vector.extract_strided_slice %37 {offsets = [0, 0], sizes = [8, 32], strides = [1, 1]} : vector<8x96xf32> to vector<8x32xf32>
    %39 = vector.extract_strided_slice %37 {offsets = [0, 32], sizes = [8, 32], strides = [1, 1]} : vector<8x96xf32> to vector<8x32xf32>
    %40 = vector.extract_strided_slice %37 {offsets = [0, 64], sizes = [8, 32], strides = [1, 1]} : vector<8x96xf32> to vector<8x32xf32>
    %c0_25 = arith.constant 0 : index
    %c0_26 = arith.constant 0 : index
    %41 = vector.load %arg7[%c0_25, %c0_26] : memref<32x8xf32, #tpu.memory_space<vmem>>, vector<32x8xf32>
    %cst_27 = arith.constant dense<0.000000e+00> : vector<8x8xf32>
    %42 = tpu.matmul %38, %41, %cst_27 {dimension_numbers = #tpu.dot_dimension_numbers<[1], [0], [0], [1], [0, 0, 1, 1], [], []>} : vector<8x32xf32>, vector<32x8xf32>, vector<8x8xf32> -> vector<8x8xf32>
    %43 = vector.extract_strided_slice %42 {offsets = [0, 0], sizes = [8, 4], strides = [1, 1]} : vector<8x8xf32> to vector<8x4xf32>
    %44 = vector.extract_strided_slice %42 {offsets = [0, 4], sizes = [8, 4], strides = [1, 1]} : vector<8x8xf32> to vector<8x4xf32>
    %45 = arith.mulf %38, %38 : vector<8x32xf32>
    %cst_28 = arith.constant dense<0.000000e+00> : vector<8x4xf32>
    %46 = tpu.matmul %45, %7, %cst_28 {dimension_numbers = #tpu.dot_dimension_numbers<[1], [0], [0], [1], [0, 0, 1, 1], [], []>} : vector<8x32xf32>, vector<32x4xf32>, vector<8x4xf32> -> vector<8x4xf32>
    %cst_29 = arith.constant 1.250000e-01 : f32
    %47 = vector.broadcast %cst_29 : f32 to vector<8x4xf32>
    %48 = arith.mulf %43, %47 : vector<8x4xf32>
    %49 = arith.mulf %48, %43 : vector<8x4xf32>
    %50 = arith.subf %46, %49 : vector<8x4xf32>
    %cst_30 = arith.constant 0.142857149 : f32
    %51 = vector.broadcast %cst_30 : f32 to vector<8x4xf32>
    %52 = arith.mulf %50, %51 : vector<8x4xf32>
    %53 = math.sqrt %52 : vector<8x4xf32>
    %cst_31 = arith.constant 9.99999974E-6 : f32
    %54 = vector.broadcast %cst_31 : f32 to vector<8x4xf32>
    %55 = arith.addf %53, %54 : vector<8x4xf32>
    %56 = tpu.reciprocal %55 : vector<8x4xf32> -> vector<8x4xf32>
    %57 = arith.mulf %56, %44 : vector<8x4xf32>
    %cst_32 = arith.constant 5.000000e-01 : f32
    %58 = vector.broadcast %cst_32 : f32 to vector<8x4xf32>
    %59 = arith.mulf %57, %58 : vector<8x4xf32>
    %60 = vector.broadcast %6 : vector<8x1xf32> to vector<8x4xf32>
    %61 = arith.addf %59, %60 : vector<8x4xf32>
    %62 = math.exp %61 : vector<8x4xf32>
    %63 = arith.mulf %62, %56 : vector<8x4xf32>
    %64 = arith.mulf %63, %48 : vector<8x4xf32>
    %cst_33 = arith.constant dense<0.000000e+00> : vector<8x32xf32>
    %65 = tpu.matmul %63, %8, %cst_33 {dimension_numbers = #tpu.dot_dimension_numbers<[1], [0], [0], [1], [0, 0, 1, 1], [], []>} : vector<8x4xf32>, vector<4x32xf32>, vector<8x32xf32> -> vector<8x32xf32>
    %cst_34 = arith.constant dense<0.000000e+00> : vector<8x32xf32>
    %66 = tpu.matmul %64, %8, %cst_34 {dimension_numbers = #tpu.dot_dimension_numbers<[1], [0], [0], [1], [0, 0, 1, 1], [], []>} : vector<8x4xf32>, vector<4x32xf32>, vector<8x32xf32> -> vector<8x32xf32>
    %67 = arith.mulf %38, %65 : vector<8x32xf32>
    %68 = arith.subf %67, %66 : vector<8x32xf32>
    %c0_35 = arith.constant 0 : index
    %c0_36 = arith.constant 0 : index
    %69 = vector.load %arg18[%c0_35, %c0_36] : memref<8x32xf32, #tpu.memory_space<vmem>>, vector<8x32xf32>
    %cst_37 = arith.constant dense<0.000000e+00> : vector<8x32xf32>
    %70 = tpu.matmul %9, %69, %cst_37 {dimension_numbers = #tpu.dot_dimension_numbers<[1], [0], [0], [1], [0, 0, 1, 1], [], []>} : vector<8x8xf32>, vector<8x32xf32>, vector<8x32xf32> -> vector<8x32xf32>
    %cst_38 = arith.constant dense<0.000000e+00> : vector<8x32xf32>
    %71 = tpu.matmul %10, %68, %cst_38 {dimension_numbers = #tpu.dot_dimension_numbers<[1], [0], [0], [1], [0, 0, 1, 1], [], []>} : vector<8x8xf32>, vector<8x32xf32>, vector<8x32xf32> -> vector<8x32xf32>
    %72 = arith.addf %70, %71 : vector<8x32xf32>
    %c0_39 = arith.constant 0 : index
    %c0_40 = arith.constant 0 : index
    %73 = vector.load %arg19[%c0_39, %c0_40] : memref<8x4xf32, #tpu.memory_space<vmem>>, vector<8x4xf32>
    %cst_41 = arith.constant dense<0.000000e+00> : vector<8x4xf32>
    %74 = tpu.matmul %9, %73, %cst_41 {dimension_numbers = #tpu.dot_dimension_numbers<[1], [0], [0], [1], [0, 0, 1, 1], [], []>} : vector<8x8xf32>, vector<8x4xf32>, vector<8x4xf32> -> vector<8x4xf32>
    %cst_42 = arith.constant dense<0.000000e+00> : vector<8x4xf32>
    %75 = tpu.matmul %10, %62, %cst_42 {dimension_numbers = #tpu.dot_dimension_numbers<[1], [0], [0], [1], [0, 0, 1, 1], [], []>} : vector<8x8xf32>, vector<8x4xf32>, vector<8x4xf32> -> vector<8x4xf32>
    %76 = arith.addf %74, %75 : vector<8x4xf32>
    %cst_43 = arith.constant 9.99999974E-6 : f32
    %77 = vector.broadcast %cst_43 : f32 to vector<8x4xf32>
    %78 = arith.addf %76, %77 : vector<8x4xf32>
    %79 = tpu.reciprocal %78 {approx = true} : vector<8x4xf32> -> vector<8x4xf32>
    %cst_44 = arith.constant dense<0.000000e+00> : vector<8x32xf32>
    %80 = tpu.matmul %79, %8, %cst_44 {dimension_numbers = #tpu.dot_dimension_numbers<[1], [0], [0], [1], [0, 0, 1, 1], [], []>} : vector<8x4xf32>, vector<4x32xf32>, vector<8x32xf32> -> vector<8x32xf32>
    %c0_45 = arith.constant 0 : index
    %c0_46 = arith.constant 0 : index
    %81 = vector.load %arg18[%c0_45, %c0_46] : memref<8x32xf32, #tpu.memory_space<vmem>>, vector<8x32xf32>
    tpu.vector_store %arg18[%c0_45, %c0_46], %68 {strides = array<i32>} : memref<8x32xf32, #tpu.memory_space<vmem>>, vector<8x32xf32>,
    %c0_47 = arith.constant 0 : index
    %c0_48 = arith.constant 0 : index
    %82 = vector.load %arg19[%c0_47, %c0_48] : memref<8x4xf32, #tpu.memory_space<vmem>>, vector<8x4xf32>
    tpu.vector_store %arg19[%c0_47, %c0_48], %62 {strides = array<i32>} : memref<8x4xf32, #tpu.memory_space<vmem>>, vector<8x4xf32>,
    %83 = arith.mulf %72, %80 : vector<8x32xf32>
    %84 = arith.mulf %83, %39 : vector<8x32xf32>
    %c0_49 = arith.constant 0 : index
    %c0_50 = arith.constant 0 : index
    %85 = vector.load %arg8[%c0_49, %c0_50] : memref<32x8xf32, #tpu.memory_space<vmem>>, vector<32x8xf32>
    %cst_51 = arith.constant dense<0.000000e+00> : vector<8x8xf32>
    %86 = tpu.matmul %84, %85, %cst_51 {dimension_numbers = #tpu.dot_dimension_numbers<[1], [0], [0], [1], [0, 0, 1, 1], [], []>} : vector<8x32xf32>, vector<32x8xf32>, vector<8x8xf32> -> vector<8x8xf32>
    %87 = vector.extract_strided_slice %86 {offsets = [0, 0], sizes = [8, 4], strides = [1, 1]} : vector<8x8xf32> to vector<8x4xf32>
    %88 = vector.extract_strided_slice %86 {offsets = [0, 4], sizes = [8, 4], strides = [1, 1]} : vector<8x8xf32> to vector<8x4xf32>
    %89 = arith.mulf %84, %84 : vector<8x32xf32>
    %cst_52 = arith.constant dense<0.000000e+00> : vector<8x4xf32>
    %90 = tpu.matmul %89, %7, %cst_52 {dimension_numbers = #tpu.dot_dimension_numbers<[1], [0], [0], [1], [0, 0, 1, 1], [], []>} : vector<8x32xf32>, vector<32x4xf32>, vector<8x4xf32> -> vector<8x4xf32>
    %cst_53 = arith.constant 1.250000e-01 : f32
    %91 = vector.broadcast %cst_53 : f32 to vector<8x4xf32>
    %92 = arith.mulf %87, %91 : vector<8x4xf32>
    %93 = arith.mulf %92, %87 : vector<8x4xf32>
    %94 = arith.subf %90, %93 : vector<8x4xf32>
    %cst_54 = arith.constant 0.142857149 : f32
    %95 = vector.broadcast %cst_54 : f32 to vector<8x4xf32>
    %96 = arith.mulf %94, %95 : vector<8x4xf32>
    %97 = math.sqrt %96 : vector<8x4xf32>
    %cst_55 = arith.constant 9.99999974E-6 : f32
    %98 = vector.broadcast %cst_55 : f32 to vector<8x4xf32>
    %99 = arith.addf %97, %98 : vector<8x4xf32>
    %100 = tpu.reciprocal %99 : vector<8x4xf32> -> vector<8x4xf32>
    %101 = arith.mulf %100, %88 : vector<8x4xf32>
    %cst_56 = arith.constant 5.000000e-01 : f32
    %102 = vector.broadcast %cst_56 : f32 to vector<8x4xf32>
    %103 = arith.mulf %101, %102 : vector<8x4xf32>
    %104 = vector.broadcast %6 : vector<8x1xf32> to vector<8x4xf32>
    %105 = arith.addf %103, %104 : vector<8x4xf32>
    %106 = math.exp %105 : vector<8x4xf32>
    %107 = arith.mulf %106, %100 : vector<8x4xf32>
    %108 = arith.mulf %107, %92 : vector<8x4xf32>
    %cst_57 = arith.constant dense<0.000000e+00> : vector<8x32xf32>
    %109 = tpu.matmul %107, %8, %cst_57 {dimension_numbers = #tpu.dot_dimension_numbers<[1], [0], [0], [1], [0, 0, 1, 1], [], []>} : vector<8x4xf32>, vector<4x32xf32>, vector<8x32xf32> -> vector<8x32xf32>
    %cst_58 = arith.constant dense<0.000000e+00> : vector<8x32xf32>
    %110 = tpu.matmul %108, %8, %cst_58 {dimension_numbers = #tpu.dot_dimension_numbers<[1], [0], [0], [1], [0, 0, 1, 1], [], []>} : vector<8x4xf32>, vector<4x32xf32>, vector<8x32xf32> -> vector<8x32xf32>
    %111 = arith.mulf %84, %109 : vector<8x32xf32>
    %112 = arith.subf %111, %110 : vector<8x32xf32>
    %c0_59 = arith.constant 0 : index
    %c0_60 = arith.constant 0 : index
    %113 = vector.load %arg20[%c0_59, %c0_60] : memref<8x32xf32, #tpu.memory_space<vmem>>, vector<8x32xf32>
    %cst_61 = arith.constant dense<0.000000e+00> : vector<8x32xf32>
    %114 = tpu.matmul %9, %113, %cst_61 {dimension_numbers = #tpu.dot_dimension_numbers<[1], [0], [0], [1], [0, 0, 1, 1], [], []>} : vector<8x8xf32>, vector<8x32xf32>, vector<8x32xf32> -> vector<8x32xf32>
    %cst_62 = arith.constant dense<0.000000e+00> : vector<8x32xf32>
    %115 = tpu.matmul %10, %112, %cst_62 {dimension_numbers = #tpu.dot_dimension_numbers<[1], [0], [0], [1], [0, 0, 1, 1], [], []>} : vector<8x8xf32>, vector<8x32xf32>, vector<8x32xf32> -> vector<8x32xf32>
    %116 = arith.addf %114, %115 : vector<8x32xf32>
    %c0_63 = arith.constant 0 : index
    %c0_64 = arith.constant 0 : index
    %117 = vector.load %arg21[%c0_63, %c0_64] : memref<8x4xf32, #tpu.memory_space<vmem>>, vector<8x4xf32>
    %cst_65 = arith.constant dense<0.000000e+00> : vector<8x4xf32>
    %118 = tpu.matmul %9, %117, %cst_65 {dimension_numbers = #tpu.dot_dimension_numbers<[1], [0], [0], [1], [0, 0, 1, 1], [], []>} : vector<8x8xf32>, vector<8x4xf32>, vector<8x4xf32> -> vector<8x4xf32>
    %cst_66 = arith.constant dense<0.000000e+00> : vector<8x4xf32>
    %119 = tpu.matmul %10, %106, %cst_66 {dimension_numbers = #tpu.dot_dimension_numbers<[1], [0], [0], [1], [0, 0, 1, 1], [], []>} : vector<8x8xf32>, vector<8x4xf32>, vector<8x4xf32> -> vector<8x4xf32>
    %120 = arith.addf %118, %119 : vector<8x4xf32>
    %cst_67 = arith.constant 9.99999974E-6 : f32
    %121 = vector.broadcast %cst_67 : f32 to vector<8x4xf32>
    %122 = arith.addf %120, %121 : vector<8x4xf32>
    %123 = tpu.reciprocal %122 {approx = true} : vector<8x4xf32> -> vector<8x4xf32>
    %cst_68 = arith.constant dense<0.000000e+00> : vector<8x32xf32>
    %124 = tpu.matmul %123, %8, %cst_68 {dimension_numbers = #tpu.dot_dimension_numbers<[1], [0], [0], [1], [0, 0, 1, 1], [], []>} : vector<8x4xf32>, vector<4x32xf32>, vector<8x32xf32> -> vector<8x32xf32>
    %c0_69 = arith.constant 0 : index
    %c0_70 = arith.constant 0 : index
    %125 = vector.load %arg20[%c0_69, %c0_70] : memref<8x32xf32, #tpu.memory_space<vmem>>, vector<8x32xf32>
    tpu.vector_store %arg20[%c0_69, %c0_70], %112 {strides = array<i32>} : memref<8x32xf32, #tpu.memory_space<vmem>>, vector<8x32xf32>,
    %c0_71 = arith.constant 0 : index
    %c0_72 = arith.constant 0 : index
    %126 = vector.load %arg21[%c0_71, %c0_72] : memref<8x4xf32, #tpu.memory_space<vmem>>, vector<8x4xf32>
    tpu.vector_store %arg21[%c0_71, %c0_72], %106 {strides = array<i32>} : memref<8x4xf32, #tpu.memory_space<vmem>>, vector<8x4xf32>,
    %127 = arith.mulf %116, %124 : vector<8x32xf32>
    %128 = arith.mulf %127, %40 : vector<8x32xf32>
    %129 = arith.addf %4, %128 : vector<8x32xf32>
    %c0_73 = arith.constant 0 : index
    %c0_74 = arith.constant 0 : index
    %130 = vector.load %arg9[%c0_73, %c0_74] : memref<1x32xf32, #tpu.memory_space<vmem>>, vector<1x32xf32>
    %c0_75 = arith.constant 0 : index
    %c0_76 = arith.constant 0 : index
    %131 = vector.load %arg10[%c0_75, %c0_76] : memref<1x32xf32, #tpu.memory_space<vmem>>, vector<1x32xf32>
    %cst_77 = arith.constant dense<0.000000e+00> : vector<8xf32>
    %132 = vector.multi_reduction <add>, %129, %cst_77 [1] : vector<8x32xf32> to vector<8xf32>
    %133 = vector.shape_cast %132 : vector<8xf32> to vector<8x1xf32>
    %cst_78 = arith.constant 3.200000e+01 : f32
    %134 = vector.broadcast %cst_78 : f32 to vector<8x1xf32>
    %135 = arith.divf %133, %134 : vector<8x1xf32>
    %136 = vector.broadcast %135 : vector<8x1xf32> to vector<8x32xf32>
    %137 = arith.subf %129, %136 : vector<8x32xf32>
    %138 = arith.mulf %137, %137 : vector<8x32xf32>
    %cst_79 = arith.constant dense<0.000000e+00> : vector<8xf32>
    %139 = vector.multi_reduction <add>, %138, %cst_79 [1] : vector<8x32xf32> to vector<8xf32>
    %140 = vector.shape_cast %139 : vector<8xf32> to vector<8x1xf32>
    %cst_80 = arith.constant 3.200000e+01 : f32
    %141 = vector.broadcast %cst_80 : f32 to vector<8x1xf32>
    %142 = arith.divf %140, %141 : vector<8x1xf32>
    %143 = vector.broadcast %135 : vector<8x1xf32> to vector<8x32xf32>
    %144 = arith.subf %129, %143 : vector<8x32xf32>
    %cst_81 = arith.constant 9.99999974E-6 : f32
    %145 = vector.broadcast %cst_81 : f32 to vector<8x1xf32>
    %146 = arith.addf %142, %145 : vector<8x1xf32>
    %147 = math.rsqrt %146 : vector<8x1xf32>
    %148 = vector.broadcast %147 : vector<8x1xf32> to vector<8x32xf32>
    %149 = arith.mulf %144, %148 : vector<8x32xf32>
    %150 = vector.broadcast %130 : vector<1x32xf32> to vector<8x32xf32>
    %151 = arith.mulf %149, %150 : vector<8x32xf32>
    %152 = vector.broadcast %131 : vector<1x32xf32> to vector<8x32xf32>
    %153 = arith.addf %151, %152 : vector<8x32xf32>
    %154 = arith.truncf %153 : vector<8x32xf32> to vector<8x32xbf16>
    %c0_82 = arith.constant 0 : index
    %c0_83 = arith.constant 0 : index
    %155 = vector.load %arg11[%c0_82, %c0_83] : memref<32x128xbf16, #tpu.memory_space<vmem>>, vector<32x128xbf16>
    %cst_84 = arith.constant dense<0.000000e+00> : vector<8x128xf32>
    %156 = tpu.matmul %154, %155, %cst_84 {dimension_numbers = #tpu.dot_dimension_numbers<[1], [0], [0], [1], [0, 0, 1, 1], [], []>} : vector<8x32xbf16>, vector<32x128xbf16>, vector<8x128xf32> -> vector<8x128xf32>
    %cst_85 = arith.constant 5.000000e-01 : f32
    %157 = vector.broadcast %cst_85 : f32 to vector<8x128xf32>
    %158 = arith.mulf %157, %156 : vector<8x128xf32>
    %cst_86 = arith.constant 0.707106769 : f32
    %159 = vector.broadcast %cst_86 : f32 to vector<8x128xf32>
    %160 = arith.mulf %156, %159 : vector<8x128xf32>
    %161 = math.erf %160 : vector<8x128xf32>
    %cst_87 = arith.constant 1.000000e+00 : f32
    %162 = vector.broadcast %cst_87 : f32 to vector<8x128xf32>
    %163 = arith.addf %162, %161 : vector<8x128xf32>
    %164 = arith.mulf %158, %163 : vector<8x128xf32>
    %165 = arith.truncf %164 : vector<8x128xf32> to vector<8x128xbf16>
    %c0_88 = arith.constant 0 : index
    %c0_89 = arith.constant 0 : index
    %166 = vector.load %arg12[%c0_88, %c0_89] : memref<128x32xbf16, #tpu.memory_space<vmem>>, vector<128x32xbf16>
    %cst_90 = arith.constant dense<0.000000e+00> : vector<8x32xf32>
    %167 = tpu.matmul %165, %166, %cst_90 {dimension_numbers = #tpu.dot_dimension_numbers<[1], [0], [0], [1], [0, 0, 1, 1], [], []>} : vector<8x128xbf16>, vector<128x32xbf16>, vector<8x32xf32> -> vector<8x32xf32>
    %168 = arith.addf %129, %167 : vector<8x32xf32>
    %c0_91 = arith.constant 0 : index
    %c0_92 = arith.constant 0 : index
    %c0_93 = arith.constant 0 : index
    %169 = vector.load %arg17[%c0_91, %c0_92, %c0_93] : memref<1x8x32xf32, #tpu.memory_space<vmem>>, vector<1x8x32xf32>
    %170 = vector.shape_cast %169 : vector<1x8x32xf32> to vector<8x32xf32>
    %171 = vector.shape_cast %168 : vector<8x32xf32> to vector<1x8x32xf32>
    tpu.vector_store %arg17[%c0_91, %c0_92, %c0_93], %171 {strides = array<i32>} : memref<1x8x32xf32, #tpu.memory_space<vmem>>, vector<1x8x32xf32>,
    return
  }
  func.func @transform_0(%arg0: i32, %arg1: i32) -> (i32, i32, i32) {
    %c0_i32 = arith.constant 0 : i32
    %c0_i32_0 = arith.constant 0 : i32
    return %arg0, %arg1, %c0_i32 : i32, i32, i32
  }
  func.func @transform_1(%arg0: i32, %arg1: i32) -> (i32, i32, i32) {
    %c0_i32 = arith.constant 0 : i32
    %c0_i32_0 = arith.constant 0 : i32
    return %arg0, %arg1, %c0_i32 : i32, i32, i32
  }
  func.func @transform_2(%arg0: i32, %arg1: i32) -> (i32, i32) {
    %c0_i32 = arith.constant 0 : i32
    %c0_i32_0 = arith.constant 0 : i32
    %c0_i32_1 = arith.constant 0 : i32
    return %c0_i32, %c0_i32_0 : i32, i32
  }
  func.func @transform_3(%arg0: i32, %arg1: i32) -> (i32, i32) {
    %c0_i32 = arith.constant 0 : i32
    %c0_i32_0 = arith.constant 0 : i32
    %c0_i32_1 = arith.constant 0 : i32
    return %c0_i32, %c0_i32_0 : i32, i32
  }
  func.func @transform_4(%arg0: i32, %arg1: i32) -> (i32, i32) {
    %c0_i32 = arith.constant 0 : i32
    %c0_i32_0 = arith.constant 0 : i32
    %c0_i32_1 = arith.constant 0 : i32
    return %c0_i32, %c0_i32_0 : i32, i32
  }
  func.func @transform_5(%arg0: i32, %arg1: i32) -> (i32, i32) {
    %c0_i32 = arith.constant 0 : i32
    %c0_i32_0 = arith.constant 0 : i32
    %c0_i32_1 = arith.constant 0 : i32
    return %c0_i32, %c0_i32_0 : i32, i32
  }
  func.func @transform_6(%arg0: i32, %arg1: i32) -> (i32, i32) {
    %c0_i32 = arith.constant 0 : i32
    %c0_i32_0 = arith.constant 0 : i32
    %c0_i32_1 = arith.constant 0 : i32
    return %c0_i32, %c0_i32_0 : i32, i32
  }
  func.func @transform_7(%arg0: i32, %arg1: i32) -> (i32, i32) {
    %c0_i32 = arith.constant 0 : i32
    %c0_i32_0 = arith.constant 0 : i32
    %c0_i32_1 = arith.constant 0 : i32
    return %c0_i32, %c0_i32_0 : i32, i32
  }
  func.func @transform_8(%arg0: i32, %arg1: i32) -> (i32, i32) {
    %c0_i32 = arith.constant 0 : i32
    %c0_i32_0 = arith.constant 0 : i32
    %c0_i32_1 = arith.constant 0 : i32
    return %c0_i32, %c0_i32_0 : i32, i32
  }
  func.func @transform_9(%arg0: i32, %arg1: i32) -> (i32, i32) {
    %c0_i32 = arith.constant 0 : i32
    %c0_i32_0 = arith.constant 0 : i32
    %c0_i32_1 = arith.constant 0 : i32
    return %c0_i32, %c0_i32_0 : i32, i32
  }
  func.func @transform_10(%arg0: i32, %arg1: i32) -> (i32, i32) {
    %c0_i32 = arith.constant 0 : i32
    %c0_i32_0 = arith.constant 0 : i32
    %c0_i32_1 = arith.constant 0 : i32
    return %c0_i32, %c0_i32_0 : i32, i32
  }
  func.func @transform_11(%arg0: i32, %arg1: i32) -> (i32, i32) {
    %c0_i32 = arith.constant 0 : i32
    %c0_i32_0 = arith.constant 0 : i32
    %c0_i32_1 = arith.constant 0 : i32
    return %c0_i32, %c0_i32_0 : i32, i32
  }
  func.func @transform_12(%arg0: i32, %arg1: i32) -> (i32, i32) {
    %c0_i32 = arith.constant 0 : i32
    %c0_i32_0 = arith.constant 0 : i32
    %c0_i32_1 = arith.constant 0 : i32
    return %c0_i32, %c0_i32_0 : i32, i32
  }
  func.func @transform_13(%arg0: i32, %arg1: i32) -> (i32, i32) {
    %c0_i32 = arith.constant 0 : i32
    %c0_i32_0 = arith.constant 0 : i32
    %c0_i32_1 = arith.constant 0 : i32
    return %c0_i32, %c0_i32_0 : i32, i32
  }
  func.func @transform_14(%arg0: i32, %arg1: i32) -> (i32, i32) {
    %c0_i32 = arith.constant 0 : i32
    %c0_i32_0 = arith.constant 0 : i32
    %c0_i32_1 = arith.constant 0 : i32
    return %c0_i32, %c0_i32_0 : i32, i32
  }
  func.func @transform_15(%arg0: i32, %arg1: i32) -> (i32, i32, i32) {
    %c0_i32 = arith.constant 0 : i32
    %c0_i32_0 = arith.constant 0 : i32
    return %arg0, %arg1, %c0_i32 : i32, i32, i32
  }
}

</mosaic_0001>

<bundles_post_ra>
// kernel: tpu_custom_call.1
= control target key start
LH: loop header
LB: loop body
LE: loop exit
PB: predicated region body
PF: predicated region fallthrough
CT: control target
= control target key end

     0   :  { %s4636_s0 = inlined_call_operand.hbm [shape: f32[2,8,32], index: 0, kind: input, shape index: {}]   ;;  %s4637_s1 = inlined_call_operand.hbm [shape: f32[2,8,1], index: 1, kind: input, shape index: {}]   ;;  %s4638_s2 = inlined_call_operand.hbm [shape: f32[1,32], index: 2, kind: input, shape index: {}]   ;;  %s4639_s3 = inlined_call_operand.hbm [shape: f32[1,32], index: 3, kind: input, shape index: {}]   ;;  %s4640_s4 = inlined_call_operand.hbm [shape: bf16[32,96], index: 4, kind: input, shape index: {}]   ;;  %s4641_s5 = inlined_call_operand.hbm [shape: f32[32,8], index: 5, kind: input, shape index: {}]   ;;  %s4642_s6 = inlined_call_operand.hbm [shape: f32[32,8], index: 6, kind: input, shape index: {}]   ;;  %s4643_s7 = inlined_call_operand.hbm [shape: f32[1,32], index: 7, kind: input, shape index: {}]   ;;  %s4644_s8 = inlined_call_operand.hbm [shape: f32[1,32], index: 8, kind: input, shape index: {}]   ;;  %s4645_s9 = inlined_call_operand.hbm [shape: bf16[32,128], index: 9, kind: input, shape index: {}]   ;;  %s4646_s10 = inlined_call_operand.hbm [shape: bf16[128,32], index: 10, kind: input, shape index: {}]   ;;  %s4647_s11 = inlined_call_operand.hbm [shape: f32[32,4], index: 11, kind: input, shape index: {}]   ;;  %s4648_s12 = inlined_call_operand.hbm [shape: f32[4,32], index: 12, kind: input, shape index: {}]   ;;  %s4649_s13 = inlined_call_operand.hbm [shape: f32[8,8], index: 13, kind: input, shape index: {}]   ;;  %s4650_s14 = inlined_call_operand.hbm [shape: f32[8,8], index: 14, kind: input, shape index: {}]   ;;  %s4651_s15 = inlined_call_operand.hbm [shape: f32[2,8,32], index: 15, kind: output, shape index: {}]  }
   0x1   :  { %4670 = sst [smem:[#allocation45_spill]] %s4636_s0 }
   0x2   :  { %4671 = sst [smem:[#allocation46_spill]] %s4637_s1 }
   0x3   :  { %4672 = sst [smem:[#allocation47_spill]] %s4638_s2 }
   0x4   :  { %4673 = sst [smem:[#allocation48_spill]] %s4639_s3 }
   0x5   :  { %4674 = sst [smem:[#allocation49_spill]] %s4640_s4 }
   0x6   :  { %4675 = sst [smem:[#allocation50_spill]] %s4641_s5 }
   0x7   :  { %4676 = sst [smem:[#allocation51_spill]] %s4642_s6 }
   0x8   :  { %4677 = sst [smem:[#allocation52_spill]] %s4643_s7 }
   0x9   :  { %4678 = sst [smem:[#allocation53_spill]] %s4644_s8 }
   0xa   :  { %4679 = sst [smem:[#allocation54_spill]] %s4645_s9 }
   0xb   :  { %4680 = sst [smem:[#allocation55_spill]] %s4646_s10 }
   0xc   :  { %4681 = sst [smem:[#allocation56_spill]] %s4651_s15 }
   0xd   :  { %20 = vsyncpa [#allocation7], 0 }
   0xe   :  { %22 = vsyncpa [#allocation7 + $0x1], 0 }
   0xf   :  { %23 = vsyncpa [#allocation10], 0 }
  0x10   :  { %25 = vsyncpa [#allocation10 + $0x1], 0 }
  0x11   :  { %26 = vsyncpa [#allocation13], 0 }
  0x12   :  { %27 = vsyncpa [#allocation16], 0 }
  0x13   :  { %28 = vsyncpa [#allocation19], 0 }
  0x14   :  { %29 = vsyncpa [#allocation22], 0 }
  0x15   :  { %30 = vsyncpa [#allocation25], 0 }
  0x16   :  { %31 = vsyncpa [#allocation28], 0 }
  0x17   :  { %32 = vsyncpa [#allocation8], 0 }
  0x18   :  { %34 = vsyncpa [#allocation8 + $0x1], 0  ;;  %s3904_s18 = smov 0   ;;  %s3906_s19 = smov 0  }
  0x19   :  { %s3908_s20 = smov 0   ;;  %s3910_s21 = smov 0  }
  0x1a   :  { %s3912_s22 = smov 0   ;;  %s3914_s23 = smov 0  }
  0x1b LB: > { %4682 = sst [smem:[#allocation41_spill]] %s3775_s18  ;;  %s3935_s24 = sadd.s32 4294967295, %s3795_s23   ;;  %s3795_s23 = sphi %s3914_s23, %s40_s23   ;;  %s3791_s22 = sphi %s3912_s22, %s4741_s22   ;;  %s3787_s21 = sphi %s3910_s21, %s4740_s21   ;;  %s3783_s20 = sphi %s3908_s20, %s4739_s20   ;;  %s3779_s19 = sphi %s3906_s19, %s4738_s19   ;;  %s3775_s18 = sphi %s3904_s18, %s4737_s18  }
  0x1c   : > { %4683 = sst [smem:[#allocation42_spill]] %s3787_s21  ;;  %p2689_p0 = scmp.ge.s32.totalorder %s3795_s23, 1 }
  0x1d   : > { %4684 = sst [smem:[#allocation43_spill]] %s3935_s24  ;;  %p4656_p1 = scmp.eq.s32.totalorder %s3935_s24, 0 }
  0x1e   : > { %p414_p2 = scmp.lt.s32.totalorder %s3795_s23, 3  ;;  %s3797_s26 = smov [#allocation11]  }
  0x1f   : > { %s427_s27 = sshll.u32 %s3797_s26, 4  ;;  %s3798_s28 = smov [#allocation12]   ;;  %s428_s27 = int_to_ptr.vmem [resolvable:$true] %s427_s27 }
  0x20   : > { %p3940_p3 = pnand %p2689_p0, %p414_p2  ;;  %s438_s29 = sshll.u32 %s3798_s28, 4  ;;  %s3953_s29 = int_to_ptr.vmem [resolvable:$true] %s438_s29 }
  0x21   : > { %s3799_s16 = smov [#allocation15]   ;;  %s4688_s2 = sld [smem:[#allocation47_spill]] }
  0x22   : > { %s4685_s25 = scalar_select %p3940_p3, 1, 0 }
  0x23   : > { %p3070_p5 = pneg %p3940_p3  ;;  %s461_s17 = sshll.u32 %s3799_s16, 4  ;;  %s3955_s17 = int_to_ptr.vmem [resolvable:$true] %s461_s17 }
  0x24   : > { %4686 = sst [smem:[#allocation44_spill]] %s4685_s25 }
  0x25   : > { %p3949_p6 = pnand %p3070_p5, %p4656_p1 }
  0x27   : > { %s3257_s21 = scalar_lea.hbm %s4688_s2, 16  ;;  %p3965_p8 = pneg %p3949_p6 }
  0x28   : > { %p3258_p7 = scmp.ne.s32.totalorder %s4688_s2, %s3257_s21  ;;  %p3264_p11 = scmp.lt.u32.totalorder %s3257_s21, %s4688_s2 }
  0x2a   : > { %p3260_p9 = pnand %p3965_p8, %p3258_p7 }
  0x2c   : > { %p3261_p10 = pneg %p3260_p9 }
  0x2e   : > { %p3266_p12 = pnand %p3264_p11, %p3261_p10 }
  0x30   : > { %3269 = shalt.err (!%p3266_p12)
}
  0x31   : > { %s3270_s15 = scalar_lea.vmem %s428_s27, 16  ;;  %s3277_s1 = scalar_lea.vmem %s428_s27, 32 }
  0x32   : > { %p3271_p13 = scmp.ne.s32.totalorder %s428_s27, %s3270_s15  ;;  %p3278_p5 = scmp.lt.s32.totalorder %s428_s27, %s428_s27 }
  0x33   : > { %p3279_p4 = scmp.lt.s32.totalorder %s3277_s1, %s3270_s15 }
  0x34   : > { %p3273_p0 = pnand %p3271_p13, %p3965_p8 }
  0x35   : > { %p3280_p1 = por %p3279_p4, %p3278_p5 }
  0x36   : > { %p3274_p2 = pneg %p3273_p0 }
  0x38   : > { %p3281_p3 = pnand %p3280_p1, %p3274_p2 }
  0x3a   : > { %3284 = shalt.err (!%p3281_p3)
}
  0x3b   : > { %3073 = dma.hbm_to_vmem [thread:$0]  (!%p3949_p6), %s4688_s2, 16, %s428_s27, [#allocation10]  }
  0x3c   : > { %s4690_s3 = sld [smem:[#allocation48_spill]] }
  0x42   : > { %s3285_s16 = scalar_lea.hbm %s4690_s3, 16 }
  0x43   : > { %p3286_p7 = scmp.ne.s32.totalorder %s4690_s3, %s3285_s16  ;;  %p3292_p1 = scmp.lt.u32.totalorder %s3285_s16, %s4690_s3 }
  0x45   : > { %p3288_p9 = pnand %p3286_p7, %p3965_p8 }
  0x47   : > { %p3289_p4 = pneg %p3288_p9 }
  0x49   : > { %p3294_p3 = pnand %p3292_p1, %p3289_p4 }
  0x4b   : > { %3297 = shalt.err (!%p3294_p3)
}
  0x4c   : > { %s3298_s27 = scalar_lea.vmem %s3953_s29, 16  ;;  %s3305_s18 = scalar_lea.vmem %s3953_s29, 32 }
  0x4d   : > { %p3299_p10 = scmp.ne.s32.totalorder %s3953_s29, %s3298_s27  ;;  %p3306_p13 = scmp.lt.s32.totalorder %s3953_s29, %s3953_s29 }
  0x4e   : > { %p3307_p0 = scmp.lt.s32.totalorder %s3305_s18, %s3298_s27 }
  0x4f   : > { %p3301_p11 = pnand %p3299_p10, %p3965_p8 }
  0x50   : > { %p3308_p2 = por %p3307_p0, %p3306_p13 }
  0x51   : > { %p3302_p12 = pneg %p3301_p11 }
  0x53   : > { %p3309_p5 = pnand %p3308_p2, %p3302_p12 }
  0x55   : > { %3312 = shalt.err (!%p3309_p5)
}
  0x56   : > { %3076 = dma.hbm_to_vmem [thread:$0]  (!%p3949_p6), %s4690_s3, 16, %s3953_s29, [#allocation13]  }
  0x57   : > { %s4691_s5 = sld [smem:[#allocation50_spill]] }
  0x5d   : > { %s3313_s21 = scalar_lea.hbm %s4691_s5, 512 }
  0x5e   : > { %p3314_p7 = scmp.ne.s32.totalorder %s4691_s5, %s3313_s21  ;;  %p3320_p1 = scmp.lt.u32.totalorder %s3313_s21, %s4691_s5 }
  0x60   : > { %p3316_p9 = pnand %p3314_p7, %p3965_p8 }
  0x62   : > { %p3317_p4 = pneg %p3316_p9 }
  0x64   : > { %p3322_p3 = pnand %p3320_p1, %p3317_p4 }
  0x66   : > { %3325 = shalt.err (!%p3322_p3)
}
  0x67   : > { %s3326_s29 = scalar_lea.vmem %s3955_s17, 512  ;;  %p3334_p13 = scmp.lt.s32.totalorder %s3955_s17, %s3955_s17 }
  0x68   : > { %p3327_p10 = scmp.ne.s32.totalorder %s3955_s17, %s3326_s29  ;;  %p3335_p0 = scmp.lt.s32.totalorder %s3326_s29, %s3326_s29 }
  0x6a   : > { %p3329_p11 = pnand %p3327_p10, %p3965_p8  ;;  %p3336_p2 = por %p3335_p0, %p3334_p13 }
  0x6c   : > { %p3330_p12 = pneg %p3329_p11 }
  0x6e   : > { %p3337_p5 = pnand %p3336_p2, %p3330_p12 }
  0x70   : > { %3340 = shalt.err (!%p3337_p5)
}
  0x71   : > { %s4661_s18 = smov 128   ;;  %s4667_s24 = smov 8  }
  0x72   : > { %3082 = dma.hbm_to_vmem [thread:$0]  (!%p3949_p6), %s4691_s5, 512, %s3955_s17, [#allocation16], %s4661_s18, %s4661_s18, %s4667_s24  }
  0x73   : > { %s3802_s0 = smov [#allocation18]   ;;  %s4692_s7 = sld [smem:[#allocation52_spill]] }
  0x74   : > { %s488_s21 = sshll.u32 %s3802_s0, 4  ;;  %s489_s21 = int_to_ptr.vmem [resolvable:$true] %s488_s21 }
  0x79   : > { %s3341_s1 = scalar_lea.hbm %s4692_s7, 16 }
  0x7a   : > { %p3342_p7 = scmp.ne.s32.totalorder %s4692_s7, %s3341_s1  ;;  %p3348_p1 = scmp.lt.u32.totalorder %s3341_s1, %s4692_s7 }
  0x7c   : > { %p3344_p9 = pnand %p3342_p7, %p3965_p8 }
  0x7e   : > { %p3345_p4 = pneg %p3344_p9 }
  0x80   : > { %p3350_p3 = pnand %p3348_p1, %p3345_p4 }
  0x82   : > { %3353 = shalt.err (!%p3350_p3)
}
  0x83   : > { %s3354_s17 = scalar_lea.vmem %s489_s21, 16  ;;  %s3361_s25 = scalar_lea.vmem %s489_s21, 32 }
  0x84   : > { %p3355_p10 = scmp.ne.s32.totalorder %s489_s21, %s3354_s17  ;;  %p3362_p13 = scmp.lt.s32.totalorder %s489_s21, %s489_s21 }
  0x85   : > { %p3363_p0 = scmp.lt.s32.totalorder %s3361_s25, %s3354_s17 }
  0x86   : > { %p3357_p11 = pnand %p3355_p10, %p3965_p8 }
  0x87   : > { %p3364_p2 = por %p3363_p0, %p3362_p13 }
  0x88   : > { %p3358_p12 = pneg %p3357_p11 }
  0x8a   : > { %p3365_p5 = pnand %p3364_p2, %p3358_p12 }
  0x8c   : > { %3368 = shalt.err (!%p3365_p5)
}
  0x8d   : > { %3088 = dma.hbm_to_vmem [thread:$0]  (!%p3949_p6), %s4692_s7, 16, %s489_s21, [#allocation19]  }
  0x8e   : > { %s3803_s2 = smov [#allocation21]   ;;  %s3804_s16 = smov [#allocation24]  }
  0x8f   : > { %s509_s3 = sshll.u32 %s3803_s2, 4  ;;  %s535_s15 = sshll.u32 %s3804_s16, 4  ;;  %s510_s3 = int_to_ptr.vmem [resolvable:$true] %s509_s3  ;;  %s4049_s15 = int_to_ptr.vmem [resolvable:$true] %s535_s15 }
  0x90   : > { %s4693_s9 = sld [smem:[#allocation54_spill]] }
  0x96   : > { %s3369_s29 = scalar_lea.hbm %s4693_s9, 256 }
  0x97   : > { %p3370_p7 = scmp.ne.s32.totalorder %s4693_s9, %s3369_s29  ;;  %p3376_p1 = scmp.lt.u32.totalorder %s3369_s29, %s4693_s9 }
  0x99   : > { %p3372_p9 = pnand %p3370_p7, %p3965_p8 }
  0x9b   : > { %p3373_p4 = pneg %p3372_p9 }
  0x9d   : > { %p3378_p3 = pnand %p3376_p1, %p3373_p4 }
  0x9f   : > { %3381 = shalt.err (!%p3378_p3)
}
  0xa0   : > { %s3382_s0 = scalar_lea.vmem %s510_s3, 256  ;;  %p3390_p13 = scmp.lt.s32.totalorder %s510_s3, %s510_s3 }
  0xa1   : > { %p3383_p10 = scmp.ne.s32.totalorder %s510_s3, %s3382_s0  ;;  %p3391_p0 = scmp.lt.s32.totalorder %s3382_s0, %s3382_s0 }
  0xa3   : > { %p3385_p11 = pnand %p3383_p10, %p3965_p8  ;;  %p3392_p2 = por %p3391_p0, %p3390_p13 }
  0xa5   : > { %p3386_p12 = pneg %p3385_p11 }
  0xa7   : > { %p3393_p5 = pnand %p3392_p2, %p3386_p12 }
  0xa9   : > { %3396 = shalt.err (!%p3393_p5)
}
  0xaa   : > { %s4663_s2 = smov 64   ;;  %s4665_s16 = smov 4  }
  0xab   : > { %3094 = dma.hbm_to_vmem [thread:$0]  (!%p3949_p6), %s4693_s9, 256, %s510_s3, [#allocation22], %s4663_s2, %s4663_s2, %s4665_s16  }
  0xac   : > { %s3397_s25 = scalar_lea.hbm %s4647_s11, 512 }
  0xad   : > { %p3398_p7 = scmp.ne.s32.totalorder %s4647_s11, %s3397_s25  ;;  %p3404_p1 = scmp.lt.u32.totalorder %s3397_s25, %s4647_s11 }
  0xaf   : > { %p3400_p9 = pnand %p3398_p7, %p3965_p8 }
  0xb1   : > { %p3401_p4 = pneg %p3400_p9 }
  0xb3   : > { %p3406_p3 = pnand %p3404_p1, %p3401_p4 }
  0xb5   : > { %3409 = shalt.err (!%p3406_p3)
}
  0xb6   : > { %s3410_s3 = scalar_lea.vmem %s4049_s15, 512  ;;  %p3418_p13 = scmp.lt.s32.totalorder %s4049_s15, %s4049_s15 }
  0xb7   : > { %p3411_p10 = scmp.ne.s32.totalorder %s4049_s15, %s3410_s3  ;;  %p3419_p0 = scmp.lt.s32.totalorder %s3410_s3, %s3410_s3 }
  0xb9   : > { %p3413_p11 = pnand %p3411_p10, %p3965_p8  ;;  %p3420_p2 = por %p3419_p0, %p3418_p13 }
  0xbb   : > { %p3414_p12 = pneg %p3413_p11 }
  0xbd   : > { %p3421_p5 = pnand %p3420_p2, %p3414_p12 }
  0xbf   : > { %3424 = shalt.err (!%p3421_p5)
}
  0xc0   : > { %s4694_s18 = smov 128   ;;  %s3807_s29 = smov [#allocation27]  }
  0xc1   : > { %3100 = dma.hbm_to_vmem [thread:$0]  (!%p3949_p6), %s4647_s11, 512, %s4049_s15, [#allocation25], %s4694_s18, %s4694_s18, %s4667_s24  }
  0xc2   : > { %s560_s17 = sshll.u32 %s3807_s29, 4  ;;  %s3808_s25 = smov [#allocation14]   ;;  %s561_s17 = int_to_ptr.vmem [resolvable:$true] %s560_s17 }
  0xc3   : > { %s448_s26 = sshll.u32 %s3808_s25, 4  ;;  %s3425_s3 = scalar_lea.hbm %s4649_s13, 128  ;;  %s4098_s26 = int_to_ptr.vmem [resolvable:$true] %s448_s26 }
  0xc4   : > { %p3426_p7 = scmp.ne.s32.totalorder %s4649_s13, %s3425_s3  ;;  %p3432_p1 = scmp.lt.u32.totalorder %s3425_s3, %s4649_s13 }
  0xc6   : > { %p3428_p9 = pnand %p3426_p7, %p3965_p8 }
  0xc8   : > { %p3429_p4 = pneg %p3428_p9 }
  0xca   : > { %p3434_p3 = pnand %p3432_p1, %p3429_p4 }
  0xcc   : > { %3437 = shalt.err (!%p3434_p3)
}
  0xcd   : > { %s3438_s27 = scalar_lea.vmem %s561_s17, 128  ;;  %p3446_p13 = scmp.lt.s32.totalorder %s561_s17, %s561_s17 }
  0xce   : > { %p3439_p10 = scmp.ne.s32.totalorder %s561_s17, %s3438_s27  ;;  %p3447_p0 = scmp.lt.s32.totalorder %s3438_s27, %s3438_s27 }
  0xd0   : > { %p3441_p11 = pnand %p3439_p10, %p3965_p8  ;;  %p3448_p2 = por %p3447_p0, %p3446_p13 }
  0xd2   : > { %p3442_p12 = pneg %p3441_p11 }
  0xd4   : > { %p3449_p5 = pnand %p3448_p2, %p3442_p12 }
  0xd6   : > { %3452 = shalt.err (!%p3449_p5)
}
  0xd7   : > { %3106 = dma.hbm_to_vmem [thread:$0]  (!%p3949_p6), %s4649_s13, 128, %s561_s17, [#allocation28]  }
  0xd8   : > { %s4695_s4 = sld [smem:[#allocation49_spill]] }
  0xde   : > { %s3453_s21 = scalar_lea.hbm %s4695_s4, 256 }
  0xdf   : > { %p3454_p7 = scmp.ne.s32.totalorder %s4695_s4, %s3453_s21  ;;  %p3460_p1 = scmp.lt.u32.totalorder %s3453_s21, %s4695_s4 }
  0xe1   : > { %p3456_p9 = pnand %p3454_p7, %p3965_p8 }
  0xe3   : > { %p3457_p4 = pneg %p3456_p9 }
  0xe5   : > { %p3462_p3 = pnand %p3460_p1, %p3457_p4 }
  0xe7   : > { %3465 = shalt.err (!%p3462_p3)
}
  0xe8   : > { %s3466_s17 = scalar_lea.vmem %s4098_s26, 256  ;;  %p3474_p13 = scmp.lt.s32.totalorder %s4098_s26, %s4098_s26 }
  0xe9   : > { %p3467_p10 = scmp.ne.s32.totalorder %s4098_s26, %s3466_s17  ;;  %p3475_p0 = scmp.lt.s32.totalorder %s3466_s17, %s3466_s17 }
  0xeb   : > { %p3469_p11 = pnand %p3467_p10, %p3965_p8  ;;  %p3476_p2 = por %p3475_p0, %p3474_p13 }
  0xed   : > { %p3470_p12 = pneg %p3469_p11 }
  0xef   : > { %p3477_p5 = pnand %p3476_p2, %p3470_p12 }
  0xf1   : > { %3480 = shalt.err (!%p3477_p5)
}
  0xf2   : > { %s4696_s27 = smov 4   ;;  %s4697_s2 = smov 64  }
  0xf3   : > { %3079 = dma.hbm_to_vmem [thread:$0]  (!%p3949_p6), %s4695_s4, 256, %s4098_s26, [#allocation13], %s4697_s2, %s4697_s2, %s4696_s27  }
  0xf4   : > { %s3809_s25 = smov [#allocation17]   ;;  %s3810_s0 = smov [#allocation20]  }
  0xf5   : > { %s474_s21 = sshll.u32 %s3809_s25, 4  ;;  %s499_s3 = sshll.u32 %s3810_s0, 4  ;;  %s475_s21 = int_to_ptr.vmem [resolvable:$true] %s474_s21  ;;  %s4144_s3 = int_to_ptr.vmem [resolvable:$true] %s499_s3 }
  0xf6   : > { %s4698_s6 = sld [smem:[#allocation51_spill]] }
  0xfc   : > { %s3481_s17 = scalar_lea.hbm %s4698_s6, 512 }
  0xfd   : > { %p3482_p7 = scmp.ne.s32.totalorder %s4698_s6, %s3481_s17  ;;  %p3488_p1 = scmp.lt.u32.totalorder %s3481_s17, %s4698_s6 }
  0xff   : > { %p3484_p9 = pnand %p3482_p7, %p3965_p8 }
 0x101   : > { %p3485_p4 = pneg %p3484_p9 }
 0x103   : > { %p3490_p3 = pnand %p3488_p1, %p3485_p4 }
 0x105   : > { %3493 = shalt.err (!%p3490_p3)
}
 0x106   : > { %s3494_s29 = scalar_lea.vmem %s475_s21, 512  ;;  %p3502_p13 = scmp.lt.s32.totalorder %s475_s21, %s475_s21 }
 0x107   : > { %p3495_p10 = scmp.ne.s32.totalorder %s475_s21, %s3494_s29  ;;  %p3503_p0 = scmp.lt.s32.totalorder %s3494_s29, %s3494_s29 }
 0x109   : > { %p3497_p11 = pnand %p3495_p10, %p3965_p8  ;;  %p3504_p2 = por %p3503_p0, %p3502_p13 }
 0x10b   : > { %p3498_p12 = pneg %p3497_p11 }
 0x10d   : > { %p3505_p5 = pnand %p3504_p2, %p3498_p12 }
 0x10f   : > { %3508 = shalt.err (!%p3505_p5)
}
 0x110   : > { %s4699_s5 = smov 8   ;;  %s4700_s8 = sld [smem:[#allocation53_spill]] }
 0x111   : > { %3085 = dma.hbm_to_vmem [thread:$0]  (!%p3949_p6), %s4698_s6, 512, %s475_s21, [#allocation16], %s4694_s18, %s4694_s18, %s4699_s5  }
 0x116   : > { %s3509_s15 = scalar_lea.hbm %s4700_s8, 16 }
 0x117   : > { %p3510_p7 = scmp.ne.s32.totalorder %s4700_s8, %s3509_s15  ;;  %p3516_p1 = scmp.lt.u32.totalorder %s3509_s15, %s4700_s8 }
 0x119   : > { %p3512_p9 = pnand %p3510_p7, %p3965_p8 }
 0x11b   : > { %p3513_p4 = pneg %p3512_p9 }
 0x11d   : > { %p3518_p3 = pnand %p3516_p1, %p3513_p4 }
 0x11f   : > { %3521 = shalt.err (!%p3518_p3)
}
 0x120   : > { %s3522_s18 = scalar_lea.vmem %s4144_s3, 16  ;;  %s3529_s21 = scalar_lea.vmem %s4144_s3, 32 }
 0x121   : > { %p3523_p10 = scmp.ne.s32.totalorder %s4144_s3, %s3522_s18  ;;  %p3530_p13 = scmp.lt.s32.totalorder %s4144_s3, %s4144_s3 }
 0x122   : > { %p3531_p0 = scmp.lt.s32.totalorder %s3529_s21, %s3522_s18 }
 0x123   : > { %p3525_p11 = pnand %p3523_p10, %p3965_p8 }
 0x124   : > { %p3532_p2 = por %p3531_p0, %p3530_p13 }
 0x125   : > { %p3526_p12 = pneg %p3525_p11 }
 0x127   : > { %p3533_p5 = pnand %p3532_p2, %p3526_p12 }
 0x129   : > { %3536 = shalt.err (!%p3533_p5)
}
 0x12a   : > { %3091 = dma.hbm_to_vmem [thread:$0]  (!%p3949_p6), %s4700_s8, 16, %s4144_s3, [#allocation19]  }
 0x12b   : > { %s3811_s25 = smov [#allocation23]   ;;  %s3812_s1 = smov [#allocation26]  }
 0x12c   : > { %s522_s0 = sshll.u32 %s3811_s25, 4  ;;  %s549_s15 = sshll.u32 %s3812_s1, 4  ;;  %s523_s0 = int_to_ptr.vmem [resolvable:$true] %s522_s0  ;;  %s4191_s15 = int_to_ptr.vmem [resolvable:$true] %s549_s15 }
 0x12d   : > { %s4701_s10 = sld [smem:[#allocation55_spill]] }
 0x133   : > { %s3537_s26 = scalar_lea.hbm %s4701_s10, 1024 }
 0x134   : > { %p3538_p7 = scmp.ne.s32.totalorder %s4701_s10, %s3537_s26  ;;  %p3544_p1 = scmp.lt.u32.totalorder %s3537_s26, %s4701_s10 }
 0x136   : > { %p3540_p9 = pnand %p3538_p7, %p3965_p8 }
 0x138   : > { %p3541_p4 = pneg %p3540_p9 }
 0x13a   : > { %p3546_p3 = pnand %p3544_p1, %p3541_p4 }
 0x13c   : > { %3549 = shalt.err (!%p3546_p3)
}
 0x13d   : > { %s3550_s5 = scalar_lea.vmem %s523_s0, 1024  ;;  %p3558_p13 = scmp.lt.s32.totalorder %s523_s0, %s523_s0 }
 0x13e   : > { %p3551_p10 = scmp.ne.s32.totalorder %s523_s0, %s3550_s5  ;;  %p3559_p0 = scmp.lt.s32.totalorder %s3550_s5, %s3550_s5 }
 0x140   : > { %p3553_p11 = pnand %p3551_p10, %p3965_p8  ;;  %p3560_p2 = por %p3559_p0, %p3558_p13 }
 0x142   : > { %p3554_p12 = pneg %p3553_p11 }
 0x144   : > { %p3561_p5 = pnand %p3560_p2, %p3554_p12 }
 0x146   : > { %3564 = shalt.err (!%p3561_p5)
}
 0x147   : > { %3097 = dma.hbm_to_vmem [thread:$0]  (!%p3949_p6), %s4701_s10, 1024, %s523_s0, [#allocation22], %s4697_s2, %s4697_s2, %s4696_s27  }
 0x148   : > { %s3565_s16 = scalar_lea.hbm %s4648_s12, 64 }
 0x149   : > { %p3566_p7 = scmp.ne.s32.totalorder %s4648_s12, %s3565_s16  ;;  %p3572_p1 = scmp.lt.u32.totalorder %s3565_s16, %s4648_s12 }
 0x14b   : > { %p3568_p9 = pnand %p3566_p7, %p3965_p8 }
 0x14d   : > { %p3569_p4 = pneg %p3568_p9 }
 0x14f   : > { %p3574_p3 = pnand %p3572_p1, %p3569_p4 }
 0x151   : > { %3577 = shalt.err (!%p3574_p3)
}
 0x152   : > { %s3578_s27 = scalar_lea.vmem %s4191_s15, 64  ;;  %p3586_p13 = scmp.lt.s32.totalorder %s4191_s15, %s4191_s15 }
 0x153   : > { %p3579_p10 = scmp.ne.s32.totalorder %s4191_s15, %s3578_s27  ;;  %p3587_p0 = scmp.lt.s32.totalorder %s3578_s27, %s3578_s27 }
 0x155   : > { %p3581_p11 = pnand %p3579_p10, %p3965_p8  ;;  %p3588_p2 = por %p3587_p0, %p3586_p13 }
 0x157   : > { %p3582_p12 = pneg %p3581_p11 }
 0x159   : > { %p3589_p5 = pnand %p3588_p2, %p3582_p12 }
 0x15b   : > { %3592 = shalt.err (!%p3589_p5)
}
 0x15c   : > { %3103 = dma.hbm_to_vmem [thread:$0]  (!%p3949_p6), %s4648_s12, 64, %s4191_s15, [#allocation25]  }
 0x15d   : > { %s3813_s3 = smov [#allocation29]   ;;  %s3593_s1 = scalar_lea.hbm %s4650_s14, 128 }
 0x15e   : > { %s571_s5 = sshll.u32 %s3813_s3, 4  ;;  %p3594_p7 = scmp.ne.s32.totalorder %s4650_s14, %s3593_s1  ;;  %s572_s5 = int_to_ptr.vmem [resolvable:$true] %s571_s5 }
 0x15f   : > { %p3600_p1 = scmp.lt.u32.totalorder %s3593_s1, %s4650_s14 }
 0x160   : > { %p3596_p9 = pnand %p3594_p7, %p3965_p8 }
 0x162   : > { %p3597_p4 = pneg %p3596_p9 }
 0x164   : > { %p3602_p3 = pnand %p3600_p1, %p3597_p4 }
 0x166   : > { %3605 = shalt.err (!%p3602_p3)
}
 0x167   : > { %s3606_s15 = scalar_lea.vmem %s572_s5, 128  ;;  %p3614_p13 = scmp.lt.s32.totalorder %s572_s5, %s572_s5 }
 0x168   : > { %p3607_p10 = scmp.ne.s32.totalorder %s572_s5, %s3606_s15  ;;  %p3615_p0 = scmp.lt.s32.totalorder %s3606_s15, %s3606_s15 }
 0x16a   : > { %p3609_p11 = pnand %p3607_p10, %p3965_p8  ;;  %p3616_p2 = por %p3615_p0, %p3614_p13 }
 0x16c   : > { %p3610_p12 = pneg %p3609_p11 }
 0x16e   : > { %p3617_p5 = pnand %p3616_p2, %p3610_p12 }
 0x170   : > { %3620 = shalt.err (!%p3617_p5)
}
 0x171   : > { %s4702_s27 = sld [smem:[#allocation41_spill]]  ;;  %s4703_s28 = sld [smem:[#allocation43_spill]] }
 0x172   : > { %3109 = dma.hbm_to_vmem [thread:$0]  (!%p3949_p6), %s4650_s14, 128, %s572_s5, [#allocation28]  }
 0x173   : > { %s2688_s2 = sadd.s32 4294967294, %s3795_s23   ;;  %s52_s0 = sadd.s32 1, %s3791_s22 }
 0x174   : > { %s61_s30 = sadd.s32 1, %s3783_s20  ;;  %p54_p8 = scmp.ge.s32.totalorder %s52_s0, 2 }
 0x175   : > { %p68_p7 = scmp.ne.s32.totalorder %s3783_s20, %s3779_s19  ;;  %p69_p9 = scmp.eq.s32.totalorder %s3795_s23, 0 }
 0x176   : > { %s4743_s0 = smov (%p54_p8, %s52_s0), 0  ;;  %p407_p12 = scmp.eq.s32.totalorder %s2688_s2, 1 }
 0x177   : > { %p74_p4 = scmp.ne.s32.totalorder %s3779_s19, %s4702_s27  ;;  %p4265_p1 = por %p69_p9, %p68_p7 }
 0x178   : > { %p4705_p3 = scmp.eq.s32.totalorder %s4703_s28, 0  ;;  %s56_s24 = ssub.s32 %s3791_s22, %s4743_s0 }
 0x179   : > { %p401_p10 = scmp.eq.s32.totalorder %s4703_s28, 1  ;;  %p59_p11 = scmp.eq.s32.totalorder %s56_s24, 0 }
 0x17a   : > { %p4271_p6 = por %p4705_p3, %p74_p4  ;;  %p3134_p0 = scmp.lt.s32.totalorder %s3795_s23, 2 }
 0x17b   : > { %p4278_p13 = por %p401_p10, %p68_p7  ;;  %p4286_p2 = por %p407_p12, %p74_p4 }
 0x17c   : > { %s4706_s5 = scalar_select %p4271_p6, 1, 0 }
 0x17d   : > { %s4707_s25 = scalar_select %p4278_p13, 1, 0 }
 0x17e   : > { %s4284_s1 = scalar_select %p59_p11, %s3783_s20, %s61_s30  }
 0x17f   : > { %s4708_s17 = scalar_select %p4286_p2, 1, 0 }
 0x180   : > { %s582_s16 = sand.u32 1, %s3783_s20   ;;  %s2705_s29 = sshll.u32 %s3791_s22, 7 }
 0x181   : > { %s4291_s26 = sshll.u32 %s582_s16, 3  ;;  %s4709_s21 = sld [smem:[#allocation45_spill]] }
 0x182   : > { %s586_s2 = scalar_lea.vmem [#allocation6], %s4291_s26  ;;  %p4304_p5 = pnand %p3134_p0, %p4265_p1 }
 0x183   : > { %s594_s30 = sshll.u32 %s586_s2, 4  ;;  %s4712_s7 = sld [smem:[#allocation46_spill]]  ;;  %s4300_s30 = int_to_ptr.vmem [resolvable:$true] %s594_s30 }
 0x184   : > { %s601_s18 = sand.u32 1, %s3795_s23   ;;  %p3623_p7 = pneg %p4304_p5 }
 0x187   : > { %s4710_s27 = smov %s4709_s21  ;;  %s4297_s28 = scalar_lea.hbm %s4709_s21, %s2705_s29 }
 0x188   : > { %s583_s21 = scalar_lea.sflag [#allocation7], %s582_s16  ;;  %s3621_s8 = scalar_lea.hbm %s4297_s28, 128 }
 0x189   : > { %s4311_s15 = scalar_lea.hbm %s4712_s7, %s2705_s29  ;;  %p3622_p8 = scmp.ne.s32.totalorder %s4297_s28, %s3621_s8 }
 0x18a   : > { %s3626_s9 = scalar_lea.hbm %s4710_s27, 256  ;;  %p3627_p1 = scmp.lt.u32.totalorder %s4297_s28, %s4710_s27 }
 0x18b   : > { %p3624_p9 = pnand %p3623_p7, %p3622_p8  ;;  %p3628_p3 = scmp.lt.u32.totalorder %s3626_s9, %s3621_s8 }
 0x18c   : > { %p3630_p11 = scmp.lt.u32.totalorder %s3621_s8, %s4297_s28 }
 0x18d   : > { %p3625_p4 = pneg %p3624_p9  ;;  %p3629_p10 = por %p3628_p3, %p3627_p1 }
 0x18f   : > { %p3631_p12 = por %p3630_p11, %p3629_p10 }
 0x191   : > { %p3632_p0 = pnand %p3631_p12, %p3625_p4 }
 0x193   : > { %3635 = shalt.err (!%p3632_p0)
}
 0x194   : > { %s3636_s6 = scalar_lea.vmem %s4300_s30, 128  ;;  %s3814_s16 = smov [#allocation6]  }
 0x195   : > { %p3637_p8 = scmp.ne.s32.totalorder %s4300_s30, %s3636_s6  ;;  %s3641_s29 = sshll.u32 %s3814_s16, 4  ;;  %s3642_s29 = int_to_ptr.vmem [resolvable:$false] %s3641_s29 }
 0x196   : > { %s3643_s10 = scalar_lea.vmem %s3642_s29, 256  ;;  %p3644_p13 = scmp.lt.s32.totalorder %s4300_s30, %s3642_s29 }
 0x197   : > { %p3639_p9 = pnand %p3637_p8, %p3623_p7  ;;  %p3645_p1 = scmp.lt.s32.totalorder %s3643_s10, %s3636_s6 }
 0x199   : > { %p3640_p2 = pneg %p3639_p9  ;;  %p3646_p3 = por %p3645_p1, %p3644_p13 }
 0x19b   : > { %p3647_p10 = pnand %p3646_p3, %p3640_p2 }
 0x19d   : > { %3650 = shalt.err (!%p3647_p10)
}
 0x19e   : > { %3113 = dma.hbm_to_vmem [thread:$0]  (!%p4304_p5), %s4297_s28, 128, %s4300_s30, %s583_s21  }
 0x19f   : > { %s605_s8 = scalar_lea.vmem [#allocation9], %s4291_s26  ;;  %s602_s3 = scalar_lea.sflag [#allocation10], %s601_s18 }
 0x1a0   : > { %s613_s9 = sshll.u32 %s605_s8, 4  ;;  %s3651_s2 = scalar_lea.hbm %s4311_s15, 128  ;;  %s614_s9 = int_to_ptr.vmem [resolvable:$true] %s613_s9 }
 0x1a1   : > { %p3652_p13 = scmp.ne.s32.totalorder %s4311_s15, %s3651_s2  ;;  %s3656_s16 = scalar_lea.hbm %s4712_s7, 256 }
 0x1a2   : > { %p3657_p11 = scmp.lt.u32.totalorder %s4311_s15, %s4712_s7  ;;  %p3658_p12 = scmp.lt.u32.totalorder %s3656_s16, %s3651_s2 }
 0x1a3   : > { %p3654_p2 = pnand %p3652_p13, %p3623_p7  ;;  %p3660_p8 = scmp.lt.u32.totalorder %s3651_s2, %s4311_s15 }
 0x1a4   : > { %p3659_p0 = por %p3658_p12, %p3657_p11 }
 0x1a5   : > { %p3655_p4 = pneg %p3654_p2 }
 0x1a6   : > { %p3661_p9 = por %p3660_p8, %p3659_p0 }
 0x1a8   : > { %p3662_p1 = pnand %p3661_p9, %p3655_p4 }
 0x1aa   : > { %3665 = shalt.err (!%p3662_p1)
}
 0x1ab   : > { %s3666_s26 = scalar_lea.vmem %s614_s9, 128  ;;  %s3815_s28 = smov [#allocation9]  }
 0x1ac   : > { %p3667_p3 = scmp.ne.s32.totalorder %s614_s9, %s3666_s26  ;;  %s3671_s30 = sshll.u32 %s3815_s28, 4  ;;  %s3672_s30 = int_to_ptr.vmem [resolvable:$false] %s3671_s30 }
 0x1ad   : > { %s3673_s18 = scalar_lea.vmem %s3672_s30, 256  ;;  %p3674_p2 = scmp.lt.s32.totalorder %s614_s9, %s3672_s30 }
 0x1ae   : > { %p3669_p10 = pnand %p3667_p3, %p3623_p7  ;;  %p3675_p6 = scmp.lt.s32.totalorder %s3673_s18, %s3666_s26 }
 0x1b0   : > { %p3670_p13 = pneg %p3669_p10  ;;  %p3676_p11 = por %p3675_p6, %p3674_p2 }
 0x1b2   : > { %p3677_p12 = pnand %p3676_p11, %p3670_p13 }
 0x1b4   : > { %3680 = shalt.err (!%p3677_p12)
}
 0x1b5   : > { %3116 = dma.hbm_to_vmem [thread:$0]  (!%p4304_p5), %s4311_s15, 128, %s614_s9, %s602_s3  }
 0x1b6   : > { %s4713_s21 = sld [smem:[#allocation44_spill]] }
 0x1bc   : > { %p4714_p4 = scmp.ne.s32.totalorder %s4713_s21, 0 }
 0x1bd   : > { %s4364_s8 = sand.u32 (!%p4714_p4), 1, %s3779_s19   ;;  %p4715_p6 = scmp.ne.s32.totalorder (!%p4714_p4), %s4706_s5, 0 }
 0x1be   : > { %622 = sbr.rel (%p4714_p4) target bundleno = 3390 (0xd3e), region = 80  ;;  %s4367_s2 = sshll.u32 (!%p4714_p4), %s4364_s8, 3 }
 0x1bf   : > { %s625_s4 = scalar_lea.sflag (!%p4714_p4), [#allocation7], %s4364_s8  ;;  %s628_s6 = scalar_lea.vmem (!%p4714_p4), [#allocation6], %s4367_s2 }
 0x1c5   : > { %3734 = dma.done.wait (%p4715_p6), %s625_s4, 128  }
 0x1c6   : > { %3736 = vsyncadd (%p4715_p6), %s625_s4, 4294967168  ;;  %s4716_s24 = sld [smem:[#allocation43_spill]]  ;;  %s637_s3 = scalar_lea.vmem [#allocation9], %s4367_s2 }
 0x1cc   : > { %s633_s15 = sand.u32 1, %s4716_s24  }
 0x1cd   : > { %s634_s9 = scalar_lea.sflag [#allocation10], %s633_s15 }
 0x1ce   : > { %3738 = dma.done.wait (%p4715_p6), %s634_s9, 128  }
 0x1cf   : > { %3740 = vsyncadd (%p4715_p6), %s634_s9, 4294967168  ;;  %p4717_p5 = scmp.eq.s32.totalorder %s4716_s24, 0 }
 0x1d1   : > { %3742 = dma.done.wait (%p4717_p5), [#allocation10], 16   ;;  %p4718_p7 = pmov %p4717_p5 }
 0x1d2   : > { %p4719_p0 = pmov %p4717_p5 }
 0x1d3   : > { %3744 = vsyncadd (%p4718_p7), [#allocation10], 4294967280 }
 0x1d4   : > { %3746 = dma.done.wait (%p4719_p0), [#allocation13], 272   ;;  %p4720_p8 = pmov %p4719_p0 }
 0x1d5   : > { %p4721_p9 = pmov %p4719_p0 }
 0x1d6   : > { %3748 = vsyncadd (%p4720_p8), [#allocation13], 4294967024 }
 0x1d7   : > { %3750 = dma.done.wait (%p4721_p9), [#allocation16], 1024   ;;  %p4722_p1 = pmov %p4719_p0 }
 0x1d8   : > { %p4723_p3 = pmov %p4719_p0 }
 0x1d9   : > { %3752 = vsyncadd (%p4722_p1), [#allocation16], 4294966272 }
 0x1da   : > { %3754 = dma.done.wait (%p4723_p3), [#allocation19], 32   ;;  %p4724_p10 = pmov %p4719_p0 }
 0x1db   : > { %p4725_p13 = pmov %p4719_p0 }
 0x1dc   : > { %3756 = vsyncadd (%p4724_p10), [#allocation19], 4294967264 }
 0x1dd   : > { %3758 = dma.done.wait (%p4725_p13), [#allocation22], 1280   ;;  %p4726_p2 = pmov %p4719_p0 }
 0x1de   : > { %p4727_p11 = pmov %p4719_p0 }
 0x1df   : > { %3760 = vsyncadd (%p4726_p2), [#allocation22], 4294966016 }
 0x1e0   : > { %3762 = dma.done.wait (%p4727_p11), [#allocation25], 576   ;;  %p4728_p12 = pmov %p4719_p0 }
 0x1e1   : > { %p4729_p4 = pmov %p4719_p0 }
 0x1e2   : > { %3764 = vsyncadd (%p4728_p12), [#allocation25], 4294966720 }
 0x1e3   : > { %3766 = dma.done.wait (%p4729_p4), [#allocation28], 256   ;;  %p4730_p6 = pmov %p4719_p0 }
 0x1e4   : > { %vm746_vm0 = vcmask 261120   ;;  %v4409_v0 = vld [vmem:[%s628_s6] sm:$0xff]  ;;  %v3816_v8 = vmov 0.0   ;;  %vm3817_vm1 = vmmov 0   ;;  %v3818_v10 = vmov 0.0|0.0   ;;  %v852_v19 = vld [vmem:[#allocation15] sm:$0xff] }
 0x1e5   : > { %3768 = vsyncadd (%p4730_p6), [#allocation28], 4294967040  ;;  %v764_v1 = vsel %vm746_vm0, %v4409_v0, 0.0  ;;  %v3223_v7 = vld [vmem:[#allocation14] sm:$0xff]   ;;  %2834 = vmatprep.subr.bf16.mxu0 %v3816_v8  ;;  %747 = vst.msk [vmem:[#allocation2] sm:$0xff] %vm746_vm0, %v3816_v8  ;;  %2838 = vmatprep.mubr.msk.bf16.mxu0 %vm3817_vm1, %v3816_v8  ;;  %v3224_v9 = vld [vmem:[#allocation14 + $0x8] sm:$0xff]  }
 0x1e6   : > { %765 = vadd.xlane.f32.xlu0 %v764_v1  ;;  %750 = vst.msk [vmem:[#allocation4] sm:$0xff] %vm746_vm0, %v3816_v8  ;;  %2835 = vmatpush3.bf16.msra.mxu0 %v3223_v7  ;;  %v2725_v15 = vld [vmem:[#allocation11] ss:$0 sm:$0xff]  ;;  %v2726_v17 = vld [vmem:[#allocation12] ss:$0 sm:$0xff]  ;;  %v854_v24 = vld [vmem:[#allocation15 + $0x10] sm:$0xff] }
 0x1e7   : > { %2869 = vmatprep.subr.mxu1 %v3816_v8  ;;  %2836 = vmatprep.subr.bf16.mxu0 %v3816_v8  ;;  %v853_v20 = vld [vmem:[#allocation15 + $0x8] sm:$0xff]  ;;  %v855_v25 = vld [vmem:[#allocation15 + $0x18] sm:$0xff]  ;;  %v3819_v28 = vmov 0   ;;  %s3820_s5 = smov 96   ;;  %v4454_v40 = vld [vmem:[#allocation26] sm:$0xf] }
 0x1e8   : > { %2871 = vmatprep.mubr.msk.f32.mxu1 %vm3817_vm1, %v3816_v8  ;;  %v2985_v22 = vpack.c.bf16 %v853_v20, %v852_v19  ;;  %v2988_v26 = vpack.c.bf16 %v855_v25, %v854_v24  ;;  %v753_v27 = vld [vmem:[%s637_s3] sm:$0xff]  ;;  %3221 = vset.pattern.permute.xlu1 %v3819_v28  ;;  %v754_v29 = vld [vmem:[#allocation24] sm:$0xff]  ;;  %v757_v33 = vld [vmem:[#allocation24 + $0x18] sm:$0xff]  ;;  %vm1036_vm2 = vcmask 1043456   ;;  %vm748_vm3 = vcmask 31744   ;;  %s3821_s16 = smov 124  }
 0x1e9   : > { %3222 = vset.pattern.permute.xlu0 %v3819_v28  ;;  %1024 = vperm.xlu1 %3221, %v753_v27   ;;  %v755_v30 = vld [vmem:[#allocation24 + $0x8] sm:$0xff]  ;;  %v756_v32 = vld [vmem:[#allocation24 + $0x10] sm:$0xff]  ;;  %749 = vst.msk [vmem:[#allocation3] sm:$0xff] %vm748_vm3, %v3816_v8  ;;  %751 = vst.msk [vmem:[#allocation5] sm:$0xff] %vm748_vm3, %v3816_v8  ;;  %vm1186_vm6 = vcmask 64512   ;;  %s3822_s29 = smov 64  }
 0x1ea   : > { %2837 = vmatpush3.bf16.msra.mxu0 %v3224_v9  ;;  %v4434_v31 = vpack.c.bf16 %v755_v30, %v754_v29  ;;  %v4442_v37 = vpack.c.bf16 %v757_v33, %v756_v32  ;;  %2870 = vmatpush3.msk.msra.mxu1 %vm1036_vm2, %v4454_v40  ;;  %v1558_v24 = vld [vmem:[#allocation17 + $0x10] sm:$0xff]  ;;  %v1559_v25 = vld [vmem:[#allocation17 + $0x18] sm:$0xff]  ;;  %s4731_s10 = sld [smem:[#allocation42_spill]]  ;;  %s740_s28 = scalar_lea.vmem [#allocation30], %s4367_s2 }
 0x1eb   : > { %2984 = vmatprep.subr.bf16.mxu0 %v3818_v10  ;;  %2884 = vmatprep.subr.mxu1 %v3816_v8  ;;  %s2460_s30 = sshll.u32 %s740_s28, 4  ;;  %s4732_s4 = sld [smem:[#allocation56_spill]]  ;;  %s4588_s30 = int_to_ptr.vmem [resolvable:$true] %s2460_s30 }
 0x1ec   : > { %s2446_s2 = scalar_lea.sflag [#allocation8], %s4364_s8  ;;  %s3681_s24 = scalar_lea.vmem %s4588_s30, 128 }
 0x1ed   : > { %p3682_p5 = scmp.ne.s32.totalorder %s4588_s30, %s3681_s24  ;;  %p4733_p7 = scmp.ne.s32.totalorder %s4707_s25, 0 }
 0x1ee   : > { %s3823_s15 = smov [#allocation30]  }
 0x1ef   : > { %p3683_p0 = pnand %p3682_p5, %p4733_p7  ;;  %s3685_s9 = sshll.u32 %s3823_s15, 4  ;;  %s3686_s9 = int_to_ptr.vmem [resolvable:$false] %s3685_s9 }
 0x1f0   : > { %v1333_v62 = vld [vmem:[#allocation3] sm:$0xff]  ;;  %s2768_s26 = sshll.u32 %s4731_s10, 7  ;;  %s3687_s3 = scalar_lea.vmem %s3686_s9, 256 }
 0x1f1   : > { %s4586_s6 = scalar_lea.hbm %s4732_s4, %s2768_s26  ;;  %p3684_p8 = pneg %p3683_p0 }
 0x1f2   : > { %p3688_p9 = scmp.lt.s32.totalorder %s4588_s30, %s3686_s9  ;;  %p3689_p1 = scmp.lt.s32.totalorder %s3687_s3, %s3681_s24 }
 0x1f4   : > { %p3690_p3 = por %p3689_p1, %p3688_p9 }
 0x1f6   : > { %p3691_p10 = pnand %p3690_p3, %p3684_p8 }
 0x268   : > { %v4467_v55 = vpop.permute.xlu1 %1024 }
 0x273   : > { %v766_v2 = vpop.xlane.xlu0 %765 }
 0x274   : > { %v768_v3 = vmul.f32 0.03125, %v766_v2 }
 0x276   : > { %v769_v4 = vsub.f32 %v4409_v0, %v768_v3  ;;  %v4477_v3 = vld [vmem:[#allocation29] sm:$0xff] }
 0x278   : > { %v770_v5 = vmul.f32 %v769_v4, %v769_v4 }
 0x27a   : > { %v771_v6 = vsel %vm746_vm0, %v770_v5, 0.0 }
 0x27b   : > { %772 = vadd.xlane.f32.xlu0 %v771_v6 }
 0x308   : > { %v773_v11 = vpop.xlane.xlu0 %772 }
 0x309   : > { %v774_v12 = vmul.f32 0.03125, %v773_v11  ;;  %v1185_v11 = vld [vmem:[#allocation2] sm:$0xff] }
 0x30b   : > { %v775_v13 = vadd.f32 1e-05, %v774_v12 }
 0x30d   : > { %3235 = vrsqrt.f32 %v775_v13 }
 0x317   : > { %v3236_v14 = vpop.eup %3235 }
 0x318   : > { %v777_v16 = vmul.f32 %v3236_v14, %v769_v4  ;;  %v4484_v4 = vld [vmem:[#allocation27] sm:$0xff] }
 0x31a   : > { %v784_v18 = vmul.f32 %v2725_v15, %v777_v16 }
 0x31c   : > { %v791_v21 = vadd.f32 %v2726_v17, %v784_v18 }
 0x31e   : > { %v792_v23 = vpack.c.bf16 %v791_v21, %v791_v21  ;;  %v1556_v21 = vld [vmem:[#allocation17] sm:$0xff] }
 0x320   : > { %2839 = vmatmul.mubr.msk.bf16.vlgmr.msra.gmra.mrb[0].mxu0 %vm746_vm0, %v792_v23 }
 0x321   : > { %2986 = vmatpush3.bf16.msra.mxu0 %v2985_v22  ;;  %2850 = vmatprep.mubr.msk.f32.mxu0 %vm3817_vm1, %v3816_v8  ;;  %v1557_v22 = vld [vmem:[#allocation17 + $0x8] sm:$0xff] }
 0x322   : > { %2987 = vmatprep.subr.bf16.mxu0 %v3818_v10  ;;  %v2997_v23 = vpack.c.bf16 %v1557_v22, %v1556_v21 }
 0x325   : > { %2989 = vmatpush3.bf16.msra.mxu0 %v2988_v26  ;;  %v3000_v26 = vpack.c.bf16 %v1559_v25, %v1558_v24  ;;  %v3225_v25 = vld [vmem:[#allocation21] sm:$0xff]  }
 0x326   : > { %2990 = vmatprep.subr.bf16.mxu0 %v3818_v10 }
 0x3f3   : > { %v4436_v34 = vpop.f32.mrb[0].mxu0 }
 0x3f4   : > { %1552 = vrot.lane.b32.xlu0 %v4436_v34, %s3820_s5  ;;  %v2840_v35 = vpop.f32.mrb[1].mxu0  ;;  %2851 = vmatmul.mubr.msk.f32.vlgmr.msra.gmra.mrb[4].mxu0 %vm746_vm0, %v4436_v34  ;;  %v929_v39 = vmul.f32 %v4436_v34, %v4436_v34 }
 0x3f5   : > { %2992 = vmatpush3.bf16.msra.mxu0 %v4434_v31  ;;  %v849_v36 = vpop.f32.mrb[2].mxu0  ;;  %2861 = vmatprep.mubr.msk.f32.mxu0 %vm3817_vm1, %v3816_v8 }
 0x3f6   : > { %v2841_v38 = vpop.f32.mrb[3].mxu0  ;;  %2993 = vmatprep.subr.bf16.mxu0 %v3818_v10 }
 0x3f9   : > { %2995 = vmatpush3.bf16.msra.mxu0 %v4442_v37 }
 0x3fa   : > { %2864 = vmatprep.subr.mxu0 %v3816_v8 }
 0x3fc   : > { %2862 = vmatmul.mubr.msk.f32.vlgmr.msra.gmra.mrb[6].mxu0 %vm746_vm0, %v929_v39 }
 0x3fd   : > { %2866 = vmatprep.mubr.msk.f32.mxu0 %vm3817_vm1, %v3816_v8  ;;  %2865 = vmatpush3.msk.msra.mxu0 %vm1036_vm2, %v4454_v40 }
 0x3fe   : > { %2874 = vmatprep.subr.mxu0 %v3816_v8 }
 0x466   : > { %v1553_v32 = vpop.permute.xlu0 %1552 }
 0x4c7   : > { %v925_v41 = vpop.f32.mrb[4].mxu0 }
 0x4c8   : > { %1017 = vrot.lane.b32.xlu1 %v925_v41, %s3821_s16  ;;  %v2852_v42 = vpop.f32.mrb[5].mxu0  ;;  %v1003_v43 = vmul.f32 0.125, %v925_v41 }
 0x4ca   : > { %v1004_v44 = vmul.f32 %v1003_v43, %v925_v41 }
 0x4cf   : > { %v999_v45 = vpop.f32.mrb[6].mxu0 }
 0x4d0   : > { %v1005_v46 = vsub.f32 %v999_v45, %v1004_v44  ;;  %v2863_v47 = vpop.f32.mrb[7].mxu0 }
 0x4d2   : > { %v1006_v48 = vmul.f32 0.14285715, %v1005_v46 }
 0x4d4   : > { %3237 = vrsqrt.f32 %v1006_v48  ;;  %vm1009_vm4 = vcmp.eq.f32.partialorder %v1006_v48, inf  ;;  %v1012_v52 = vand.u32 2147483648, %v1006_v48  ;;  %vm1011_vm5 = vcmp.eq.f32.partialorder %v1006_v48, 0.0 }
 0x4de   : > { %v3238_v49 = vpop.eup %3237 }
 0x4df   : > { %v1008_v50 = vmul.f32 %v3238_v49, %v1006_v48 }
 0x4e1   : > { %v1010_v51 = vsel %vm1009_vm4, %v1006_v48, %v1008_v50 }
 0x4e2   : > { %v1013_v53 = vsel %vm1011_vm5, %v1012_v52, %v1010_v51 }
 0x4e3   : > { %v1014_v54 = vadd.f32 1e-05, %v1013_v53 }
 0x4e5   : > { %3239 = vrcp.f32 %v1014_v54 }
 0x4ef   : > { %v3240_v56 = vpop.eup %3239 }
 0x53a   : > { %v1018_v57 = vpop.permute.xlu1 %1017 }
 0x53b   : > { %v1020_v58 = vmul.f32 %v3240_v56, %v1018_v57 }
 0x53d   : > { %v1021_v59 = vmul.f32 0.5, %v1020_v58 }
 0x53f   : > { %v1027_v60 = vadd.f32 %v4467_v55, %v1021_v59 }
 0x541   : > { %v1028_v61 = vmul.f32 1.442695, %v1027_v60 }
 0x543   : > { %3241 = vpow2.f32 %v1028_v61 }
 0x54d   : > { %v3242_v63 = vpop.eup %3241 }
 0x54e   : > { %v1030_v1 = vmul.f32 %v3242_v63, %v3240_v56  ;;  %1550 = vst.msk [vmem:[#allocation3] sm:$0xff] %vm748_vm3, %v3242_v63 }
 0x550   : > { %2867 = vmatmul.mubr.msk.f32.vlgmr.msra.gmra.mrb[8].mxu0 %vm748_vm3, %v1030_v1  ;;  %v1031_v2 = vmul.f32 %v1030_v1, %v1003_v43 }
 0x551   : > { %2876 = vmatprep.mubr.msk.f32.mxu0 %vm3817_vm1, %v3816_v8 }
 0x552   : > { %2872 = vmatmul.mubr.msk.f32.vlgmr.msra.gmra.mrb[0].mxu1 %vm748_vm3, %v1031_v2 }
 0x553   : > { %2885 = vmatpush3.msra.mxu1 %v3242_v63  ;;  %2886 = vmatprep.mubr.msk.f32.mxu1 %vm3817_vm1, %v3816_v8  ;;  %v1879_v63 = vld [vmem:[#allocation4] sm:$0xff] }
 0x554   : > { %2889 = vmatprep.subr.mxu1 %v3816_v8 }
 0x556   : > { %2887 = vmatmul.mubr.msk.f32.vlgmr.msra.gmra.mrb[2].mxu1 %vm1186_vm6, %v4477_v3 }
 0x557   : > { %2890 = vmatpush3.msra.mxu1 %v1333_v62  ;;  %2891 = vmatprep.mubr.msk.f32.mxu1 %vm3817_vm1, %v3816_v8 }
 0x558   : > { %2996 = vmatprep.subr.bf16.mxu1 %v3818_v10 }
 0x55a   : > { %2892 = vmatmul.mubr.msk.f32.vlgmr.msra.gmra.mrb[4].mxu1 %vm1186_vm6, %v4484_v4 }
 0x55b   : > { %2907 = vmatprep.mubr.msk.f32.mxu1 %vm3817_vm1, %v3816_v8  ;;  %2998 = vmatpush3.bf16.msra.mxu1 %v2997_v23 }
 0x55c   : > { %2999 = vmatprep.subr.bf16.mxu1 %v3818_v10 }
 0x55f   : > { %3001 = vmatpush3.bf16.msra.mxu1 %v3000_v26  ;;  %v3226_v26 = vld [vmem:[#allocation21 + $0x8] sm:$0xff]  }
 0x560   : > { %2921 = vmatprep.subr.mxu1 %v3816_v8 }
 0x623   : > { %v1106_v5 = vpop.f32.mrb[8].mxu0 }
 0x624   : > { %v1183_v6 = vmul.f32 %v1106_v5, %v4436_v34  ;;  %v2868_v7 = vpop.f32.mrb[9].mxu0 }
 0x625   : > { %v1179_v9 = vpop.f32.mrb[0].mxu1 }
 0x626   : > { %v1184_v12 = vsub.f32 %v1183_v6, %v1179_v9  ;;  %v2873_v13 = vpop.f32.mrb[1].mxu1 }
 0x628   : > { %2875 = vmatpush3.msra.mxu0 %v1184_v12  ;;  %1549 = vst.msk [vmem:[#allocation2] sm:$0xff] %vm746_vm0, %v1184_v12 }
 0x629   : > { %2877 = vmatmul.mubr.msk.f32.vlgmr.msra.gmra.mrb[10].mxu0 %vm1186_vm6, %v4477_v3  ;;  %v1400_v14 = vpop.f32.mrb[2].mxu1  ;;  %2879 = vmatprep.subr.mxu0 %v3816_v8 }
 0x62a   : > { %v2888_v15 = vpop.f32.mrb[3].mxu1  ;;  %2880 = vmatpush3.msra.mxu0 %v1185_v11  ;;  %2881 = vmatprep.mubr.msk.f32.mxu0 %vm3817_vm1, %v3816_v8 }
 0x62b   : > { %2894 = vmatprep.subr.mxu0 %v3816_v8 }
 0x62d   : > { %v1470_v16 = vpop.f32.mrb[4].mxu1 }
 0x62e   : > { %v1471_v17 = vadd.f32 %v1470_v16, %v1400_v14  ;;  %v2893_v18 = vpop.f32.mrb[5].mxu1 }
 0x630   : > { %v1474_v19 = vadd.f32 1e-05, %v1471_v17 }
 0x631   : > { %2882 = vmatmul.mubr.msk.f32.vlgmr.msra.gmra.mrb[10].mxu0 %vm1186_vm6, %v4484_v4 }
 0x632   : > { %3243 = vrcp.f32 %v1474_v19  ;;  %2895 = vmatpush3.msk.msra.mxu0 %vm1036_vm2, %v4454_v40  ;;  %2896 = vmatprep.mubr.msk.f32.mxu0 %vm3817_vm1, %v3816_v8 }
 0x633   : > { %3002 = vmatprep.subr.bf16.mxu0 %v3818_v10 }
 0x63c   : > { %v3244_v20 = vpop.eup %3243 }
 0x63d   : > { %2897 = vmatmul.mubr.msk.f32.vlgmr.msra.gmra.mrb[12].mxu0 %vm748_vm3, %v3244_v20 }
 0x63e   : > { %3004 = vmatpush3.bf16.msra.mxu0 %v4434_v31  ;;  %2918 = vmatprep.mubr.msk.f32.mxu0 %vm3817_vm1, %v3816_v8 }
 0x63f   : > { %3005 = vmatprep.subr.bf16.mxu0 %v3818_v10 }
 0x642   : > { %3007 = vmatpush3.bf16.msra.mxu0 %v4442_v37 }
 0x643   : > { %2926 = vmatprep.subr.mxu0 %v3816_v8 }
 0x704   : > { %v1329_v27 = vpop.f32.mrb[10].mxu0 }
 0x705   : > { %v2883_v28 = vpop.f32.mrb[11].mxu0 }
 0x706   : > { %v3229_v28 = vld [vmem:[#allocation23 + $0x10] sm:$0xff]  }
 0x710   : > { %v1545_v29 = vpop.f32.mrb[12].mxu0 }
 0x711   : > { %v1551_v30 = vmul.f32 %v1545_v29, %v1329_v27  ;;  %v2898_v31 = vpop.f32.mrb[13].mxu0  ;;  %v3228_v27 = vld [vmem:[#allocation23 + $0x8] sm:$0xff]  }
 0x713   : > { %v1555_v33 = vmul.f32 %v1553_v32, %v1551_v30 }
 0x715   : > { %v1633_v35 = vmul.f32 %v1555_v33, %v1555_v33  ;;  %2908 = vmatmul.mubr.msk.f32.vlgmr.msra.gmra.mrb[6].mxu1 %vm746_vm0, %v1555_v33 }
 0x716   : > { %2922 = vmatpush3.msk.msra.mxu1 %vm1036_vm2, %v4454_v40  ;;  %2923 = vmatprep.mubr.msk.f32.mxu1 %vm3817_vm1, %v3816_v8 }
 0x717   : > { %2919 = vmatmul.mubr.msk.f32.vlgmr.msra.gmra.mrb[14].mxu0 %vm746_vm0, %v1633_v35  ;;  %2931 = vmatprep.subr.mxu1 %v3816_v8 }
 0x718   : > { %2927 = vmatpush3.msk.msra.mxu0 %vm1036_vm2, %v4454_v40  ;;  %2928 = vmatprep.mubr.msk.f32.mxu0 %vm3817_vm1, %v3816_v8 }
 0x719   : > { %2941 = vmatprep.subr.mxu0 %v3816_v8 }
 0x7e8   : > { %v1629_v10 = vpop.f32.mrb[6].mxu1 }
 0x7e9   : > { %v1707_v36 = vmul.f32 0.125, %v1629_v10  ;;  %1721 = vrot.lane.b32.xlu1 %v1629_v10, %s3821_s16  ;;  %v2909_v37 = vpop.f32.mrb[7].mxu1 }
 0x7ea   : > { %v1703_v38 = vpop.f32.mrb[14].mxu0 }
 0x7eb   : > { %v1708_v39 = vmul.f32 %v1707_v36, %v1629_v10  ;;  %v2920_v41 = vpop.f32.mrb[15].mxu0  ;;  %v2755_v10 = vld [vmem:[#allocation20] ss:$0 sm:$0xff] }
 0x7ec   : > { %v3231_v41 = vld [vmem:[#allocation23 + $0x20] sm:$0xff]  }
 0x7ed   : > { %v1709_v42 = vsub.f32 %v1703_v38, %v1708_v39  ;;  %2239 = vrot.lane.b32.xlu1 %v4436_v34, %s3822_s29  ;;  %v2020_v34 = vld [vmem:[#allocation5] sm:$0xff]  ;;  %v3230_v39 = vld [vmem:[#allocation23 + $0x18] sm:$0xff]  }
 0x7ef   : > { %v1710_v43 = vmul.f32 0.14285715, %v1709_v42  ;;  %v3232_v42 = vld [vmem:[#allocation23 + $0x28] sm:$0xff]  }
 0x7f1   : > { %3245 = vrsqrt.f32 %v1710_v43  ;;  %vm1713_vm7 = vcmp.eq.f32.partialorder %v1710_v43, inf  ;;  %v1716_v47 = vand.u32 2147483648, %v1710_v43  ;;  %vm1715_vm8 = vcmp.eq.f32.partialorder %v1710_v43, 0.0 }
 0x7fb   : > { %v3246_v44 = vpop.eup %3245 }
 0x7fc   : > { %v1712_v45 = vmul.f32 %v3246_v44, %v1710_v43  ;;  %v3234_v44 = vld [vmem:[#allocation23 + $0x38] sm:$0xff]  }
 0x7fe   : > { %v1714_v46 = vsel %vm1713_vm7, %v1710_v43, %v1712_v45  ;;  %v3233_v43 = vld [vmem:[#allocation23 + $0x30] sm:$0xff]  }
 0x7ff   : > { %v1717_v48 = vsel %vm1715_vm8, %v1716_v47, %v1714_v46 }
 0x800   : > { %v1718_v49 = vadd.f32 1e-05, %v1717_v48 }
 0x802   : > { %3247 = vrcp.f32 %v1718_v49 }
 0x80c   : > { %v3248_v50 = vpop.eup %3247 }
 0x85b   : > { %v1722_v51 = vpop.permute.xlu1 %1721 }
 0x85c   : > { %v1724_v52 = vmul.f32 %v3248_v50, %v1722_v51 }
 0x85e   : > { %v1725_v53 = vmul.f32 0.5, %v1724_v52 }
 0x85f   : > { %v2240_v17 = vpop.permute.xlu1 %2239 }
 0x860   : > { %v1726_v54 = vadd.f32 %v1725_v53, %v4467_v55 }
 0x862   : > { %v1727_v56 = vmul.f32 1.442695, %v1726_v54 }
 0x864   : > { %3249 = vpow2.f32 %v1727_v56 }
 0x86e   : > { %v3250_v57 = vpop.eup %3249 }
 0x86f   : > { %v1729_v58 = vmul.f32 %v3250_v57, %v3248_v50  ;;  %2237 = vst.msk [vmem:[#allocation5] sm:$0xff] %vm748_vm3, %v3250_v57 }
 0x871   : > { %2924 = vmatmul.mubr.msk.f32.vlgmr.msra.gmra.mrb[8].mxu1 %vm748_vm3, %v1729_v58  ;;  %v1730_v59 = vmul.f32 %v1729_v58, %v1707_v36 }
 0x872   : > { %2933 = vmatprep.mubr.msk.f32.mxu1 %vm3817_vm1, %v3816_v8 }
 0x873   : > { %2929 = vmatmul.mubr.msk.f32.vlgmr.msra.gmra.mrb[16].mxu0 %vm748_vm3, %v1730_v59 }
 0x874   : > { %2942 = vmatpush3.msra.mxu0 %v3250_v57  ;;  %2943 = vmatprep.mubr.msk.f32.mxu0 %vm3817_vm1, %v3816_v8 }
 0x875   : > { %2946 = vmatprep.subr.mxu0 %v3816_v8 }
 0x877   : > { %2944 = vmatmul.mubr.msk.f32.vlgmr.msra.gmra.mrb[18].mxu0 %vm1186_vm6, %v4477_v3 }
 0x878   : > { %2947 = vmatpush3.msra.mxu0 %v2020_v34  ;;  %2948 = vmatprep.mubr.msk.f32.mxu0 %vm3817_vm1, %v3816_v8 }
 0x879   : > { %2956 = vmatprep.subr.bf16.mxu0 %v3816_v8 }
 0x87b   : > { %2949 = vmatmul.mubr.msk.f32.vlgmr.msra.gmra.mrb[20].mxu0 %vm1186_vm6, %v4484_v4 }
 0x87c   : > { %2960 = vmatprep.mubr.msk.bf16.mxu0 %vm3817_vm1, %v3816_v8  ;;  %2957 = vmatpush3.bf16.msra.mxu0 %v3225_v25 }
 0x87d   : > { %2958 = vmatprep.subr.bf16.mxu0 %v3816_v8 }
 0x880   : > { %2959 = vmatpush3.bf16.msra.mxu0 %v3226_v26 }
 0x944   : > { %v1800_v55 = vpop.f32.mrb[8].mxu1 }
 0x945   : > { %v1877_v60 = vmul.f32 %v1800_v55, %v1555_v33  ;;  %v2925_v61 = vpop.f32.mrb[9].mxu1  ;;  %v2754_v33 = vld [vmem:[#allocation18] ss:$0 sm:$0xff] }
 0x946   : > { %v1873_v62 = vpop.f32.mrb[16].mxu0 }
 0x947   : > { %v1878_v1 = vsub.f32 %v1877_v60, %v1873_v62  ;;  %v2930_v2 = vpop.f32.mrb[17].mxu0 }
 0x949   : > { %2932 = vmatpush3.msra.mxu1 %v1878_v1  ;;  %2236 = vst.msk [vmem:[#allocation4] sm:$0xff] %vm746_vm0, %v1878_v1 }
 0x94a   : > { %2934 = vmatmul.mubr.msk.f32.vlgmr.msra.gmra.mrb[10].mxu1 %vm1186_vm6, %v4477_v3  ;;  %v2087_v5 = vpop.f32.mrb[18].mxu0  ;;  %2936 = vmatprep.subr.mxu1 %v3816_v8 }
 0x94b   : > { %v2945_v6 = vpop.f32.mrb[19].mxu0  ;;  %2937 = vmatpush3.msra.mxu1 %v1879_v63  ;;  %2938 = vmatprep.mubr.msk.f32.mxu1 %vm3817_vm1, %v3816_v8 }
 0x94c   : > { %2951 = vmatprep.subr.mxu1 %v3816_v8 }
 0x94e   : > { %v2157_v7 = vpop.f32.mrb[20].mxu0 }
 0x94f   : > { %v2158_v9 = vadd.f32 %v2157_v7, %v2087_v5  ;;  %v2950_v11 = vpop.f32.mrb[21].mxu0 }
 0x951   : > { %v2161_v12 = vadd.f32 1e-05, %v2158_v9 }
 0x952   : > { %2939 = vmatmul.mubr.msk.f32.vlgmr.msra.gmra.mrb[10].mxu1 %vm1186_vm6, %v4484_v4 }
 0x953   : > { %3251 = vrcp.f32 %v2161_v12  ;;  %2952 = vmatpush3.msk.msra.mxu1 %vm1036_vm2, %v4454_v40  ;;  %2953 = vmatprep.mubr.msk.f32.mxu1 %vm3817_vm1, %v3816_v8 }
 0x954   : > { %2964 = vmatprep.subr.bf16.mxu1 %v3816_v8 }
 0x95d   : > { %v3252_v3 = vpop.eup %3251 }
 0x95e   : > { %2954 = vmatmul.mubr.msk.f32.vlgmr.msra.gmra.mrb[12].mxu1 %vm748_vm3, %v3252_v3 }
 0x95f   : > { %2980 = vmatprep.mubr.msk.bf16.mxu1 %vm3817_vm1, %v3816_v8 }
 0xa25   : > { %v2016_v13 = vpop.f32.mrb[10].mxu1 }
 0xa26   : > { %v2940_v14 = vpop.f32.mrb[11].mxu1 }
 0xa31   : > { %v2232_v15 = vpop.f32.mrb[12].mxu1 }
 0xa32   : > { %v2238_v16 = vmul.f32 %v2232_v15, %v2016_v13  ;;  %v2955_v4 = vpop.f32.mrb[13].mxu1 }
 0xa34   : > { %v2242_v18 = vmul.f32 %v2240_v17, %v2238_v16 }
 0xa36   : > { %v4565_v40 = vadd.f32 %v2242_v18, %v4409_v0  ;;  %v3227_v0 = vld [vmem:[#allocation23] sm:$0xff]  }
 0xa37   : > { %2965 = vmatpush3.bf16.msra.mxu1 %v3227_v0 }
 0xa38   : > { %v2246_v19 = vsel %vm746_vm0, %v4565_v40, 0.0  ;;  %2966 = vmatprep.subr.bf16.mxu1 %v3816_v8 }
 0xa39   : > { %2247 = vadd.xlane.f32.xlu1 %v2246_v19 }
 0xa3b   : > { %2967 = vmatpush3.bf16.msra.mxu1 %v3228_v27 }
 0xa3c   : > { %2968 = vmatprep.subr.bf16.mxu1 %v3816_v8 }
 0xa3f   : > { %2969 = vmatpush3.bf16.msra.mxu1 %v3229_v28 }
 0xa40   : > { %2970 = vmatprep.subr.bf16.mxu1 %v3816_v8 }
 0xa43   : > { %2971 = vmatpush3.bf16.msra.mxu1 %v3230_v39 }
 0xa44   : > { %2972 = vmatprep.subr.bf16.mxu1 %v3816_v8 }
 0xa47   : > { %2973 = vmatpush3.bf16.msra.mxu1 %v3231_v41 }
 0xa48   : > { %2974 = vmatprep.subr.bf16.mxu1 %v3816_v8 }
 0xa4b   : > { %2975 = vmatpush3.bf16.msra.mxu1 %v3232_v42 }
 0xa4c   : > { %2976 = vmatprep.subr.bf16.mxu1 %v3816_v8 }
 0xa4f   : > { %2977 = vmatpush3.bf16.msra.mxu1 %v3233_v43 }
 0xa50   : > { %2978 = vmatprep.subr.bf16.mxu1 %v3816_v8 }
 0xa53   : > { %2979 = vmatpush3.bf16.msra.mxu1 %v3234_v44 }
 0xac6   : > { %v2248_v20 = vpop.xlane.xlu1 %2247 }
 0xac7   : > { %v2249_v21 = vmul.f32 0.03125, %v2248_v20 }
 0xac9   : > { %v2250_v22 = vsub.f32 %v4565_v40, %v2249_v21 }
 0xacb   : > { %v2251_v23 = vmul.f32 %v2250_v22, %v2250_v22 }
 0xacd   : > { %v2252_v24 = vsel %vm746_vm0, %v2251_v23, 0.0 }
 0xace   : > { %2253 = vadd.xlane.f32.xlu0 %v2252_v24 }
 0xb5b   : > { %v2254_v29 = vpop.xlane.xlu0 %2253 }
 0xb5c   : > { %v2255_v30 = vmul.f32 0.03125, %v2254_v29 }
 0xb5e   : > { %v2256_v31 = vadd.f32 1e-05, %v2255_v30 }
 0xb60   : > { %3253 = vrsqrt.f32 %v2256_v31 }
 0xb6a   : > { %v3254_v32 = vpop.eup %3253 }
 0xb6b   : > { %v2258_v35 = vmul.f32 %v3254_v32, %v2250_v22 }
 0xb6d   : > { %v2265_v36 = vmul.f32 %v2754_v33, %v2258_v35 }
 0xb6f   : > { %v2272_v37 = vadd.f32 %v2755_v10, %v2265_v36 }
 0xb71   : > { %v2273_v38 = vpack.c.bf16 %v2272_v37, %v2272_v37 }
 0xb73   : > { %2961 = vmatmul.mubr.msk.bf16.vlgmr.msra.gmra.mrb[24].mxu0 %vm746_vm0, %v2273_v38 }
 0xc46   : > { %v2327_v45 = vpop.f32.mrb[24].mxu0 }
 0xc47   : > { %v2334_v46 = vmul.f32 0.70710677, %v2327_v45  ;;  %v2962_v47 = vpop.f32.mrb[25].mxu0  ;;  %v2333_v51 = vmul.f32 0.5, %v2327_v45 }
 0xc48   : > { %v2330_v48 = vpop.f32.mrb[26].mxu0 }
 0xc49   : > { %3255 = verf.f32 %v2334_v46  ;;  %v2963_v49 = vpop.f32.mrb[27].mxu0 }
 0xc53   : > { %v3256_v50 = vpop.eup %3255 }
 0xc54   : > { %v2336_v52 = vadd.f32 1.0, %v3256_v50 }
 0xc56   : > { %v2337_v53 = vmul.f32 %v2336_v52, %v2333_v51 }
 0xc58   : > { %v2338_v54 = vpack.c.bf16 %v2337_v53, %v2337_v53 }
 0xc5a   : > { %2981 = vmatmul.mubr.bf16.vlgmr.msra.gmra.mrb[16].mxu1 %v2338_v54 }
 0xd2d   : > { %v2437_v8 = vpop.f32.mrb[16].mxu1 }
 0xd2e   : > { %v2443_v56 = vadd.f32 %v2437_v8, %v4565_v40  ;;  %v2982_v34 = vpop.f32.mrb[17].mxu1 }
 0xd2f   : > { %v2440_v57 = vpop.f32.mrb[18].mxu1 }
 0xd30   : > { %v2983_v58 = vpop.f32.mrb[19].mxu1  ;;  %2444 = vst.msk [vmem:[%s740_s28] sm:$0xff] %vm746_vm0, %v2443_v56 }
 0xd31   : > { %3694 = shalt.err (!%p3691_p10)
}
 0xd32   : > { %s3695_s8 = scalar_lea.hbm %s4586_s6, 128  ;;  %s3699_s29 = scalar_lea.hbm %s4732_s4, 256 }
 0xd33   : > { %p3696_p13 = scmp.ne.s32.totalorder %s4586_s6, %s3695_s8  ;;  %p3700_p12 = scmp.lt.u32.totalorder %s4586_s6, %s4732_s4 }
 0xd34   : > { %p3701_p4 = scmp.lt.u32.totalorder %s3699_s29, %s3695_s8  ;;  %p3703_p5 = scmp.lt.u32.totalorder %s3695_s8, %s4586_s6 }
 0xd35   : > { %p3697_p2 = pnand %p3696_p13, %p4733_p7 }
 0xd36   : > { %p3702_p6 = por %p3701_p4, %p3700_p12 }
 0xd37   : > { %p3698_p11 = pneg %p3697_p2 }
 0xd38   : > { %p3704_p0 = por %p3703_p5, %p3702_p6 }
 0xd3a   : > { %p3705_p8 = pnand %p3704_p0, %p3698_p11 }
 0xd3c   : > { %3708 = shalt.err (!%p3705_p8)
}
 0xd3d   : > { %3068 = dma.vmem_to_hbm [thread:$0]  (%p4733_p7), %s4588_s30, 128, %s4586_s6, %s2446_s2  }
 0xd3e PF: > { %s4734_s28 = sld [smem:[#allocation41_spill]]  ;;  %p4735_p9 = scmp.ne.s32.totalorder %s4708_s17, 0 }
 0xd3f   : > { %p4736_p1 = scmp.ge.s32.totalorder %s3795_s23, 2 }
 0xd41   : > { %p3118_p3 = pnand %p4736_p1, %p4735_p9 }
 0xd44   : > { %s2472_s18 = sand.u32 1, %s4734_s28  }
 0xd45   : > { %s2473_s21 = scalar_lea.sflag [#allocation8], %s2472_s18 }
 0xd46   : > { %3770 = dma.done.wait (!%p3118_p3), %s2473_s21, 128  }
 0xd47   : > { %3772 = vsyncadd (!%p3118_p3), %s2473_s21, 4294967168  ;;  %s40_s23 = sadd.s32 1, %s3795_s23   ;;  %s4737_s18 = smov %s3779_s19 }
 0xd48   : > { %p37_p10 = scmp.ge.s32.totalorder %s40_s23, 4   ;;  %s4738_s19 = smov %s3783_s20 }
 0xd49   : > { %s4739_s20 = smov %s4284_s1  ;;  %s4740_s21 = smov %s3791_s22 }
 0xd4a   : > { %s4741_s22 = smov %s4743_s0  ;;  %39 = sbr.rel (!%p37_p10) target bundleno = 27 (0x1b), region = 194 }
 0xd51   :  { %2478 = vsyncpa [#allocation7], 1 }
 0xd52   :  { %2480 = vsyncpa [#allocation7 + $0x1], 1 }
 0xd53   :  { %2481 = vsyncpa [#allocation10], 1 }
 0xd54   :  { %2483 = vsyncpa [#allocation10 + $0x1], 1 }
 0xd55   :  { %2484 = vsyncpa [#allocation13], 1 }
 0xd56   :  { %2485 = vsyncpa [#allocation16], 1 }
 0xd57   :  { %2486 = vsyncpa [#allocation19], 1 }
 0xd58   :  { %2487 = vsyncpa [#allocation22], 1 }
 0xd59   :  { %2488 = vsyncpa [#allocation25], 1 }
 0xd5a   :  { %2489 = vsyncpa [#allocation28], 1 }
 0xd5b   :  { %2490 = vsyncpa [#allocation8], 1 }
 0xd5c   :  { %2492 = vsyncpa [#allocation8 + $0x1], 1 }

// kernel: tpu_custom_call.1
= control target key start
LH: loop header
LB: loop body
LE: loop exit
PB: predicated region body
PF: predicated region fallthrough
CT: control target
= control target key end

     0   :  { %s4636_s0 = inlined_call_operand.hbm [shape: f32[2,8,32], index: 0, kind: input, shape index: {}]   ;;  %s4637_s1 = inlined_call_operand.hbm [shape: f32[2,8,1], index: 1, kind: input, shape index: {}]   ;;  %s4638_s2 = inlined_call_operand.hbm [shape: f32[1,32], index: 2, kind: input, shape index: {}]   ;;  %s4639_s3 = inlined_call_operand.hbm [shape: f32[1,32], index: 3, kind: input, shape index: {}]   ;;  %s4640_s4 = inlined_call_operand.hbm [shape: bf16[32,96], index: 4, kind: input, shape index: {}]   ;;  %s4641_s5 = inlined_call_operand.hbm [shape: f32[32,8], index: 5, kind: input, shape index: {}]   ;;  %s4642_s6 = inlined_call_operand.hbm [shape: f32[32,8], index: 6, kind: input, shape index: {}]   ;;  %s4643_s7 = inlined_call_operand.hbm [shape: f32[1,32], index: 7, kind: input, shape index: {}]   ;;  %s4644_s8 = inlined_call_operand.hbm [shape: f32[1,32], index: 8, kind: input, shape index: {}]   ;;  %s4645_s9 = inlined_call_operand.hbm [shape: bf16[32,128], index: 9, kind: input, shape index: {}]   ;;  %s4646_s10 = inlined_call_operand.hbm [shape: bf16[128,32], index: 10, kind: input, shape index: {}]   ;;  %s4647_s11 = inlined_call_operand.hbm [shape: f32[32,4], index: 11, kind: input, shape index: {}]   ;;  %s4648_s12 = inlined_call_operand.hbm [shape: f32[4,32], index: 12, kind: input, shape index: {}]   ;;  %s4649_s13 = inlined_call_operand.hbm [shape: f32[8,8], index: 13, kind: input, shape index: {}]   ;;  %s4650_s14 = inlined_call_operand.hbm [shape: f32[8,8], index: 14, kind: input, shape index: {}]   ;;  %s4651_s15 = inlined_call_operand.hbm [shape: f32[2,8,32], index: 15, kind: output, shape index: {}]  }
   0x1   :  { %4670 = sst [smem:[#allocation45_spill]] %s4636_s0 }
   0x2   :  { %4671 = sst [smem:[#allocation46_spill]] %s4637_s1 }
   0x3   :  { %4672 = sst [smem:[#allocation47_spill]] %s4638_s2 }
   0x4   :  { %4673 = sst [smem:[#allocation48_spill]] %s4639_s3 }
   0x5   :  { %4674 = sst [smem:[#allocation49_spill]] %s4640_s4 }
   0x6   :  { %4675 = sst [smem:[#allocation50_spill]] %s4641_s5 }
   0x7   :  { %4676 = sst [smem:[#allocation51_spill]] %s4642_s6 }
   0x8   :  { %4677 = sst [smem:[#allocation52_spill]] %s4643_s7 }
   0x9   :  { %4678 = sst [smem:[#allocation53_spill]] %s4644_s8 }
   0xa   :  { %4679 = sst [smem:[#allocation54_spill]] %s4645_s9 }
   0xb   :  { %4680 = sst [smem:[#allocation55_spill]] %s4646_s10 }
   0xc   :  { %4681 = sst [smem:[#allocation56_spill]] %s4651_s15 }
   0xd   :  { %20 = vsyncpa [#allocation7], 0 }
   0xe   :  { %22 = vsyncpa [#allocation7 + $0x1], 0 }
   0xf   :  { %23 = vsyncpa [#allocation10], 0 }
  0x10   :  { %25 = vsyncpa [#allocation10 + $0x1], 0 }
  0x11   :  { %26 = vsyncpa [#allocation13], 0 }
  0x12   :  { %27 = vsyncpa [#allocation16], 0 }
  0x13   :  { %28 = vsyncpa [#allocation19], 0 }
  0x14   :  { %29 = vsyncpa [#allocation22], 0 }
  0x15   :  { %30 = vsyncpa [#allocation25], 0 }
  0x16   :  { %31 = vsyncpa [#allocation28], 0 }
  0x17   :  { %32 = vsyncpa [#allocation8], 0 }
  0x18   :  { %34 = vsyncpa [#allocation8 + $0x1], 0  ;;  %s3904_s18 = smov 0   ;;  %s3906_s19 = smov 0  }
  0x19   :  { %s3908_s20 = smov 0   ;;  %s3910_s21 = smov 0  }
  0x1a   :  { %s3912_s22 = smov 0   ;;  %s3914_s23 = smov 0  }
  0x1b LB: > { %4682 = sst [smem:[#allocation41_spill]] %s3775_s18  ;;  %s3935_s24 = sadd.s32 4294967295, %s3795_s23   ;;  %s3795_s23 = sphi %s3914_s23, %s40_s23   ;;  %s3791_s22 = sphi %s3912_s22, %s4741_s22   ;;  %s3787_s21 = sphi %s3910_s21, %s4740_s21   ;;  %s3783_s20 = sphi %s3908_s20, %s4739_s20   ;;  %s3779_s19 = sphi %s3906_s19, %s4738_s19   ;;  %s3775_s18 = sphi %s3904_s18, %s4737_s18  }
  0x1c   : > { %4683 = sst [smem:[#allocation42_spill]] %s3787_s21  ;;  %p2689_p0 = scmp.ge.s32.totalorder %s3795_s23, 1 }
  0x1d   : > { %4684 = sst [smem:[#allocation43_spill]] %s3935_s24  ;;  %p4656_p1 = scmp.eq.s32.totalorder %s3935_s24, 0 }
  0x1e   : > { %p414_p2 = scmp.lt.s32.totalorder %s3795_s23, 3  ;;  %s3797_s26 = smov [#allocation11]  }
  0x1f   : > { %s427_s27 = sshll.u32 %s3797_s26, 4  ;;  %s3798_s28 = smov [#allocation12]   ;;  %s428_s27 = int_to_ptr.vmem [resolvable:$true] %s427_s27 }
  0x20   : > { %p3940_p3 = pnand %p2689_p0, %p414_p2  ;;  %s438_s29 = sshll.u32 %s3798_s28, 4  ;;  %s3953_s29 = int_to_ptr.vmem [resolvable:$true] %s438_s29 }
  0x21   : > { %s3799_s16 = smov [#allocation15]   ;;  %s4688_s2 = sld [smem:[#allocation47_spill]] }
  0x22   : > { %s4685_s25 = scalar_select %p3940_p3, 1, 0 }
  0x23   : > { %p3070_p5 = pneg %p3940_p3  ;;  %s461_s17 = sshll.u32 %s3799_s16, 4  ;;  %s3955_s17 = int_to_ptr.vmem [resolvable:$true] %s461_s17 }
  0x24   : > { %4686 = sst [smem:[#allocation44_spill]] %s4685_s25 }
  0x25   : > { %p3949_p6 = pnand %p3070_p5, %p4656_p1 }
  0x27   : > { %s3257_s21 = scalar_lea.hbm %s4688_s2, 16  ;;  %p3965_p8 = pneg %p3949_p6 }
  0x28   : > { %p3258_p7 = scmp.ne.s32.totalorder %s4688_s2, %s3257_s21  ;;  %p3264_p11 = scmp.lt.u32.totalorder %s3257_s21, %s4688_s2 }
  0x2a   : > { %p3260_p9 = pnand %p3965_p8, %p3258_p7 }
  0x2c   : > { %p3261_p10 = pneg %p3260_p9 }
  0x2e   : > { %p3266_p12 = pnand %p3264_p11, %p3261_p10 }
  0x30   : > { %3269 = shalt.err (!%p3266_p12)
}
  0x31   : > { %s3270_s15 = scalar_lea.vmem %s428_s27, 16  ;;  %s3277_s1 = scalar_lea.vmem %s428_s27, 32 }
  0x32   : > { %p3271_p13 = scmp.ne.s32.totalorder %s428_s27, %s3270_s15  ;;  %p3278_p5 = scmp.lt.s32.totalorder %s428_s27, %s428_s27 }
  0x33   : > { %p3279_p4 = scmp.lt.s32.totalorder %s3277_s1, %s3270_s15 }
  0x34   : > { %p3273_p0 = pnand %p3271_p13, %p3965_p8 }
  0x35   : > { %p3280_p1 = por %p3279_p4, %p3278_p5 }
  0x36   : > { %p3274_p2 = pneg %p3273_p0 }
  0x38   : > { %p3281_p3 = pnand %p3280_p1, %p3274_p2 }
  0x3a   : > { %3284 = shalt.err (!%p3281_p3)
}
  0x3b   : > { %3073 = dma.hbm_to_vmem [thread:$0]  (!%p3949_p6), %s4688_s2, 16, %s428_s27, [#allocation10]  }
  0x3c   : > { %s4690_s3 = sld [smem:[#allocation48_spill]] }
  0x42   : > { %s3285_s16 = scalar_lea.hbm %s4690_s3, 16 }
  0x43   : > { %p3286_p7 = scmp.ne.s32.totalorder %s4690_s3, %s3285_s16  ;;  %p3292_p1 = scmp.lt.u32.totalorder %s3285_s16, %s4690_s3 }
  0x45   : > { %p3288_p9 = pnand %p3286_p7, %p3965_p8 }
  0x47   : > { %p3289_p4 = pneg %p3288_p9 }
  0x49   : > { %p3294_p3 = pnand %p3292_p1, %p3289_p4 }
  0x4b   : > { %3297 = shalt.err (!%p3294_p3)
}
  0x4c   : > { %s3298_s27 = scalar_lea.vmem %s3953_s29, 16  ;;  %s3305_s18 = scalar_lea.vmem %s3953_s29, 32 }
  0x4d   : > { %p3299_p10 = scmp.ne.s32.totalorder %s3953_s29, %s3298_s27  ;;  %p3306_p13 = scmp.lt.s32.totalorder %s3953_s29, %s3953_s29 }
  0x4e   : > { %p3307_p0 = scmp.lt.s32.totalorder %s3305_s18, %s3298_s27 }
  0x4f   : > { %p3301_p11 = pnand %p3299_p10, %p3965_p8 }
  0x50   : > { %p3308_p2 = por %p3307_p0, %p3306_p13 }
  0x51   : > { %p3302_p12 = pneg %p3301_p11 }
  0x53   : > { %p3309_p5 = pnand %p3308_p2, %p3302_p12 }
  0x55   : > { %3312 = shalt.err (!%p3309_p5)
}
  0x56   : > { %3076 = dma.hbm_to_vmem [thread:$0]  (!%p3949_p6), %s4690_s3, 16, %s3953_s29, [#allocation13]  }
  0x57   : > { %s4691_s5 = sld [smem:[#allocation50_spill]] }
  0x5d   : > { %s3313_s21 = scalar_lea.hbm %s4691_s5, 512 }
  0x5e   : > { %p3314_p7 = scmp.ne.s32.totalorder %s4691_s5, %s3313_s21  ;;  %p3320_p1 = scmp.lt.u32.totalorder %s3313_s21, %s4691_s5 }
  0x60   : > { %p3316_p9 = pnand %p3314_p7, %p3965_p8 }
  0x62   : > { %p3317_p4 = pneg %p3316_p9 }
  0x64   : > { %p3322_p3 = pnand %p3320_p1, %p3317_p4 }
  0x66   : > { %3325 = shalt.err (!%p3322_p3)
}
  0x67   : > { %s3326_s29 = scalar_lea.vmem %s3955_s17, 512  ;;  %p3334_p13 = scmp.lt.s32.totalorder %s3955_s17, %s3955_s17 }
  0x68   : > { %p3327_p10 = scmp.ne.s32.totalorder %s3955_s17, %s3326_s29  ;;  %p3335_p0 = scmp.lt.s32.totalorder %s3326_s29, %s3326_s29 }
  0x6a   : > { %p3329_p11 = pnand %p3327_p10, %p3965_p8  ;;  %p3336_p2 = por %p3335_p0, %p3334_p13 }
  0x6c   : > { %p3330_p12 = pneg %p3329_p11 }
  0x6e   : > { %p3337_p5 = pnand %p3336_p2, %p3330_p12 }
  0x70   : > { %3340 = shalt.err (!%p3337_p5)
}
  0x71   : > { %s4661_s18 = smov 128   ;;  %s4667_s24 = smov 8  }
  0x72   : > { %3082 = dma.hbm_to_vmem [thread:$0]  (!%p3949_p6), %s4691_s5, 512, %s3955_s17, [#allocation16], %s4661_s18, %s4661_s18, %s4667_s24  }
  0x73   : > { %s3802_s0 = smov [#allocation18]   ;;  %s4692_s7 = sld [smem:[#allocation52_spill]] }
  0x74   : > { %s488_s21 = sshll.u32 %s3802_s0, 4  ;;  %s489_s21 = int_to_ptr.vmem [resolvable:$true] %s488_s21 }
  0x79   : > { %s3341_s1 = scalar_lea.hbm %s4692_s7, 16 }
  0x7a   : > { %p3342_p7 = scmp.ne.s32.totalorder %s4692_s7, %s3341_s1  ;;  %p3348_p1 = scmp.lt.u32.totalorder %s3341_s1, %s4692_s7 }
  0x7c   : > { %p3344_p9 = pnand %p3342_p7, %p3965_p8 }
  0x7e   : > { %p3345_p4 = pneg %p3344_p9 }
  0x80   : > { %p3350_p3 = pnand %p3348_p1, %p3345_p4 }
  0x82   : > { %3353 = shalt.err (!%p3350_p3)
}
  0x83   : > { %s3354_s17 = scalar_lea.vmem %s489_s21, 16  ;;  %s3361_s25 = scalar_lea.vmem %s489_s21, 32 }
  0x84   : > { %p3355_p10 = scmp.ne.s32.totalorder %s489_s21, %s3354_s17  ;;  %p3362_p13 = scmp.lt.s32.totalorder %s489_s21, %s489_s21 }
  0x85   : > { %p3363_p0 = scmp.lt.s32.totalorder %s3361_s25, %s3354_s17 }
  0x86   : > { %p3357_p11 = pnand %p3355_p10, %p3965_p8 }
  0x87   : > { %p3364_p2 = por %p3363_p0, %p3362_p13 }
  0x88   : > { %p3358_p12 = pneg %p3357_p11 }
  0x8a   : > { %p3365_p5 = pnand %p3364_p2, %p3358_p12 }
  0x8c   : > { %3368 = shalt.err (!%p3365_p5)
}
  0x8d   : > { %3088 = dma.hbm_to_vmem [thread:$0]  (!%p3949_p6), %s4692_s7, 16, %s489_s21, [#allocation19]  }
  0x8e   : > { %s3803_s2 = smov [#allocation21]   ;;  %s3804_s16 = smov [#allocation24]  }
  0x8f   : > { %s509_s3 = sshll.u32 %s3803_s2, 4  ;;  %s535_s15 = sshll.u32 %s3804_s16, 4  ;;  %s510_s3 = int_to_ptr.vmem [resolvable:$true] %s509_s3  ;;  %s4049_s15 = int_to_ptr.vmem [resolvable:$true] %s535_s15 }
  0x90   : > { %s4693_s9 = sld [smem:[#allocation54_spill]] }
  0x96   : > { %s3369_s29 = scalar_lea.hbm %s4693_s9, 256 }
  0x97   : > { %p3370_p7 = scmp.ne.s32.totalorder %s4693_s9, %s3369_s29  ;;  %p3376_p1 = scmp.lt.u32.totalorder %s3369_s29, %s4693_s9 }
  0x99   : > { %p3372_p9 = pnand %p3370_p7, %p3965_p8 }
  0x9b   : > { %p3373_p4 = pneg %p3372_p9 }
  0x9d   : > { %p3378_p3 = pnand %p3376_p1, %p3373_p4 }
  0x9f   : > { %3381 = shalt.err (!%p3378_p3)
}
  0xa0   : > { %s3382_s0 = scalar_lea.vmem %s510_s3, 256  ;;  %p3390_p13 = scmp.lt.s32.totalorder %s510_s3, %s510_s3 }
  0xa1   : > { %p3383_p10 = scmp.ne.s32.totalorder %s510_s3, %s3382_s0  ;;  %p3391_p0 = scmp.lt.s32.totalorder %s3382_s0, %s3382_s0 }
  0xa3   : > { %p3385_p11 = pnand %p3383_p10, %p3965_p8  ;;  %p3392_p2 = por %p3391_p0, %p3390_p13 }
  0xa5   : > { %p3386_p12 = pneg %p3385_p11 }
  0xa7   : > { %p3393_p5 = pnand %p3392_p2, %p3386_p12 }
  0xa9   : > { %3396 = shalt.err (!%p3393_p5)
}
  0xaa   : > { %s4663_s2 = smov 64   ;;  %s4665_s16 = smov 4  }
  0xab   : > { %3094 = dma.hbm_to_vmem [thread:$0]  (!%p3949_p6), %s4693_s9, 256, %s510_s3, [#allocation22], %s4663_s2, %s4663_s2, %s4665_s16  }
  0xac   : > { %s3397_s25 = scalar_lea.hbm %s4647_s11, 512 }
  0xad   : > { %p3398_p7 = scmp.ne.s32.totalorder %s4647_s11, %s3397_s25  ;;  %p3404_p1 = scmp.lt.u32.totalorder %s3397_s25, %s4647_s11 }
  0xaf   : > { %p3400_p9 = pnand %p3398_p7, %p3965_p8 }
  0xb1   : > { %p3401_p4 = pneg %p3400_p9 }
  0xb3   : > { %p3406_p3 = pnand %p3404_p1, %p3401_p4 }
  0xb5   : > { %3409 = shalt.err (!%p3406_p3)
}
  0xb6   : > { %s3410_s3 = scalar_lea.vmem %s4049_s15, 512  ;;  %p3418_p13 = scmp.lt.s32.totalorder %s4049_s15, %s4049_s15 }
  0xb7   : > { %p3411_p10 = scmp.ne.s32.totalorder %s4049_s15, %s3410_s3  ;;  %p3419_p0 = scmp.lt.s32.totalorder %s3410_s3, %s3410_s3 }
  0xb9   : > { %p3413_p11 = pnand %p3411_p10, %p3965_p8  ;;  %p3420_p2 = por %p3419_p0, %p3418_p13 }
  0xbb   : > { %p3414_p12 = pneg %p3413_p11 }
  0xbd   : > { %p3421_p5 = pnand %p3420_p2, %p3414_p12 }
  0xbf   : > { %3424 = shalt.err (!%p3421_p5)
}
  0xc0   : > { %s4694_s18 = smov 128   ;;  %s3807_s29 = smov [#allocation27]  }
  0xc1   : > { %3100 = dma.hbm_to_vmem [thread:$0]  (!%p3949_p6), %s4647_s11, 512, %s4049_s15, [#allocation25], %s4694_s18, %s4694_s18, %s4667_s24  }
  0xc2   : > { %s560_s17 = sshll.u32 %s3807_s29, 4  ;;  %s3808_s25 = smov [#allocation14]   ;;  %s561_s17 = int_to_ptr.vmem [resolvable:$true] %s560_s17 }
  0xc3   : > { %s448_s26 = sshll.u32 %s3808_s25, 4  ;;  %s3425_s3 = scalar_lea.hbm %s4649_s13, 128  ;;  %s4098_s26 = int_to_ptr.vmem [resolvable:$true] %s448_s26 }
  0xc4   : > { %p3426_p7 = scmp.ne.s32.totalorder %s4649_s13, %s3425_s3  ;;  %p3432_p1 = scmp.lt.u32.totalorder %s3425_s3, %s4649_s13 }
  0xc6   : > { %p3428_p9 = pnand %p3426_p7, %p3965_p8 }
  0xc8   : > { %p3429_p4 = pneg %p3428_p9 }
  0xca   : > { %p3434_p3 = pnand %p3432_p1, %p3429_p4 }
  0xcc   : > { %3437 = shalt.err (!%p3434_p3)
}
  0xcd   : > { %s3438_s27 = scalar_lea.vmem %s561_s17, 128  ;;  %p3446_p13 = scmp.lt.s32.totalorder %s561_s17, %s561_s17 }
  0xce   : > { %p3439_p10 = scmp.ne.s32.totalorder %s561_s17, %s3438_s27  ;;  %p3447_p0 = scmp.lt.s32.totalorder %s3438_s27, %s3438_s27 }
  0xd0   : > { %p3441_p11 = pnand %p3439_p10, %p3965_p8  ;;  %p3448_p2 = por %p3447_p0, %p3446_p13 }
  0xd2   : > { %p3442_p12 = pneg %p3441_p11 }
  0xd4   : > { %p3449_p5 = pnand %p3448_p2, %p3442_p12 }
  0xd6   : > { %3452 = shalt.err (!%p3449_p5)
}
  0xd7   : > { %3106 = dma.hbm_to_vmem [thread:$0]  (!%p3949_p6), %s4649_s13, 128, %s561_s17, [#allocation28]  }
  0xd8   : > { %s4695_s4 = sld [smem:[#allocation49_spill]] }
  0xde   : > { %s3453_s21 = scalar_lea.hbm %s4695_s4, 256 }
  0xdf   : > { %p3454_p7 = scmp.ne.s32.totalorder %s4695_s4, %s3453_s21  ;;  %p3460_p1 = scmp.lt.u32.totalorder %s3453_s21, %s4695_s4 }
  0xe1   : > { %p3456_p9 = pnand %p3454_p7, %p3965_p8 }
  0xe3   : > { %p3457_p4 = pneg %p3456_p9 }
  0xe5   : > { %p3462_p3 = pnand %p3460_p1, %p3457_p4 }
  0xe7   : > { %3465 = shalt.err (!%p3462_p3)
}
  0xe8   : > { %s3466_s17 = scalar_lea.vmem %s4098_s26, 256  ;;  %p3474_p13 = scmp.lt.s32.totalorder %s4098_s26, %s4098_s26 }
  0xe9   : > { %p3467_p10 = scmp.ne.s32.totalorder %s4098_s26, %s3466_s17  ;;  %p3475_p0 = scmp.lt.s32.totalorder %s3466_s17, %s3466_s17 }
  0xeb   : > { %p3469_p11 = pnand %p3467_p10, %p3965_p8  ;;  %p3476_p2 = por %p3475_p0, %p3474_p13 }
  0xed   : > { %p3470_p12 = pneg %p3469_p11 }
  0xef   : > { %p3477_p5 = pnand %p3476_p2, %p3470_p12 }
  0xf1   : > { %3480 = shalt.err (!%p3477_p5)
}
  0xf2   : > { %s4696_s27 = smov 4   ;;  %s4697_s2 = smov 64  }
  0xf3   : > { %3079 = dma.hbm_to_vmem [thread:$0]  (!%p3949_p6), %s4695_s4, 256, %s4098_s26, [#allocation13], %s4697_s2, %s4697_s2, %s4696_s27  }
  0xf4   : > { %s3809_s25 = smov [#allocation17]   ;;  %s3810_s0 = smov [#allocation20]  }
  0xf5   : > { %s474_s21 = sshll.u32 %s3809_s25, 4  ;;  %s499_s3 = sshll.u32 %s3810_s0, 4  ;;  %s475_s21 = int_to_ptr.vmem [resolvable:$true] %s474_s21  ;;  %s4144_s3 = int_to_ptr.vmem [resolvable:$true] %s499_s3 }
  0xf6   : > { %s4698_s6 = sld [smem:[#allocation51_spill]] }
  0xfc   : > { %s3481_s17 = scalar_lea.hbm %s4698_s6, 512 }
  0xfd   : > { %p3482_p7 = scmp.ne.s32.totalorder %s4698_s6, %s3481_s17  ;;  %p3488_p1 = scmp.lt.u32.totalorder %s3481_s17, %s4698_s6 }
  0xff   : > { %p3484_p9 = pnand %p3482_p7, %p3965_p8 }
 0x101   : > { %p3485_p4 = pneg %p3484_p9 }
 0x103   : > { %p3490_p3 = pnand %p3488_p1, %p3485_p4 }
 0x105   : > { %3493 = shalt.err (!%p3490_p3)
}
 0x106   : > { %s3494_s29 = scalar_lea.vmem %s475_s21, 512  ;;  %p3502_p13 = scmp.lt.s32.totalorder %s475_s21, %s475_s21 }
 0x107   : > { %p3495_p10 = scmp.ne.s32.totalorder %s475_s21, %s3494_s29  ;;  %p3503_p0 = scmp.lt.s32.totalorder %s3494_s29, %s3494_s29 }
 0x109   : > { %p3497_p11 = pnand %p3495_p10, %p3965_p8  ;;  %p3504_p2 = por %p3503_p0, %p3502_p13 }
 0x10b   : > { %p3498_p12 = pneg %p3497_p11 }
 0x10d   : > { %p3505_p5 = pnand %p3504_p2, %p3498_p12 }
 0x10f   : > { %3508 = shalt.err (!%p3505_p5)
}
 0x110   : > { %s4699_s5 = smov 8   ;;  %s4700_s8 = sld [smem:[#allocation53_spill]] }
 0x111   : > { %3085 = dma.hbm_to_vmem [thread:$0]  (!%p3949_p6), %s4698_s6, 512, %s475_s21, [#allocation16], %s4694_s18, %s4694_s18, %s4699_s5  }
 0x116   : > { %s3509_s15 = scalar_lea.hbm %s4700_s8, 16 }
 0x117   : > { %p3510_p7 = scmp.ne.s32.totalorder %s4700_s8, %s3509_s15  ;;  %p3516_p1 = scmp.lt.u32.totalorder %s3509_s15, %s4700_s8 }
 0x119   : > { %p3512_p9 = pnand %p3510_p7, %p3965_p8 }
 0x11b   : > { %p3513_p4 = pneg %p3512_p9 }
 0x11d   : > { %p3518_p3 = pnand %p3516_p1, %p3513_p4 }
 0x11f   : > { %3521 = shalt.err (!%p3518_p3)
}
 0x120   : > { %s3522_s18 = scalar_lea.vmem %s4144_s3, 16  ;;  %s3529_s21 = scalar_lea.vmem %s4144_s3, 32 }
 0x121   : > { %p3523_p10 = scmp.ne.s32.totalorder %s4144_s3, %s3522_s18  ;;  %p3530_p13 = scmp.lt.s32.totalorder %s4144_s3, %s4144_s3 }
 0x122   : > { %p3531_p0 = scmp.lt.s32.totalorder %s3529_s21, %s3522_s18 }
 0x123   : > { %p3525_p11 = pnand %p3523_p10, %p3965_p8 }
 0x124   : > { %p3532_p2 = por %p3531_p0, %p3530_p13 }
 0x125   : > { %p3526_p12 = pneg %p3525_p11 }
 0x127   : > { %p3533_p5 = pnand %p3532_p2, %p3526_p12 }
 0x129   : > { %3536 = shalt.err (!%p3533_p5)
}
 0x12a   : > { %3091 = dma.hbm_to_vmem [thread:$0]  (!%p3949_p6), %s4700_s8, 16, %s4144_s3, [#allocation19]  }
 0x12b   : > { %s3811_s25 = smov [#allocation23]   ;;  %s3812_s1 = smov [#allocation26]  }
 0x12c   : > { %s522_s0 = sshll.u32 %s3811_s25, 4  ;;  %s549_s15 = sshll.u32 %s3812_s1, 4  ;;  %s523_s0 = int_to_ptr.vmem [resolvable:$true] %s522_s0  ;;  %s4191_s15 = int_to_ptr.vmem [resolvable:$true] %s549_s15 }
 0x12d   : > { %s4701_s10 = sld [smem:[#allocation55_spill]] }
 0x133   : > { %s3537_s26 = scalar_lea.hbm %s4701_s10, 1024 }
 0x134   : > { %p3538_p7 = scmp.ne.s32.totalorder %s4701_s10, %s3537_s26  ;;  %p3544_p1 = scmp.lt.u32.totalorder %s3537_s26, %s4701_s10 }
 0x136   : > { %p3540_p9 = pnand %p3538_p7, %p3965_p8 }
 0x138   : > { %p3541_p4 = pneg %p3540_p9 }
 0x13a   : > { %p3546_p3 = pnand %p3544_p1, %p3541_p4 }
 0x13c   : > { %3549 = shalt.err (!%p3546_p3)
}
 0x13d   : > { %s3550_s5 = scalar_lea.vmem %s523_s0, 1024  ;;  %p3558_p13 = scmp.lt.s32.totalorder %s523_s0, %s523_s0 }
 0x13e   : > { %p3551_p10 = scmp.ne.s32.totalorder %s523_s0, %s3550_s5  ;;  %p3559_p0 = scmp.lt.s32.totalorder %s3550_s5, %s3550_s5 }
 0x140   : > { %p3553_p11 = pnand %p3551_p10, %p3965_p8  ;;  %p3560_p2 = por %p3559_p0, %p3558_p13 }
 0x142   : > { %p3554_p12 = pneg %p3553_p11 }
 0x144   : > { %p3561_p5 = pnand %p3560_p2, %p3554_p12 }
 0x146   : > { %3564 = shalt.err (!%p3561_p5)
}
 0x147   : > { %3097 = dma.hbm_to_vmem [thread:$0]  (!%p3949_p6), %s4701_s10, 1024, %s523_s0, [#allocation22], %s4697_s2, %s4697_s2, %s4696_s27  }
 0x148   : > { %s3565_s16 = scalar_lea.hbm %s4648_s12, 64 }
 0x149   : > { %p3566_p7 = scmp.ne.s32.totalorder %s4648_s12, %s3565_s16  ;;  %p3572_p1 = scmp.lt.u32.totalorder %s3565_s16, %s4648_s12 }
 0x14b   : > { %p3568_p9 = pnand %p3566_p7, %p3965_p8 }
 0x14d   : > { %p3569_p4 = pneg %p3568_p9 }
 0x14f   : > { %p3574_p3 = pnand %p3572_p1, %p3569_p4 }
 0x151   : > { %3577 = shalt.err (!%p3574_p3)
}
 0x152   : > { %s3578_s27 = scalar_lea.vmem %s4191_s15, 64  ;;  %p3586_p13 = scmp.lt.s32.totalorder %s4191_s15, %s4191_s15 }
 0x153   : > { %p3579_p10 = scmp.ne.s32.totalorder %s4191_s15, %s3578_s27  ;;  %p3587_p0 = scmp.lt.s32.totalorder %s3578_s27, %s3578_s27 }
 0x155   : > { %p3581_p11 = pnand %p3579_p10, %p3965_p8  ;;  %p3588_p2 = por %p3587_p0, %p3586_p13 }
 0x157   : > { %p3582_p12 = pneg %p3581_p11 }
 0x159   : > { %p3589_p5 = pnand %p3588_p2, %p3582_p12 }
 0x15b   : > { %3592 = shalt.err (!%p3589_p5)
}
 0x15c   : > { %3103 = dma.hbm_to_vmem [thread:$0]  (!%p3949_p6), %s4648_s12, 64, %s4191_s15, [#allocation25]  }
 0x15d   : > { %s3813_s3 = smov [#allocation29]   ;;  %s3593_s1 = scalar_lea.hbm %s4650_s14, 128 }
 0x15e   : > { %s571_s5 = sshll.u32 %s3813_s3, 4  ;;  %p3594_p7 = scmp.ne.s32.totalorder %s4650_s14, %s3593_s1  ;;  %s572_s5 = int_to_ptr.vmem [resolvable:$true] %s571_s5 }
 0x15f   : > { %p3600_p1 = scmp.lt.u32.totalorder %s3593_s1, %s4650_s14 }
 0x160   : > { %p3596_p9 = pnand %p3594_p7, %p3965_p8 }
 0x162   : > { %p3597_p4 = pneg %p3596_p9 }
 0x164   : > { %p3602_p3 = pnand %p3600_p1, %p3597_p4 }
 0x166   : > { %3605 = shalt.err (!%p3602_p3)
}
 0x167   : > { %s3606_s15 = scalar_lea.vmem %s572_s5, 128  ;;  %p3614_p13 = scmp.lt.s32.totalorder %s572_s5, %s572_s5 }
 0x168   : > { %p3607_p10 = scmp.ne.s32.totalorder %s572_s5, %s3606_s15  ;;  %p3615_p0 = scmp.lt.s32.totalorder %s3606_s15, %s3606_s15 }
 0x16a   : > { %p3609_p11 = pnand %p3607_p10, %p3965_p8  ;;  %p3616_p2 = por %p3615_p0, %p3614_p13 }
 0x16c   : > { %p3610_p12 = pneg %p3609_p11 }
 0x16e   : > { %p3617_p5 = pnand %p3616_p2, %p3610_p12 }
 0x170   : > { %3620 = shalt.err (!%p3617_p5)
}
 0x171   : > { %s4702_s27 = sld [smem:[#allocation41_spill]]  ;;  %s4703_s28 = sld [smem:[#allocation43_spill]] }
 0x172   : > { %3109 = dma.hbm_to_vmem [thread:$0]  (!%p3949_p6), %s4650_s14, 128, %s572_s5, [#allocation28]  }
 0x173   : > { %s2688_s2 = sadd.s32 4294967294, %s3795_s23   ;;  %s52_s0 = sadd.s32 1, %s3791_s22 }
 0x174   : > { %s61_s30 = sadd.s32 1, %s3783_s20  ;;  %p54_p8 = scmp.ge.s32.totalorder %s52_s0, 2 }
 0x175   : > { %p68_p7 = scmp.ne.s32.totalorder %s3783_s20, %s3779_s19  ;;  %p69_p9 = scmp.eq.s32.totalorder %s3795_s23, 0 }
 0x176   : > { %s4743_s0 = smov (%p54_p8, %s52_s0), 0  ;;  %p407_p12 = scmp.eq.s32.totalorder %s2688_s2, 1 }
 0x177   : > { %p74_p4 = scmp.ne.s32.totalorder %s3779_s19, %s4702_s27  ;;  %p4265_p1 = por %p69_p9, %p68_p7 }
 0x178   : > { %p4705_p3 = scmp.eq.s32.totalorder %s4703_s28, 0  ;;  %s56_s24 = ssub.s32 %s3791_s22, %s4743_s0 }
 0x179   : > { %p401_p10 = scmp.eq.s32.totalorder %s4703_s28, 1  ;;  %p59_p11 = scmp.eq.s32.totalorder %s56_s24, 0 }
 0x17a   : > { %p4271_p6 = por %p4705_p3, %p74_p4  ;;  %p3134_p0 = scmp.lt.s32.totalorder %s3795_s23, 2 }
 0x17b   : > { %p4278_p13 = por %p401_p10, %p68_p7  ;;  %p4286_p2 = por %p407_p12, %p74_p4 }
 0x17c   : > { %s4706_s5 = scalar_select %p4271_p6, 1, 0 }
 0x17d   : > { %s4707_s25 = scalar_select %p4278_p13, 1, 0 }
 0x17e   : > { %s4284_s1 = scalar_select %p59_p11, %s3783_s20, %s61_s30  }
 0x17f   : > { %s4708_s17 = scalar_select %p4286_p2, 1, 0 }
 0x180   : > { %s582_s16 = sand.u32 1, %s3783_s20   ;;  %s2705_s29 = sshll.u32 %s3791_s22, 7 }
 0x181   : > { %s4291_s26 = sshll.u32 %s582_s16, 3  ;;  %s4709_s21 = sld [smem:[#allocation45_spill]] }
 0x182   : > { %s586_s2 = scalar_lea.vmem [#allocation6], %s4291_s26  ;;  %p4304_p5 = pnand %p3134_p0, %p4265_p1 }
 0x183   : > { %s594_s30 = sshll.u32 %s586_s2, 4  ;;  %s4712_s7 = sld [smem:[#allocation46_spill]]  ;;  %s4300_s30 = int_to_ptr.vmem [resolvable:$true] %s594_s30 }
 0x184   : > { %s601_s18 = sand.u32 1, %s3795_s23   ;;  %p3623_p7 = pneg %p4304_p5 }
 0x187   : > { %s4710_s27 = smov %s4709_s21  ;;  %s4297_s28 = scalar_lea.hbm %s4709_s21, %s2705_s29 }
 0x188   : > { %s583_s21 = scalar_lea.sflag [#allocation7], %s582_s16  ;;  %s3621_s8 = scalar_lea.hbm %s4297_s28, 128 }
 0x189   : > { %s4311_s15 = scalar_lea.hbm %s4712_s7, %s2705_s29  ;;  %p3622_p8 = scmp.ne.s32.totalorder %s4297_s28, %s3621_s8 }
 0x18a   : > { %s3626_s9 = scalar_lea.hbm %s4710_s27, 256  ;;  %p3627_p1 = scmp.lt.u32.totalorder %s4297_s28, %s4710_s27 }
 0x18b   : > { %p3624_p9 = pnand %p3623_p7, %p3622_p8  ;;  %p3628_p3 = scmp.lt.u32.totalorder %s3626_s9, %s3621_s8 }
 0x18c   : > { %p3630_p11 = scmp.lt.u32.totalorder %s3621_s8, %s4297_s28 }
 0x18d   : > { %p3625_p4 = pneg %p3624_p9  ;;  %p3629_p10 = por %p3628_p3, %p3627_p1 }
 0x18f   : > { %p3631_p12 = por %p3630_p11, %p3629_p10 }
 0x191   : > { %p3632_p0 = pnand %p3631_p12, %p3625_p4 }
 0x193   : > { %3635 = shalt.err (!%p3632_p0)
}
 0x194   : > { %s3636_s6 = scalar_lea.vmem %s4300_s30, 128  ;;  %s3814_s16 = smov [#allocation6]  }
 0x195   : > { %p3637_p8 = scmp.ne.s32.totalorder %s4300_s30, %s3636_s6  ;;  %s3641_s29 = sshll.u32 %s3814_s16, 4  ;;  %s3642_s29 = int_to_ptr.vmem [resolvable:$false] %s3641_s29 }
 0x196   : > { %s3643_s10 = scalar_lea.vmem %s3642_s29, 256  ;;  %p3644_p13 = scmp.lt.s32.totalorder %s4300_s30, %s3642_s29 }
 0x197   : > { %p3639_p9 = pnand %p3637_p8, %p3623_p7  ;;  %p3645_p1 = scmp.lt.s32.totalorder %s3643_s10, %s3636_s6 }
 0x199   : > { %p3640_p2 = pneg %p3639_p9  ;;  %p3646_p3 = por %p3645_p1, %p3644_p13 }
 0x19b   : > { %p3647_p10 = pnand %p3646_p3, %p3640_p2 }
 0x19d   : > { %3650 = shalt.err (!%p3647_p10)
}
 0x19e   : > { %3113 = dma.hbm_to_vmem [thread:$0]  (!%p4304_p5), %s4297_s28, 128, %s4300_s30, %s583_s21  }
 0x19f   : > { %s605_s8 = scalar_lea.vmem [#allocation9], %s4291_s26  ;;  %s602_s3 = scalar_lea.sflag [#allocation10], %s601_s18 }
 0x1a0   : > { %s613_s9 = sshll.u32 %s605_s8, 4  ;;  %s3651_s2 = scalar_lea.hbm %s4311_s15, 128  ;;  %s614_s9 = int_to_ptr.vmem [resolvable:$true] %s613_s9 }
 0x1a1   : > { %p3652_p13 = scmp.ne.s32.totalorder %s4311_s15, %s3651_s2  ;;  %s3656_s16 = scalar_lea.hbm %s4712_s7, 256 }
 0x1a2   : > { %p3657_p11 = scmp.lt.u32.totalorder %s4311_s15, %s4712_s7  ;;  %p3658_p12 = scmp.lt.u32.totalorder %s3656_s16, %s3651_s2 }
 0x1a3   : > { %p3654_p2 = pnand %p3652_p13, %p3623_p7  ;;  %p3660_p8 = scmp.lt.u32.totalorder %s3651_s2, %s4311_s15 }
 0x1a4   : > { %p3659_p0 = por %p3658_p12, %p3657_p11 }
 0x1a5   : > { %p3655_p4 = pneg %p3654_p2 }
 0x1a6   : > { %p3661_p9 = por %p3660_p8, %p3659_p0 }
 0x1a8   : > { %p3662_p1 = pnand %p3661_p9, %p3655_p4 }
 0x1aa   : > { %3665 = shalt.err (!%p3662_p1)
}
 0x1ab   : > { %s3666_s26 = scalar_lea.vmem %s614_s9, 128  ;;  %s3815_s28 = smov [#allocation9]  }
 0x1ac   : > { %p3667_p3 = scmp.ne.s32.totalorder %s614_s9, %s3666_s26  ;;  %s3671_s30 = sshll.u32 %s3815_s28, 4  ;;  %s3672_s30 = int_to_ptr.vmem [resolvable:$false] %s3671_s30 }
 0x1ad   : > { %s3673_s18 = scalar_lea.vmem %s3672_s30, 256  ;;  %p3674_p2 = scmp.lt.s32.totalorder %s614_s9, %s3672_s30 }
 0x1ae   : > { %p3669_p10 = pnand %p3667_p3, %p3623_p7  ;;  %p3675_p6 = scmp.lt.s32.totalorder %s3673_s18, %s3666_s26 }
 0x1b0   : > { %p3670_p13 = pneg %p3669_p10  ;;  %p3676_p11 = por %p3675_p6, %p3674_p2 }
 0x1b2   : > { %p3677_p12 = pnand %p3676_p11, %p3670_p13 }
 0x1b4   : > { %3680 = shalt.err (!%p3677_p12)
}
 0x1b5   : > { %3116 = dma.hbm_to_vmem [thread:$0]  (!%p4304_p5), %s4311_s15, 128, %s614_s9, %s602_s3  }
 0x1b6   : > { %s4713_s21 = sld [smem:[#allocation44_spill]] }
 0x1bc   : > { %p4714_p4 = scmp.ne.s32.totalorder %s4713_s21, 0 }
 0x1bd   : > { %s4364_s8 = sand.u32 (!%p4714_p4), 1, %s3779_s19   ;;  %p4715_p6 = scmp.ne.s32.totalorder (!%p4714_p4), %s4706_s5, 0 }
 0x1be   : > { %622 = sbr.rel (%p4714_p4) target bundleno = 3390 (0xd3e), region = 80  ;;  %s4367_s2 = sshll.u32 (!%p4714_p4), %s4364_s8, 3 }
 0x1bf   : > { %s625_s4 = scalar_lea.sflag (!%p4714_p4), [#allocation7], %s4364_s8  ;;  %s628_s6 = scalar_lea.vmem (!%p4714_p4), [#allocation6], %s4367_s2 }
 0x1c5   : > { %3734 = dma.done.wait (%p4715_p6), %s625_s4, 128  }
 0x1c6   : > { %3736 = vsyncadd (%p4715_p6), %s625_s4, 4294967168  ;;  %s4716_s24 = sld [smem:[#allocation43_spill]]  ;;  %s637_s3 = scalar_lea.vmem [#allocation9], %s4367_s2 }
 0x1cc   : > { %s633_s15 = sand.u32 1, %s4716_s24  }
 0x1cd   : > { %s634_s9 = scalar_lea.sflag [#allocation10], %s633_s15 }
 0x1ce   : > { %3738 = dma.done.wait (%p4715_p6), %s634_s9, 128  }
 0x1cf   : > { %3740 = vsyncadd (%p4715_p6), %s634_s9, 4294967168  ;;  %p4717_p5 = scmp.eq.s32.totalorder %s4716_s24, 0 }
 0x1d1   : > { %3742 = dma.done.wait (%p4717_p5), [#allocation10], 16   ;;  %p4718_p7 = pmov %p4717_p5 }
 0x1d2   : > { %p4719_p0 = pmov %p4717_p5 }
 0x1d3   : > { %3744 = vsyncadd (%p4718_p7), [#allocation10], 4294967280 }
 0x1d4   : > { %3746 = dma.done.wait (%p4719_p0), [#allocation13], 272   ;;  %p4720_p8 = pmov %p4719_p0 }
 0x1d5   : > { %p4721_p9 = pmov %p4719_p0 }
 0x1d6   : > { %3748 = vsyncadd (%p4720_p8), [#allocation13], 4294967024 }
 0x1d7   : > { %3750 = dma.done.wait (%p4721_p9), [#allocation16], 1024   ;;  %p4722_p1 = pmov %p4719_p0 }
 0x1d8   : > { %p4723_p3 = pmov %p4719_p0 }
 0x1d9   : > { %3752 = vsyncadd (%p4722_p1), [#allocation16], 4294966272 }
 0x1da   : > { %3754 = dma.done.wait (%p4723_p3), [#allocation19], 32   ;;  %p4724_p10 = pmov %p4719_p0 }
 0x1db   : > { %p4725_p13 = pmov %p4719_p0 }
 0x1dc   : > { %3756 = vsyncadd (%p4724_p10), [#allocation19], 4294967264 }
 0x1dd   : > { %3758 = dma.done.wait (%p4725_p13), [#allocation22], 1280   ;;  %p4726_p2 = pmov %p4719_p0 }
 0x1de   : > { %p4727_p11 = pmov %p4719_p0 }
 0x1df   : > { %3760 = vsyncadd (%p4726_p2), [#allocation22], 4294966016 }
 0x1e0   : > { %3762 = dma.done.wait (%p4727_p11), [#allocation25], 576   ;;  %p4728_p12 = pmov %p4719_p0 }
 0x1e1   : > { %p4729_p4 = pmov %p4719_p0 }
 0x1e2   : > { %3764 = vsyncadd (%p4728_p12), [#allocation25], 4294966720 }
 0x1e3   : > { %3766 = dma.done.wait (%p4729_p4), [#allocation28], 256   ;;  %p4730_p6 = pmov %p4719_p0 }
 0x1e4   : > { %vm746_vm0 = vcmask 261120   ;;  %v4409_v0 = vld [vmem:[%s628_s6] sm:$0xff]  ;;  %v3816_v8 = vmov 0.0   ;;  %vm3817_vm1 = vmmov 0   ;;  %v3818_v10 = vmov 0.0|0.0   ;;  %v852_v19 = vld [vmem:[#allocation15] sm:$0xff] }
 0x1e5   : > { %3768 = vsyncadd (%p4730_p6), [#allocation28], 4294967040  ;;  %v764_v1 = vsel %vm746_vm0, %v4409_v0, 0.0  ;;  %v3223_v7 = vld [vmem:[#allocation14] sm:$0xff]   ;;  %2834 = vmatprep.subr.bf16.mxu0 %v3816_v8  ;;  %747 = vst.msk [vmem:[#allocation2] sm:$0xff] %vm746_vm0, %v3816_v8  ;;  %2838 = vmatprep.mubr.msk.bf16.mxu0 %vm3817_vm1, %v3816_v8  ;;  %v3224_v9 = vld [vmem:[#allocation14 + $0x8] sm:$0xff]  }
 0x1e6   : > { %765 = vadd.xlane.f32.xlu0 %v764_v1  ;;  %750 = vst.msk [vmem:[#allocation4] sm:$0xff] %vm746_vm0, %v3816_v8  ;;  %2835 = vmatpush3.bf16.msra.mxu0 %v3223_v7  ;;  %v2725_v15 = vld [vmem:[#allocation11] ss:$0 sm:$0xff]  ;;  %v2726_v17 = vld [vmem:[#allocation12] ss:$0 sm:$0xff]  ;;  %v854_v24 = vld [vmem:[#allocation15 + $0x10] sm:$0xff] }
 0x1e7   : > { %2869 = vmatprep.subr.mxu1 %v3816_v8  ;;  %2836 = vmatprep.subr.bf16.mxu0 %v3816_v8  ;;  %v853_v20 = vld [vmem:[#allocation15 + $0x8] sm:$0xff]  ;;  %v855_v25 = vld [vmem:[#allocation15 + $0x18] sm:$0xff]  ;;  %v3819_v28 = vmov 0   ;;  %s3820_s5 = smov 96   ;;  %v4454_v40 = vld [vmem:[#allocation26] sm:$0xf] }
 0x1e8   : > { %2871 = vmatprep.mubr.msk.f32.mxu1 %vm3817_vm1, %v3816_v8  ;;  %v2985_v22 = vpack.c.bf16 %v853_v20, %v852_v19  ;;  %v2988_v26 = vpack.c.bf16 %v855_v25, %v854_v24  ;;  %v753_v27 = vld [vmem:[%s637_s3] sm:$0xff]  ;;  %3221 = vset.pattern.permute.xlu1 %v3819_v28  ;;  %v754_v29 = vld [vmem:[#allocation24] sm:$0xff]  ;;  %v757_v33 = vld [vmem:[#allocation24 + $0x18] sm:$0xff]  ;;  %vm1036_vm2 = vcmask 1043456   ;;  %vm748_vm3 = vcmask 31744   ;;  %s3821_s16 = smov 124  }
 0x1e9   : > { %3222 = vset.pattern.permute.xlu0 %v3819_v28  ;;  %1024 = vperm.xlu1 %3221, %v753_v27   ;;  %v755_v30 = vld [vmem:[#allocation24 + $0x8] sm:$0xff]  ;;  %v756_v32 = vld [vmem:[#allocation24 + $0x10] sm:$0xff]  ;;  %749 = vst.msk [vmem:[#allocation3] sm:$0xff] %vm748_vm3, %v3816_v8  ;;  %751 = vst.msk [vmem:[#allocation5] sm:$0xff] %vm748_vm3, %v3816_v8  ;;  %vm1186_vm6 = vcmask 64512   ;;  %s3822_s29 = smov 64  }
 0x1ea   : > { %2837 = vmatpush3.bf16.msra.mxu0 %v3224_v9  ;;  %v4434_v31 = vpack.c.bf16 %v755_v30, %v754_v29  ;;  %v4442_v37 = vpack.c.bf16 %v757_v33, %v756_v32  ;;  %2870 = vmatpush3.msk.msra.mxu1 %vm1036_vm2, %v4454_v40  ;;  %v1558_v24 = vld [vmem:[#allocation17 + $0x10] sm:$0xff]  ;;  %v1559_v25 = vld [vmem:[#allocation17 + $0x18] sm:$0xff]  ;;  %s4731_s10 = sld [smem:[#allocation42_spill]]  ;;  %s740_s28 = scalar_lea.vmem [#allocation30], %s4367_s2 }
 0x1eb   : > { %2984 = vmatprep.subr.bf16.mxu0 %v3818_v10  ;;  %2884 = vmatprep.subr.mxu1 %v3816_v8  ;;  %s2460_s30 = sshll.u32 %s740_s28, 4  ;;  %s4732_s4 = sld [smem:[#allocation56_spill]]  ;;  %s4588_s30 = int_to_ptr.vmem [resolvable:$true] %s2460_s30 }
 0x1ec   : > { %s2446_s2 = scalar_lea.sflag [#allocation8], %s4364_s8  ;;  %s3681_s24 = scalar_lea.vmem %s4588_s30, 128 }
 0x1ed   : > { %p3682_p5 = scmp.ne.s32.totalorder %s4588_s30, %s3681_s24  ;;  %p4733_p7 = scmp.ne.s32.totalorder %s4707_s25, 0 }
 0x1ee   : > { %s3823_s15 = smov [#allocation30]  }
 0x1ef   : > { %p3683_p0 = pnand %p3682_p5, %p4733_p7  ;;  %s3685_s9 = sshll.u32 %s3823_s15, 4  ;;  %s3686_s9 = int_to_ptr.vmem [resolvable:$false] %s3685_s9 }
 0x1f0   : > { %v1333_v62 = vld [vmem:[#allocation3] sm:$0xff]  ;;  %s2768_s26 = sshll.u32 %s4731_s10, 7  ;;  %s3687_s3 = scalar_lea.vmem %s3686_s9, 256 }
 0x1f1   : > { %s4586_s6 = scalar_lea.hbm %s4732_s4, %s2768_s26  ;;  %p3684_p8 = pneg %p3683_p0 }
 0x1f2   : > { %p3688_p9 = scmp.lt.s32.totalorder %s4588_s30, %s3686_s9  ;;  %p3689_p1 = scmp.lt.s32.totalorder %s3687_s3, %s3681_s24 }
 0x1f4   : > { %p3690_p3 = por %p3689_p1, %p3688_p9 }
 0x1f6   : > { %p3691_p10 = pnand %p3690_p3, %p3684_p8 }
 0x268   : > { %v4467_v55 = vpop.permute.xlu1 %1024 }
 0x273   : > { %v766_v2 = vpop.xlane.xlu0 %765 }
 0x274   : > { %v768_v3 = vmul.f32 0.03125, %v766_v2 }
 0x276   : > { %v769_v4 = vsub.f32 %v4409_v0, %v768_v3  ;;  %v4477_v3 = vld [vmem:[#allocation29] sm:$0xff] }
 0x278   : > { %v770_v5 = vmul.f32 %v769_v4, %v769_v4 }
 0x27a   : > { %v771_v6 = vsel %vm746_vm0, %v770_v5, 0.0 }
 0x27b   : > { %772 = vadd.xlane.f32.xlu0 %v771_v6 }
 0x308   : > { %v773_v11 = vpop.xlane.xlu0 %772 }
 0x309   : > { %v774_v12 = vmul.f32 0.03125, %v773_v11  ;;  %v1185_v11 = vld [vmem:[#allocation2] sm:$0xff] }
 0x30b   : > { %v775_v13 = vadd.f32 1e-05, %v774_v12 }
 0x30d   : > { %3235 = vrsqrt.f32 %v775_v13 }
 0x317   : > { %v3236_v14 = vpop.eup %3235 }
 0x318   : > { %v777_v16 = vmul.f32 %v3236_v14, %v769_v4  ;;  %v4484_v4 = vld [vmem:[#allocation27] sm:$0xff] }
 0x31a   : > { %v784_v18 = vmul.f32 %v2725_v15, %v777_v16 }
 0x31c   : > { %v791_v21 = vadd.f32 %v2726_v17, %v784_v18 }
 0x31e   : > { %v792_v23 = vpack.c.bf16 %v791_v21, %v791_v21  ;;  %v1556_v21 = vld [vmem:[#allocation17] sm:$0xff] }
 0x320   : > { %2839 = vmatmul.mubr.msk.bf16.vlgmr.msra.gmra.mrb[0].mxu0 %vm746_vm0, %v792_v23 }
 0x321   : > { %2986 = vmatpush3.bf16.msra.mxu0 %v2985_v22  ;;  %2850 = vmatprep.mubr.msk.f32.mxu0 %vm3817_vm1, %v3816_v8  ;;  %v1557_v22 = vld [vmem:[#allocation17 + $0x8] sm:$0xff] }
 0x322   : > { %2987 = vmatprep.subr.bf16.mxu0 %v3818_v10  ;;  %v2997_v23 = vpack.c.bf16 %v1557_v22, %v1556_v21 }
 0x325   : > { %2989 = vmatpush3.bf16.msra.mxu0 %v2988_v26  ;;  %v3000_v26 = vpack.c.bf16 %v1559_v25, %v1558_v24  ;;  %v3225_v25 = vld [vmem:[#allocation21] sm:$0xff]  }
 0x326   : > { %2990 = vmatprep.subr.bf16.mxu0 %v3818_v10 }
 0x3f3   : > { %v4436_v34 = vpop.f32.mrb[0].mxu0 }
 0x3f4   : > { %1552 = vrot.lane.b32.xlu0 %v4436_v34, %s3820_s5  ;;  %v2840_v35 = vpop.f32.mrb[1].mxu0  ;;  %2851 = vmatmul.mubr.msk.f32.vlgmr.msra.gmra.mrb[4].mxu0 %vm746_vm0, %v4436_v34  ;;  %v929_v39 = vmul.f32 %v4436_v34, %v4436_v34 }
 0x3f5   : > { %2992 = vmatpush3.bf16.msra.mxu0 %v4434_v31  ;;  %v849_v36 = vpop.f32.mrb[2].mxu0  ;;  %2861 = vmatprep.mubr.msk.f32.mxu0 %vm3817_vm1, %v3816_v8 }
 0x3f6   : > { %v2841_v38 = vpop.f32.mrb[3].mxu0  ;;  %2993 = vmatprep.subr.bf16.mxu0 %v3818_v10 }
 0x3f9   : > { %2995 = vmatpush3.bf16.msra.mxu0 %v4442_v37 }
 0x3fa   : > { %2864 = vmatprep.subr.mxu0 %v3816_v8 }
 0x3fc   : > { %2862 = vmatmul.mubr.msk.f32.vlgmr.msra.gmra.mrb[6].mxu0 %vm746_vm0, %v929_v39 }
 0x3fd   : > { %2866 = vmatprep.mubr.msk.f32.mxu0 %vm3817_vm1, %v3816_v8  ;;  %2865 = vmatpush3.msk.msra.mxu0 %vm1036_vm2, %v4454_v40 }
 0x3fe   : > { %2874 = vmatprep.subr.mxu0 %v3816_v8 }
 0x466   : > { %v1553_v32 = vpop.permute.xlu0 %1552 }
 0x4c7   : > { %v925_v41 = vpop.f32.mrb[4].mxu0 }
 0x4c8   : > { %1017 = vrot.lane.b32.xlu1 %v925_v41, %s3821_s16  ;;  %v2852_v42 = vpop.f32.mrb[5].mxu0  ;;  %v1003_v43 = vmul.f32 0.125, %v925_v41 }
 0x4ca   : > { %v1004_v44 = vmul.f32 %v1003_v43, %v925_v41 }
 0x4cf   : > { %v999_v45 = vpop.f32.mrb[6].mxu0 }
 0x4d0   : > { %v1005_v46 = vsub.f32 %v999_v45, %v1004_v44  ;;  %v2863_v47 = vpop.f32.mrb[7].mxu0 }
 0x4d2   : > { %v1006_v48 = vmul.f32 0.14285715, %v1005_v46 }
 0x4d4   : > { %3237 = vrsqrt.f32 %v1006_v48  ;;  %vm1009_vm4 = vcmp.eq.f32.partialorder %v1006_v48, inf  ;;  %v1012_v52 = vand.u32 2147483648, %v1006_v48  ;;  %vm1011_vm5 = vcmp.eq.f32.partialorder %v1006_v48, 0.0 }
 0x4de   : > { %v3238_v49 = vpop.eup %3237 }
 0x4df   : > { %v1008_v50 = vmul.f32 %v3238_v49, %v1006_v48 }
 0x4e1   : > { %v1010_v51 = vsel %vm1009_vm4, %v1006_v48, %v1008_v50 }
 0x4e2   : > { %v1013_v53 = vsel %vm1011_vm5, %v1012_v52, %v1010_v51 }
 0x4e3   : > { %v1014_v54 = vadd.f32 1e-05, %v1013_v53 }
 0x4e5   : > { %3239 = vrcp.f32 %v1014_v54 }
 0x4ef   : > { %v3240_v56 = vpop.eup %3239 }
 0x53a   : > { %v1018_v57 = vpop.permute.xlu1 %1017 }
 0x53b   : > { %v1020_v58 = vmul.f32 %v3240_v56, %v1018_v57 }
 0x53d   : > { %v1021_v59 = vmul.f32 0.5, %v1020_v58 }
 0x53f   : > { %v1027_v60 = vadd.f32 %v4467_v55, %v1021_v59 }
 0x541   : > { %v1028_v61 = vmul.f32 1.442695, %v1027_v60 }
 0x543   : > { %3241 = vpow2.f32 %v1028_v61 }
 0x54d   : > { %v3242_v63 = vpop.eup %3241 }
 0x54e   : > { %v1030_v1 = vmul.f32 %v3242_v63, %v3240_v56  ;;  %1550 = vst.msk [vmem:[#allocation3] sm:$0xff] %vm748_vm3, %v3242_v63 }
 0x550   : > { %2867 = vmatmul.mubr.msk.f32.vlgmr.msra.gmra.mrb[8].mxu0 %vm748_vm3, %v1030_v1  ;;  %v1031_v2 = vmul.f32 %v1030_v1, %v1003_v43 }
 0x551   : > { %2876 = vmatprep.mubr.msk.f32.mxu0 %vm3817_vm1, %v3816_v8 }
 0x552   : > { %2872 = vmatmul.mubr.msk.f32.vlgmr.msra.gmra.mrb[0].mxu1 %vm748_vm3, %v1031_v2 }
 0x553   : > { %2885 = vmatpush3.msra.mxu1 %v3242_v63  ;;  %2886 = vmatprep.mubr.msk.f32.mxu1 %vm3817_vm1, %v3816_v8  ;;  %v1879_v63 = vld [vmem:[#allocation4] sm:$0xff] }
 0x554   : > { %2889 = vmatprep.subr.mxu1 %v3816_v8 }
 0x556   : > { %2887 = vmatmul.mubr.msk.f32.vlgmr.msra.gmra.mrb[2].mxu1 %vm1186_vm6, %v4477_v3 }
 0x557   : > { %2890 = vmatpush3.msra.mxu1 %v1333_v62  ;;  %2891 = vmatprep.mubr.msk.f32.mxu1 %vm3817_vm1, %v3816_v8 }
 0x558   : > { %2996 = vmatprep.subr.bf16.mxu1 %v3818_v10 }
 0x55a   : > { %2892 = vmatmul.mubr.msk.f32.vlgmr.msra.gmra.mrb[4].mxu1 %vm1186_vm6, %v4484_v4 }
 0x55b   : > { %2907 = vmatprep.mubr.msk.f32.mxu1 %vm3817_vm1, %v3816_v8  ;;  %2998 = vmatpush3.bf16.msra.mxu1 %v2997_v23 }
 0x55c   : > { %2999 = vmatprep.subr.bf16.mxu1 %v3818_v10 }
 0x55f   : > { %3001 = vmatpush3.bf16.msra.mxu1 %v3000_v26  ;;  %v3226_v26 = vld [vmem:[#allocation21 + $0x8] sm:$0xff]  }
 0x560   : > { %2921 = vmatprep.subr.mxu1 %v3816_v8 }
 0x623   : > { %v1106_v5 = vpop.f32.mrb[8].mxu0 }
 0x624   : > { %v1183_v6 = vmul.f32 %v1106_v5, %v4436_v34  ;;  %v2868_v7 = vpop.f32.mrb[9].mxu0 }
 0x625   : > { %v1179_v9 = vpop.f32.mrb[0].mxu1 }
 0x626   : > { %v1184_v12 = vsub.f32 %v1183_v6, %v1179_v9  ;;  %v2873_v13 = vpop.f32.mrb[1].mxu1 }
 0x628   : > { %2875 = vmatpush3.msra.mxu0 %v1184_v12  ;;  %1549 = vst.msk [vmem:[#allocation2] sm:$0xff] %vm746_vm0, %v1184_v12 }
 0x629   : > { %2877 = vmatmul.mubr.msk.f32.vlgmr.msra.gmra.mrb[10].mxu0 %vm1186_vm6, %v4477_v3  ;;  %v1400_v14 = vpop.f32.mrb[2].mxu1  ;;  %2879 = vmatprep.subr.mxu0 %v3816_v8 }
 0x62a   : > { %v2888_v15 = vpop.f32.mrb[3].mxu1  ;;  %2880 = vmatpush3.msra.mxu0 %v1185_v11  ;;  %2881 = vmatprep.mubr.msk.f32.mxu0 %vm3817_vm1, %v3816_v8 }
 0x62b   : > { %2894 = vmatprep.subr.mxu0 %v3816_v8 }
 0x62d   : > { %v1470_v16 = vpop.f32.mrb[4].mxu1 }
 0x62e   : > { %v1471_v17 = vadd.f32 %v1470_v16, %v1400_v14  ;;  %v2893_v18 = vpop.f32.mrb[5].mxu1 }
 0x630   : > { %v1474_v19 = vadd.f32 1e-05, %v1471_v17 }
 0x631   : > { %2882 = vmatmul.mubr.msk.f32.vlgmr.msra.gmra.mrb[10].mxu0 %vm1186_vm6, %v4484_v4 }
 0x632   : > { %3243 = vrcp.f32 %v1474_v19  ;;  %2895 = vmatpush3.msk.msra.mxu0 %vm1036_vm2, %v4454_v40  ;;  %2896 = vmatprep.mubr.msk.f32.mxu0 %vm3817_vm1, %v3816_v8 }
 0x633   : > { %3002 = vmatprep.subr.bf16.mxu0 %v3818_v10 }
 0x63c   : > { %v3244_v20 = vpop.eup %3243 }
 0x63d   : > { %2897 = vmatmul.mubr.msk.f32.vlgmr.msra.gmra.mrb[12].mxu0 %vm748_vm3, %v3244_v20 }
 0x63e   : > { %3004 = vmatpush3.bf16.msra.mxu0 %v4434_v31  ;;  %2918 = vmatprep.mubr.msk.f32.mxu0 %vm3817_vm1, %v3816_v8 }
 0x63f   : > { %3005 = vmatprep.subr.bf16.mxu0 %v3818_v10 }
 0x642   : > { %3007 = vmatpush3.bf16.msra.mxu0 %v4442_v37 }
 0x643   : > { %2926 = vmatprep.subr.mxu0 %v3816_v8 }
 0x704   : > { %v1329_v27 = vpop.f32.mrb[10].mxu0 }
 0x705   : > { %v2883_v28 = vpop.f32.mrb[11].mxu0 }
 0x706   : > { %v3229_v28 = vld [vmem:[#allocation23 + $0x10] sm:$0xff]  }
 0x710   : > { %v1545_v29 = vpop.f32.mrb[12].mxu0 }
 0x711   : > { %v1551_v30 = vmul.f32 %v1545_v29, %v1329_v27  ;;  %v2898_v31 = vpop.f32.mrb[13].mxu0  ;;  %v3228_v27 = vld [vmem:[#allocation23 + $0x8] sm:$0xff]  }
 0x713   : > { %v1555_v33 = vmul.f32 %v1553_v32, %v1551_v30 }
 0x715   : > { %v1633_v35 = vmul.f32 %v1555_v33, %v1555_v33  ;;  %2908 = vmatmul.mubr.msk.f32.vlgmr.msra.gmra.mrb[6].mxu1 %vm746_vm0, %v1555_v33 }
 0x716   : > { %2922 = vmatpush3.msk.msra.mxu1 %vm1036_vm2, %v4454_v40  ;;  %2923 = vmatprep.mubr.msk.f32.mxu1 %vm3817_vm1, %v3816_v8 }
 0x717   : > { %2919 = vmatmul.mubr.msk.f32.vlgmr.msra.gmra.mrb[14].mxu0 %vm746_vm0, %v1633_v35  ;;  %2931 = vmatprep.subr.mxu1 %v3816_v8 }
 0x718   : > { %2927 = vmatpush3.msk.msra.mxu0 %vm1036_vm2, %v4454_v40  ;;  %2928 = vmatprep.mubr.msk.f32.mxu0 %vm3817_vm1, %v3816_v8 }
 0x719   : > { %2941 = vmatprep.subr.mxu0 %v3816_v8 }
 0x7e8   : > { %v1629_v10 = vpop.f32.mrb[6].mxu1 }
 0x7e9   : > { %v1707_v36 = vmul.f32 0.125, %v1629_v10  ;;  %1721 = vrot.lane.b32.xlu1 %v1629_v10, %s3821_s16  ;;  %v2909_v37 = vpop.f32.mrb[7].mxu1 }
 0x7ea   : > { %v1703_v38 = vpop.f32.mrb[14].mxu0 }
 0x7eb   : > { %v1708_v39 = vmul.f32 %v1707_v36, %v1629_v10  ;;  %v2920_v41 = vpop.f32.mrb[15].mxu0  ;;  %v2755_v10 = vld [vmem:[#allocation20] ss:$0 sm:$0xff] }
 0x7ec   : > { %v3231_v41 = vld [vmem:[#allocation23 + $0x20] sm:$0xff]  }
 0x7ed   : > { %v1709_v42 = vsub.f32 %v1703_v38, %v1708_v39  ;;  %2239 = vrot.lane.b32.xlu1 %v4436_v34, %s3822_s29  ;;  %v2020_v34 = vld [vmem:[#allocation5] sm:$0xff]  ;;  %v3230_v39 = vld [vmem:[#allocation23 + $0x18] sm:$0xff]  }
 0x7ef   : > { %v1710_v43 = vmul.f32 0.14285715, %v1709_v42  ;;  %v3232_v42 = vld [vmem:[#allocation23 + $0x28] sm:$0xff]  }
 0x7f1   : > { %3245 = vrsqrt.f32 %v1710_v43  ;;  %vm1713_vm7 = vcmp.eq.f32.partialorder %v1710_v43, inf  ;;  %v1716_v47 = vand.u32 2147483648, %v1710_v43  ;;  %vm1715_vm8 = vcmp.eq.f32.partialorder %v1710_v43, 0.0 }
 0x7fb   : > { %v3246_v44 = vpop.eup %3245 }
 0x7fc   : > { %v1712_v45 = vmul.f32 %v3246_v44, %v1710_v43  ;;  %v3234_v44 = vld [vmem:[#allocation23 + $0x38] sm:$0xff]  }
 0x7fe   : > { %v1714_v46 = vsel %vm1713_vm7, %v1710_v43, %v1712_v45  ;;  %v3233_v43 = vld [vmem:[#allocation23 + $0x30] sm:$0xff]  }
 0x7ff   : > { %v1717_v48 = vsel %vm1715_vm8, %v1716_v47, %v1714_v46 }
 0x800   : > { %v1718_v49 = vadd.f32 1e-05, %v1717_v48 }
 0x802   : > { %3247 = vrcp.f32 %v1718_v49 }
 0x80c   : > { %v3248_v50 = vpop.eup %3247 }
 0x85b   : > { %v1722_v51 = vpop.permute.xlu1 %1721 }
 0x85c   : > { %v1724_v52 = vmul.f32 %v3248_v50, %v1722_v51 }
 0x85e   : > { %v1725_v53 = vmul.f32 0.5, %v1724_v52 }
 0x85f   : > { %v2240_v17 = vpop.permute.xlu1 %2239 }
 0x860   : > { %v1726_v54 = vadd.f32 %v1725_v53, %v4467_v55 }
 0x862   : > { %v1727_v56 = vmul.f32 1.442695, %v1726_v54 }
 0x864   : > { %3249 = vpow2.f32 %v1727_v56 }
 0x86e   : > { %v3250_v57 = vpop.eup %3249 }
 0x86f   : > { %v1729_v58 = vmul.f32 %v3250_v57, %v3248_v50  ;;  %2237 = vst.msk [vmem:[#allocation5] sm:$0xff] %vm748_vm3, %v3250_v57 }
 0x871   : > { %2924 = vmatmul.mubr.msk.f32.vlgmr.msra.gmra.mrb[8].mxu1 %vm748_vm3, %v1729_v58  ;;  %v1730_v59 = vmul.f32 %v1729_v58, %v1707_v36 }
 0x872   : > { %2933 = vmatprep.mubr.msk.f32.mxu1 %vm3817_vm1, %v3816_v8 }
 0x873   : > { %2929 = vmatmul.mubr.msk.f32.vlgmr.msra.gmra.mrb[16].mxu0 %vm748_vm3, %v1730_v59 }
 0x874   : > { %2942 = vmatpush3.msra.mxu0 %v3250_v57  ;;  %2943 = vmatprep.mubr.msk.f32.mxu0 %vm3817_vm1, %v3816_v8 }
 0x875   : > { %2946 = vmatprep.subr.mxu0 %v3816_v8 }
 0x877   : > { %2944 = vmatmul.mubr.msk.f32.vlgmr.msra.gmra.mrb[18].mxu0 %vm1186_vm6, %v4477_v3 }
 0x878   : > { %2947 = vmatpush3.msra.mxu0 %v2020_v34  ;;  %2948 = vmatprep.mubr.msk.f32.mxu0 %vm3817_vm1, %v3816_v8 }
 0x879   : > { %2956 = vmatprep.subr.bf16.mxu0 %v3816_v8 }
 0x87b   : > { %2949 = vmatmul.mubr.msk.f32.vlgmr.msra.gmra.mrb[20].mxu0 %vm1186_vm6, %v4484_v4 }
 0x87c   : > { %2960 = vmatprep.mubr.msk.bf16.mxu0 %vm3817_vm1, %v3816_v8  ;;  %2957 = vmatpush3.bf16.msra.mxu0 %v3225_v25 }
 0x87d   : > { %2958 = vmatprep.subr.bf16.mxu0 %v3816_v8 }
 0x880   : > { %2959 = vmatpush3.bf16.msra.mxu0 %v3226_v26 }
 0x944   : > { %v1800_v55 = vpop.f32.mrb[8].mxu1 }
 0x945   : > { %v1877_v60 = vmul.f32 %v1800_v55, %v1555_v33  ;;  %v2925_v61 = vpop.f32.mrb[9].mxu1  ;;  %v2754_v33 = vld [vmem:[#allocation18] ss:$0 sm:$0xff] }
 0x946   : > { %v1873_v62 = vpop.f32.mrb[16].mxu0 }
 0x947   : > { %v1878_v1 = vsub.f32 %v1877_v60, %v1873_v62  ;;  %v2930_v2 = vpop.f32.mrb[17].mxu0 }
 0x949   : > { %2932 = vmatpush3.msra.mxu1 %v1878_v1  ;;  %2236 = vst.msk [vmem:[#allocation4] sm:$0xff] %vm746_vm0, %v1878_v1 }
 0x94a   : > { %2934 = vmatmul.mubr.msk.f32.vlgmr.msra.gmra.mrb[10].mxu1 %vm1186_vm6, %v4477_v3  ;;  %v2087_v5 = vpop.f32.mrb[18].mxu0  ;;  %2936 = vmatprep.subr.mxu1 %v3816_v8 }
 0x94b   : > { %v2945_v6 = vpop.f32.mrb[19].mxu0  ;;  %2937 = vmatpush3.msra.mxu1 %v1879_v63  ;;  %2938 = vmatprep.mubr.msk.f32.mxu1 %vm3817_vm1, %v3816_v8 }
 0x94c   : > { %2951 = vmatprep.subr.mxu1 %v3816_v8 }
 0x94e   : > { %v2157_v7 = vpop.f32.mrb[20].mxu0 }
 0x94f   : > { %v2158_v9 = vadd.f32 %v2157_v7, %v2087_v5  ;;  %v2950_v11 = vpop.f32.mrb[21].mxu0 }
 0x951   : > { %v2161_v12 = vadd.f32 1e-05, %v2158_v9 }
 0x952   : > { %2939 = vmatmul.mubr.msk.f32.vlgmr.msra.gmra.mrb[10].mxu1 %vm1186_vm6, %v4484_v4 }
 0x953   : > { %3251 = vrcp.f32 %v2161_v12  ;;  %2952 = vmatpush3.msk.msra.mxu1 %vm1036_vm2, %v4454_v40  ;;  %2953 = vmatprep.mubr.msk.f32.mxu1 %vm3817_vm1, %v3816_v8 }
 0x954   : > { %2964 = vmatprep.subr.bf16.mxu1 %v3816_v8 }
 0x95d   : > { %v3252_v3 = vpop.eup %3251 }
 0x95e   : > { %2954 = vmatmul.mubr.msk.f32.vlgmr.msra.gmra.mrb[12].mxu1 %vm748_vm3, %v3252_v3 }
 0x95f   : > { %2980 = vmatprep.mubr.msk.bf16.mxu1 %vm3817_vm1, %v3816_v8 }
 0xa25   : > { %v2016_v13 = vpop.f32.mrb[10].mxu1 }
 0xa26   : > { %v2940_v14 = vpop.f32.mrb[11].mxu1 }
 0xa31   : > { %v2232_v15 = vpop.f32.mrb[12].mxu1 }
 0xa32   : > { %v2238_v16 = vmul.f32 %v2232_v15, %v2016_v13  ;;  %v2955_v4 = vpop.f32.mrb[13].mxu1 }
 0xa34   : > { %v2242_v18 = vmul.f32 %v2240_v17, %v2238_v16 }
 0xa36   : > { %v4565_v40 = vadd.f32 %v2242_v18, %v4409_v0  ;;  %v3227_v0 = vld [vmem:[#allocation23] sm:$0xff]  }
 0xa37   : > { %2965 = vmatpush3.bf16.msra.mxu1 %v3227_v0 }
 0xa38   : > { %v2246_v19 = vsel %vm746_vm0, %v4565_v40, 0.0  ;;  %2966 = vmatprep.subr.bf16.mxu1 %v3816_v8 }
 0xa39   : > { %2247 = vadd.xlane.f32.xlu1 %v2246_v19 }
 0xa3b   : > { %2967 = vmatpush3.bf16.msra.mxu1 %v3228_v27 }
 0xa3c   : > { %2968 = vmatprep.subr.bf16.mxu1 %v3816_v8 }
 0xa3f   : > { %2969 = vmatpush3.bf16.msra.mxu1 %v3229_v28 }
 0xa40   : > { %2970 = vmatprep.subr.bf16.mxu1 %v3816_v8 }
 0xa43   : > { %2971 = vmatpush3.bf16.msra.mxu1 %v3230_v39 }
 0xa44   : > { %2972 = vmatprep.subr.bf16.mxu1 %v3816_v8 }
 0xa47   : > { %2973 = vmatpush3.bf16.msra.mxu1 %v3231_v41 }
 0xa48   : > { %2974 = vmatprep.subr.bf16.mxu1 %v3816_v8 }
 0xa4b   : > { %2975 = vmatpush3.bf16.msra.mxu1 %v3232_v42 }
 0xa4c   : > { %2976 = vmatprep.subr.bf16.mxu1 %v3816_v8 }
 0xa4f   : > { %2977 = vmatpush3.bf16.msra.mxu1 %v3233_v43 }
 0xa50   : > { %2978 = vmatprep.subr.bf16.mxu1 %v3816_v8 }
 0xa53   : > { %2979 = vmatpush3.bf16.msra.mxu1 %v3234_v44 }
 0xac6   : > { %v2248_v20 = vpop.xlane.xlu1 %2247 }
 0xac7   : > { %v2249_v21 = vmul.f32 0.03125, %v2248_v20 }
 0xac9   : > { %v2250_v22 = vsub.f32 %v4565_v40, %v2249_v21 }
 0xacb   : > { %v2251_v23 = vmul.f32 %v2250_v22, %v2250_v22 }
 0xacd   : > { %v2252_v24 = vsel %vm746_vm0, %v2251_v23, 0.0 }
 0xace   : > { %2253 = vadd.xlane.f32.xlu0 %v2252_v24 }
 0xb5b   : > { %v2254_v29 = vpop.xlane.xlu0 %2253 }
 0xb5c   : > { %v2255_v30 = vmul.f32 0.03125, %v2254_v29 }
 0xb5e   : > { %v2256_v31 = vadd.f32 1e-05, %v2255_v30 }
 0xb60   : > { %3253 = vrsqrt.f32 %v2256_v31 }
 0xb6a   : > { %v3254_v32 = vpop.eup %3253 }
 0xb6b   : > { %v2258_v35 = vmul.f32 %v3254_v32, %v2250_v22 }
 0xb6d   : > { %v2265_v36 = vmul.f32 %v2754_v33, %v2258_v35 }
 0xb6f   : > { %v2272_v37 = vadd.f32 %v2755_v10, %v2265_v36 }
 0xb71   : > { %v2273_v38 = vpack.c.bf16 %v2272_v37, %v2272_v37 }
 0xb73   : > { %2961 = vmatmul.mubr.msk.bf16.vlgmr.msra.gmra.mrb[24].mxu0 %vm746_vm0, %v2273_v38 }
 0xc46   : > { %v2327_v45 = vpop.f32.mrb[24].mxu0 }
 0xc47   : > { %v2334_v46 = vmul.f32 0.70710677, %v2327_v45  ;;  %v2962_v47 = vpop.f32.mrb[25].mxu0  ;;  %v2333_v51 = vmul.f32 0.5, %v2327_v45 }
 0xc48   : > { %v2330_v48 = vpop.f32.mrb[26].mxu0 }
 0xc49   : > { %3255 = verf.f32 %v2334_v46  ;;  %v2963_v49 = vpop.f32.mrb[27].mxu0 }
 0xc53   : > { %v3256_v50 = vpop.eup %3255 }
 0xc54   : > { %v2336_v52 = vadd.f32 1.0, %v3256_v50 }
 0xc56   : > { %v2337_v53 = vmul.f32 %v2336_v52, %v2333_v51 }
 0xc58   : > { %v2338_v54 = vpack.c.bf16 %v2337_v53, %v2337_v53 }
 0xc5a   : > { %2981 = vmatmul.mubr.bf16.vlgmr.msra.gmra.mrb[16].mxu1 %v2338_v54 }
 0xd2d   : > { %v2437_v8 = vpop.f32.mrb[16].mxu1 }
 0xd2e   : > { %v2443_v56 = vadd.f32 %v2437_v8, %v4565_v40  ;;  %v2982_v34 = vpop.f32.mrb[17].mxu1 }
 0xd2f   : > { %v2440_v57 = vpop.f32.mrb[18].mxu1 }
 0xd30   : > { %v2983_v58 = vpop.f32.mrb[19].mxu1  ;;  %2444 = vst.msk [vmem:[%s740_s28] sm:$0xff] %vm746_vm0, %v2443_v56 }
 0xd31   : > { %3694 = shalt.err (!%p3691_p10)
}
 0xd32   : > { %s3695_s8 = scalar_lea.hbm %s4586_s6, 128  ;;  %s3699_s29 = scalar_lea.hbm %s4732_s4, 256 }
 0xd33   : > { %p3696_p13 = scmp.ne.s32.totalorder %s4586_s6, %s3695_s8  ;;  %p3700_p12 = scmp.lt.u32.totalorder %s4586_s6, %s4732_s4 }
 0xd34   : > { %p3701_p4 = scmp.lt.u32.totalorder %s3699_s29, %s3695_s8  ;;  %p3703_p5 = scmp.lt.u32.totalorder %s3695_s8, %s4586_s6 }
 0xd35   : > { %p3697_p2 = pnand %p3696_p13, %p4733_p7 }
 0xd36   : > { %p3702_p6 = por %p3701_p4, %p3700_p12 }
 0xd37   : > { %p3698_p11 = pneg %p3697_p2 }
 0xd38   : > { %p3704_p0 = por %p3703_p5, %p3702_p6 }
 0xd3a   : > { %p3705_p8 = pnand %p3704_p0, %p3698_p11 }
 0xd3c   : > { %3708 = shalt.err (!%p3705_p8)
}
 0xd3d   : > { %3068 = dma.vmem_to_hbm [thread:$0]  (%p4733_p7), %s4588_s30, 128, %s4586_s6, %s2446_s2  }
 0xd3e PF: > { %s4734_s28 = sld [smem:[#allocation41_spill]]  ;;  %p4735_p9 = scmp.ne.s32.totalorder %s4708_s17, 0 }
 0xd3f   : > { %p4736_p1 = scmp.ge.s32.totalorder %s3795_s23, 2 }
 0xd41   : > { %p3118_p3 = pnand %p4736_p1, %p4735_p9 }
 0xd44   : > { %s2472_s18 = sand.u32 1, %s4734_s28  }
 0xd45   : > { %s2473_s21 = scalar_lea.sflag [#allocation8], %s2472_s18 }
 0xd46   : > { %3770 = dma.done.wait (!%p3118_p3), %s2473_s21, 128  }
 0xd47   : > { %3772 = vsyncadd (!%p3118_p3), %s2473_s21, 4294967168  ;;  %s40_s23 = sadd.s32 1, %s3795_s23   ;;  %s4737_s18 = smov %s3779_s19 }
 0xd48   : > { %p37_p10 = scmp.ge.s32.totalorder %s40_s23, 4   ;;  %s4738_s19 = smov %s3783_s20 }
 0xd49   : > { %s4739_s20 = smov %s4284_s1  ;;  %s4740_s21 = smov %s3791_s22 }
 0xd4a   : > { %s4741_s22 = smov %s4743_s0  ;;  %39 = sbr.rel (!%p37_p10) target bundleno = 27 (0x1b), region = 194 }
 0xd51   :  { %2478 = vsyncpa [#allocation7], 1 }
 0xd52   :  { %2480 = vsyncpa [#allocation7 + $0x1], 1 }
 0xd53   :  { %2481 = vsyncpa [#allocation10], 1 }
 0xd54   :  { %2483 = vsyncpa [#allocation10 + $0x1], 1 }
 0xd55   :  { %2484 = vsyncpa [#allocation13], 1 }
 0xd56   :  { %2485 = vsyncpa [#allocation16], 1 }
 0xd57   :  { %2486 = vsyncpa [#allocation19], 1 }
 0xd58   :  { %2487 = vsyncpa [#allocation22], 1 }
 0xd59   :  { %2488 = vsyncpa [#allocation25], 1 }
 0xd5a   :  { %2489 = vsyncpa [#allocation28], 1 }
 0xd5b   :  { %2490 = vsyncpa [#allocation8], 1 }
 0xd5c   :  { %2492 = vsyncpa [#allocation8 + $0x1], 1 }

</bundles_post_ra>
